<compile_context>
chip_gen: v7x
topology: tpu7x:2x2x1
jax: 0.10.0
libtpu: 0.0.40
codegen_flags: <defaults>
</compile_context>

<pallas_src>
import numpy as np

import jax
import jax.numpy as jnp
from jax import lax
from jax.experimental import pallas as pl
from jax.experimental.pallas import tpu as pltpu


# ---------------------------------------------------------------------------
# Pallas kernel 1: fc  (N,512) @ (512,1024) + b   (bf16 operands, f32 accumulate)
# ---------------------------------------------------------------------------
def _fc_kernel(x_ref, w_ref, b_ref, o_ref):
    o_ref[...] = jnp.dot(x_ref[...].astype(jnp.bfloat16), w_ref[...],
                         preferred_element_type=jnp.float32) + b_ref[...]


def fc_forward(feat, w_packed, b_packed, *, col_tile=512):
    n, k = feat.shape
    _, p = w_packed.shape
    assert p % col_tile == 0
    return pl.pallas_call(
        _fc_kernel,
        out_shape=jax.ShapeDtypeStruct((n, p), jnp.float32),
        grid=(p // col_tile,),
        in_specs=[
            pl.BlockSpec((n, k), lambda j: (0, 0)),
            pl.BlockSpec((k, col_tile), lambda j: (0, j)),
            pl.BlockSpec((1, col_tile), lambda j: (0, j)),
        ],
        out_specs=pl.BlockSpec((n, col_tile), lambda j: (0, j)),
        compiler_params=pltpu.CompilerParams(dimension_semantics=("parallel",)),
    )(feat, w_packed, b_packed)


# ---------------------------------------------------------------------------
# Pallas kernel 2: fused 5-layer ConvTranspose2d(+ReLU) stack, one grid step per sample.
#
# Activation layout (true column order): X = (Cin*(H+1) rows [padded to mult. of 8],
# Win_pad cols) where each channel plane has one zero pad row, column Wv (one past the
# valid width) is exactly zero, and columns beyond it may hold garbage (never read for
# valid outputs).  Per layer:
#   xs  = column-successor of x (concat of two lane slices; wrap column only feeds pad)
#   ze  = A0 @ x             -> even output columns   (kx=1 taps)
#   zo  = A1 @ x + A2 @ xs   -> odd output columns    (kx=2 and kx=0 taps)
#   z   = [ze | zo] + bias_map ; ReLU (except last layer)
#   x   = z @ P              -> restore true (interleaved) column order (one 0/1 matmul)
# The last layer writes z directly (lane-dense, [even|odd] halves); the wrapper
# interleaves/crops.
# ---------------------------------------------------------------------------
_N_LAYERS = 5


def _deconv_stack_kernel(x_ref, *refs):
    *wrefs, o_ref = refs
    x = x_ref[0].astype(jnp.bfloat16)                   # (128, 8) padded fc output
    idx = 0
    for l in range(_N_LAYERS):
        a_ref = wrefs[idx]; idx += 1                    # (3, Rout_pad, Rin_pad) bf16
        p_ref = None
        if l < _N_LAYERS - 1:
            p_ref = wrefs[idx]; idx += 1                # (2*Wp, 2*Wp) bf16 interleave
        b_ref = wrefs[idx]; idx += 1                    # (Rout_pad, 2*Wp) f32 bias map

        # column successor (col n -> col n+1); the wrapped column only feeds garbage.
        xs = jnp.concatenate([x[:, 1:], x[:, :1]], axis=1)

        ze = jnp.dot(a_ref[0], x, preferred_element_type=jnp.float32)
        zo = (jnp.dot(a_ref[1], x, preferred_element_type=jnp.float32)
              + jnp.dot(a_ref[2], xs, preferred_element_type=jnp.float32))
        z = jnp.concatenate([ze, zo], axis=1) + b_ref[...]    # f32 bias add

        if l < _N_LAYERS - 1:
            z = jnp.maximum(z, 0.0)                           # f32 ReLU
            x = jnp.dot(z.astype(jnp.bfloat16), p_ref[...],
                        preferred_element_type=jnp.float32).astype(jnp.bfloat16)
        else:
            # lane-dense (224, 256) store; rows 224..231 are pad, dropped here (aligned
            # sublane slice); columns stay in [even|odd] half order (wrapper interleaves)
            o_ref[0] = z[:224, :]


def deconv_stack(x0, packed_layers):
    n = x0.shape[0]
    in_specs = [pl.BlockSpec((1, 128, 8), lambda b: (b, 0, 0))]
    args = [x0]
    for layer in packed_layers:
        for arr in layer:
            if arr.ndim == 3:
                in_specs.append(pl.BlockSpec(tuple(arr.shape), lambda b: (0, 0, 0)))
            else:
                in_specs.append(pl.BlockSpec(tuple(arr.shape), lambda b: (0, 0)))
            args.append(arr)
    return pl.pallas_call(
        _deconv_stack_kernel,
        out_shape=jax.ShapeDtypeStruct((n, 224, 256), jnp.float32),
        grid=(n,),
        in_specs=in_specs,
        out_specs=pl.BlockSpec((1, 224, 256), lambda b: (b, 0, 0)),
        compiler_params=pltpu.CompilerParams(
            dimension_semantics=("parallel",),
            vmem_limit_bytes=16 * 1024 * 1024,
        ),
    )(*args)


# ---------------------------------------------------------------------------
# One-time weight packing (pure host-side preprocessing, zero per-call glue)
# ---------------------------------------------------------------------------
def _round_up(v, m):
    return (v + m - 1) // m * m


def _build_layer(w, b, H, rin_pad, win_pad, make_perm):
    """ConvTranspose2d(k=3, s=2, p=1, op=1), sub-pixel decomposition lifted to matmuls.

    out[2m+a, 2n+c] taps: (a=0): (ky=1,dy=0); (a=1): (ky=2,dy=0),(ky=0,dy=1)
                          (c=0): (kx=1,dx=0); (c=1): (kx=2,dx=0),(kx=0,dx=1)
    A[t] folds channel contraction + row shift + row-parity scatter for column tap
    kx(t) with t=0: kx=1 (even cols), t=1: kx=2 (odd cols, dx=0), t=2: kx=0 (odd cols,
    dx=1, applied to the column-shifted input).  Row counts padded to multiples of 8.
    """
    w = np.asarray(w, np.float32)                 # (Cin, Cout, 3, 3) torch layout
    bias = np.asarray(b, np.float32)
    cin, cout = w.shape[0], w.shape[1]
    hp = H + 1                                    # input plane stride (rows / channel)
    hpn = 2 * H + 1                               # output plane stride
    assert cin * hp <= rin_pad
    rout_pad = _round_up(cout * hpn, 8)

    a_mat = np.zeros((3, rout_pad, rin_pad), np.float32)
    kx_of = (1, 2, 0)
    for t in range(3):
        kx = kx_of[t]
        for co in range(cout):
            for ci in range(cin):
                for m in range(H):
                    r_even = co * hpn + 2 * m
                    r_odd = r_even + 1
                    c0 = ci * hp + m              # dy = 0
                    c1 = c0 + 1                   # dy = 1 (may hit the zero pad row)
                    a_mat[t, r_even, c0] = w[ci, co, 1, kx]
                    a_mat[t, r_odd, c0] = w[ci, co, 2, kx]
                    a_mat[t, r_odd, c1] = w[ci, co, 0, kx]

    # bias map in pre-interleave [even-half | odd-half] column order; pad rows/cols = 0.
    bcat = np.zeros((rout_pad, 2 * win_pad), np.float32)
    for co in range(cout):
        bcat[co * hpn: co * hpn + 2 * H, 0:H] = bias[co]
        bcat[co * hpn: co * hpn + 2 * H, win_pad:win_pad + H] = bias[co]

    out = [jnp.asarray(a_mat, dtype=jnp.bfloat16)]
    if make_perm:
        # 0/1 permutation: even-half col n -> 2n, odd-half col n -> 2n+1
        p_mat = np.zeros((2 * win_pad, 2 * win_pad), np.float32)
        for nn in range(win_pad):
            p_mat[nn, 2 * nn] = 1.0
            p_mat[win_pad + nn, 2 * nn + 1] = 1.0
        out.append(jnp.asarray(p_mat, dtype=jnp.bfloat16))
    out.append(jnp.asarray(bcat))
    return tuple(out), rout_pad


def pack_params(params):
    # fc: Linear(512, 784) -> pre-transposed and column-scattered into the padded
    # (16ch x 8row x 8col) layout (pad positions identically zero), cast to bf16.
    fcw = np.asarray(params["fc_w"], np.float32)     # (784, 512)
    fcb = np.asarray(params["fc_b"], np.float32)     # (784,)
    wpk = np.zeros((512, 1024), np.float32)
    bpk = np.zeros((1, 1024), np.float32)
    for c in range(16):
        for h in range(7):
            src = c * 49 + h * 7
            dst = c * 64 + h * 8
            wpk[:, dst:dst + 7] = fcw[src:src + 7, :].T
            bpk[0, dst:dst + 7] = fcb[src:src + 7]

    layers = []
    H = 7
    rin_pad = 128
    win_pad = 8
    n_layers = len(params["deconv"])
    for li, (w, b) in enumerate(params["deconv"]):
        packed, rout_pad = _build_layer(w, b, H, rin_pad, win_pad,
                                        make_perm=(li < n_layers - 1))
        layers.append(packed)
        H *= 2
        rin_pad = rout_pad
        win_pad *= 2
    return {
        "fc_w_packed": jnp.asarray(wpk, dtype=jnp.bfloat16),
        "fc_b_packed": jnp.asarray(bpk),
        "packed_layers": layers,
    }


# ---------------------------------------------------------------------------
# Parameters (deterministic, synthetic) + packing
# ---------------------------------------------------------------------------
def init_params(key):
    ks = jax.random.split(key, 16)
    params = {
        "fc_w": jax.random.normal(ks[0], (784, 512), jnp.float32) * 0.05,  # Linear(512, 784)
        "fc_b": jax.random.normal(ks[1], (784,), jnp.float32) * 0.05,
        "deconv": [],
    }
    chans = [(16, 8), (8, 4), (4, 2), (2, 1), (1, 1)]
    for li, (cin, cout) in enumerate(chans):
        w = jax.random.normal(ks[2 + 2 * li], (cin, cout, 3, 3), jnp.float32) * 0.1
        bb = jax.random.normal(ks[3 + 2 * li], (cout,), jnp.float32) * 0.1
        params["deconv"].append((w, bb))
    params.update(pack_params(params))
    return params


# ---------------------------------------------------------------------------
# MyCNNCoarse forward (2 pallas_calls + a handful of free/cheap XLA reshapes)
# ---------------------------------------------------------------------------
def my_cnn_coarse_forward(feat, params):
    n = feat.shape[0]
    y = fc_forward(feat, params["fc_w_packed"], params["fc_b_packed"])   # (N, 1024)
    x0 = y.reshape(n, 128, 8)          # free: already in padded stacked-channel layout
    out = deconv_stack(x0, params["packed_layers"])                      # (N, 224, 256)
    # last layer left its columns in [even-half | odd-half] order; interleave + crop here
    even = out[:, :, :112]             # true cols 0, 2, ..., 222
    odd = out[:, :, 128:240]           # true cols 1, 3, ..., 223
    img = jnp.stack([even, odd], axis=-1).reshape(n, 224, 224)
    return img.reshape(n, 1, 224, 224)                                   # NCHW


# ---------------------------------------------------------------------------
# Pure-JAX references for validation
#   1) HIGHEST-precision f32 reference (gross-error check)
#   2) bf16-emulating reference (weights + inter-layer activations in bf16, f32
#      accumulation) matching the kernel's dtype path -> tighter logic check
# ---------------------------------------------------------------------------
def reference_forward(feat, params):
    y = jnp.dot(feat, params["fc_w"].T, precision=lax.Precision.HIGHEST) + params["fc_b"]
    x = y.reshape(-1, 16, 7, 7)
    relus = [True, True, True, True, False]
    for (w_t, b), r in zip(params["deconv"], relus):
        w_conv = jnp.transpose(w_t, (1, 0, 2, 3))[:, :, ::-1, ::-1]   # OIHW, flipped
        x = lax.conv_general_dilated(
            x, w_conv, window_strides=(1, 1), padding=((1, 2), (1, 2)),
            lhs_dilation=(2, 2), dimension_numbers=("NCHW", "OIHW", "NCHW"),
            precision=lax.Precision.HIGHEST,
        )
        x = x + b.reshape(1, -1, 1, 1)
        if r:
            x = jnp.maximum(x, 0.0)
    return x


def reference_forward_bf16(feat, params):
    def bf(v):
        return v.astype(jnp.bfloat16).astype(jnp.float32)

    y = jnp.dot(bf(feat), bf(params["fc_w"]).T,
                precision=lax.Precision.HIGHEST) + params["fc_b"]
    x = y.reshape(-1, 16, 7, 7)
    relus = [True, True, True, True, False]
    for (w_t, b), r in zip(params["deconv"], relus):
        w_conv = bf(jnp.transpose(w_t, (1, 0, 2, 3))[:, :, ::-1, ::-1])
        x = lax.conv_general_dilated(
            bf(x), w_conv, window_strides=(1, 1), padding=((1, 2), (1, 2)),
            lhs_dilation=(2, 2), dimension_numbers=("NCHW", "OIHW", "NCHW"),
            precision=lax.Precision.HIGHEST,
        )
        x = x + b.reshape(1, -1, 1, 1)
        if r:
            x = jnp.maximum(x, 0.0)
    return x


if __name__ == "__main__":
    key = jax.random.PRNGKey(0)
    pkey, xkey = jax.random.split(key)
    params = init_params(pkey)
    feat = jax.random.normal(xkey, (2, 512), jnp.float32)   # 512-d backbone features

    fwd = jax.jit(my_cnn_coarse_forward)
    out = jax.block_until_ready(fwd(feat, params))
    assert out.shape == (2, 1, 224, 224), out.shape

    # gross-error check vs HIGHEST-precision f32 reference (kernel runs bf16 operands)
    ref_hi = reference_forward(feat, params)
    err_hi = float(jnp.max(jnp.abs(out - ref_hi)))
    assert err_hi < 3e-2, err_hi

    # tighter logic check vs a reference that mimics the kernel's bf16 operand path
    ref_emu = reference_forward_bf16(feat, params)
    err_emu = float(jnp.max(jnp.abs(out - ref_emu)))
    assert err_emu < 1e-2, err_emu

    print("KERNEL_OK")
</pallas_src>

<mosaic_0001>
module attributes {stable_mosaic.version = 11 : i64} {
  func.func @_fc_kernel(%arg0: i32, %arg1: memref<2x512xf32, #tpu.memory_space<vmem>>, %arg2: memref<512x512xbf16, #tpu.memory_space<vmem>>, %arg3: memref<1x512xf32, #tpu.memory_space<vmem>>, %arg4: memref<2x512xf32, #tpu.memory_space<vmem>>) attributes {dimension_semantics = [#tpu.dimension_semantics<parallel>], iteration_bounds = array<i64: 2>, scalar_prefetch = 0 : i64, scratch_operands = 0 : i64, tpu.core_type = #tpu.core_type<tc>, window_params = [{pipeline_mode = #tpu.pipeline_mode<synchronous>, transform_indices = @transform_0, window_bounds = array<i64: 2, 512>}, {transform_indices = @transform_1, window_bounds = array<i64: 512, 512>}, {transform_indices = @transform_2, window_bounds = array<i64: 1, 512>}, {transform_indices = @transform_3, window_bounds = array<i64: 2, 512>}]} {
    %c0 = arith.constant 0 : index
    %c0_0 = arith.constant 0 : index
    %0 = vector.load %arg1[%c0, %c0_0] : memref<2x512xf32, #tpu.memory_space<vmem>>, vector<2x512xf32>
    %1 = arith.truncf %0 : vector<2x512xf32> to vector<2x512xbf16>
    %c0_1 = arith.constant 0 : index
    %c0_2 = arith.constant 0 : index
    %2 = vector.load %arg2[%c0_1, %c0_2] : memref<512x512xbf16, #tpu.memory_space<vmem>>, vector<512x512xbf16>
    %cst = arith.constant dense<0.000000e+00> : vector<2x512xf32>
    %3 = tpu.matmul %1, %2, %cst {dimension_numbers = #tpu.dot_dimension_numbers<[1], [0], [0], [1], [0, 0, 1, 1], [], []>} : vector<2x512xbf16>, vector<512x512xbf16>, vector<2x512xf32> -> vector<2x512xf32>
    %c0_3 = arith.constant 0 : index
    %c0_4 = arith.constant 0 : index
    %4 = vector.load %arg3[%c0_3, %c0_4] : memref<1x512xf32, #tpu.memory_space<vmem>>, vector<1x512xf32>
    %5 = vector.broadcast %4 : vector<1x512xf32> to vector<2x512xf32>
    %6 = arith.addf %3, %5 : vector<2x512xf32>
    %c0_5 = arith.constant 0 : index
    %c0_6 = arith.constant 0 : index
    %7 = vector.load %arg4[%c0_5, %c0_6] : memref<2x512xf32, #tpu.memory_space<vmem>>, vector<2x512xf32>
    tpu.vector_store %arg4[%c0_5, %c0_6], %6 {strides = array<i32>} : memref<2x512xf32, #tpu.memory_space<vmem>>, vector<2x512xf32>,
    return
  }
  func.func @transform_0(%arg0: i32) -> (i32, i32) {
    %c0_i32 = arith.constant 0 : i32
    %c0_i32_0 = arith.constant 0 : i32
    %c0_i32_1 = arith.constant 0 : i32
    return %c0_i32, %c0_i32_0 : i32, i32
  }
  func.func @transform_1(%arg0: i32) -> (i32, i32) {
    %c0_i32 = arith.constant 0 : i32
    %c0_i32_0 = arith.constant 0 : i32
    return %c0_i32, %arg0 : i32, i32
  }
  func.func @transform_2(%arg0: i32) -> (i32, i32) {
    %c0_i32 = arith.constant 0 : i32
    %c0_i32_0 = arith.constant 0 : i32
    return %c0_i32, %arg0 : i32, i32
  }
  func.func @transform_3(%arg0: i32) -> (i32, i32) {
    %c0_i32 = arith.constant 0 : i32
    %c0_i32_0 = arith.constant 0 : i32
    return %c0_i32, %arg0 : i32, i32
  }
}

module attributes {stable_mosaic.version = 11 : i64} {
  func.func @_deconv_stack_kernel(%arg0: i32, %arg1: memref<1x128x8xf32, #tpu.memory_space<vmem>>, %arg2: memref<3x120x128xbf16, #tpu.memory_space<vmem>>, %arg3: memref<16x16xbf16, #tpu.memory_space<vmem>>, %arg4: memref<120x16xf32, #tpu.memory_space<vmem>>, %arg5: memref<3x120x120xbf16, #tpu.memory_space<vmem>>, %arg6: memref<32x32xbf16, #tpu.memory_space<vmem>>, %arg7: memref<120x32xf32, #tpu.memory_space<vmem>>, %arg8: memref<3x120x120xbf16, #tpu.memory_space<vmem>>, %arg9: memref<64x64xbf16, #tpu.memory_space<vmem>>, %arg10: memref<120x64xf32, #tpu.memory_space<vmem>>, %arg11: memref<3x120x120xbf16, #tpu.memory_space<vmem>>, %arg12: memref<128x128xbf16, #tpu.memory_space<vmem>>, %arg13: memref<120x128xf32, #tpu.memory_space<vmem>>, %arg14: memref<3x232x120xbf16, #tpu.memory_space<vmem>>, %arg15: memref<232x256xf32, #tpu.memory_space<vmem>>, %arg16: memref<1x224x256xf32, #tpu.memory_space<vmem>>) attributes {dimension_semantics = [#tpu.dimension_semantics<parallel>], iteration_bounds = array<i64: 2>, scalar_prefetch = 0 : i64, scratch_operands = 0 : i64, tpu.core_type = #tpu.core_type<tc>, window_params = [{transform_indices = @transform_0, window_bounds = array<i64: 1, 128, 8>}, {pipeline_mode = #tpu.pipeline_mode<synchronous>, transform_indices = @transform_1, window_bounds = array<i64: 3, 120, 128>}, {pipeline_mode = #tpu.pipeline_mode<synchronous>, transform_indices = @transform_2, window_bounds = array<i64: 16, 16>}, {pipeline_mode = #tpu.pipeline_mode<synchronous>, transform_indices = @transform_3, window_bounds = array<i64: 120, 16>}, {pipeline_mode = #tpu.pipeline_mode<synchronous>, transform_indices = @transform_4, window_bounds = array<i64: 3, 120, 120>}, {pipeline_mode = #tpu.pipeline_mode<synchronous>, transform_indices = @transform_5, window_bounds = array<i64: 32, 32>}, {pipeline_mode = #tpu.pipeline_mode<synchronous>, transform_indices = @transform_6, window_bounds = array<i64: 120, 32>}, {pipeline_mode = #tpu.pipeline_mode<synchronous>, transform_indices = @transform_7, window_bounds = array<i64: 3, 120, 120>}, {pipeline_mode = #tpu.pipeline_mode<synchronous>, transform_indices = @transform_8, window_bounds = array<i64: 64, 64>}, {pipeline_mode = #tpu.pipeline_mode<synchronous>, transform_indices = @transform_9, window_bounds = array<i64: 120, 64>}, {pipeline_mode = #tpu.pipeline_mode<synchronous>, transform_indices = @transform_10, window_bounds = array<i64: 3, 120, 120>}, {pipeline_mode = #tpu.pipeline_mode<synchronous>, transform_indices = @transform_11, window_bounds = array<i64: 128, 128>}, {pipeline_mode = #tpu.pipeline_mode<synchronous>, transform_indices = @transform_12, window_bounds = array<i64: 120, 128>}, {pipeline_mode = #tpu.pipeline_mode<synchronous>, transform_indices = @transform_13, window_bounds = array<i64: 3, 232, 120>}, {pipeline_mode = #tpu.pipeline_mode<synchronous>, transform_indices = @transform_14, window_bounds = array<i64: 232, 256>}, {transform_indices = @transform_15, window_bounds = array<i64: 1, 224, 256>}]} {
    %c0 = arith.constant 0 : index
    %c0_0 = arith.constant 0 : index
    %c0_1 = arith.constant 0 : index
    %0 = vector.load %arg1[%c0, %c0_0, %c0_1] : memref<1x128x8xf32, #tpu.memory_space<vmem>>, vector<1x128x8xf32>
    %1 = vector.shape_cast %0 : vector<1x128x8xf32> to vector<128x8xf32>
    %2 = arith.truncf %1 : vector<128x8xf32> to vector<128x8xbf16>
    %3 = vector.extract_strided_slice %2 {offsets = [0, 1], sizes = [128, 7], strides = [1, 1]} : vector<128x8xbf16> to vector<128x7xbf16>
    %4 = vector.extract_strided_slice %2 {offsets = [0, 0], sizes = [128, 1], strides = [1, 1]} : vector<128x8xbf16> to vector<128x1xbf16>
    %5 = tpu.concatenate %3, %4 in 1 : vector<128x7xbf16>, vector<128x1xbf16> -> vector<128x8xbf16>
    %c0_2 = arith.constant 0 : index
    %c0_3 = arith.constant 0 : index
    %c0_4 = arith.constant 0 : index
    %6 = vector.load %arg2[%c0_2, %c0_3, %c0_4] : memref<3x120x128xbf16, #tpu.memory_space<vmem>>, vector<1x120x128xbf16>
    %7 = vector.shape_cast %6 : vector<1x120x128xbf16> to vector<120x128xbf16>
    %cst = arith.constant dense<0.000000e+00> : vector<120x8xf32>
    %8 = tpu.matmul %7, %2, %cst {dimension_numbers = #tpu.dot_dimension_numbers<[1], [0], [0], [1], [0, 0, 1, 1], [], []>} : vector<120x128xbf16>, vector<128x8xbf16>, vector<120x8xf32> -> vector<120x8xf32>
    %c1 = arith.constant 1 : index
    %c0_5 = arith.constant 0 : index
    %c0_6 = arith.constant 0 : index
    %9 = vector.load %arg2[%c1, %c0_5, %c0_6] : memref<3x120x128xbf16, #tpu.memory_space<vmem>>, vector<1x120x128xbf16>
    %10 = vector.shape_cast %9 : vector<1x120x128xbf16> to vector<120x128xbf16>
    %cst_7 = arith.constant dense<0.000000e+00> : vector<120x8xf32>
    %11 = tpu.matmul %10, %2, %cst_7 {dimension_numbers = #tpu.dot_dimension_numbers<[1], [0], [0], [1], [0, 0, 1, 1], [], []>} : vector<120x128xbf16>, vector<128x8xbf16>, vector<120x8xf32> -> vector<120x8xf32>
    %c2 = arith.constant 2 : index
    %c0_8 = arith.constant 0 : index
    %c0_9 = arith.constant 0 : index
    %12 = vector.load %arg2[%c2, %c0_8, %c0_9] : memref<3x120x128xbf16, #tpu.memory_space<vmem>>, vector<1x120x128xbf16>
    %13 = vector.shape_cast %12 : vector<1x120x128xbf16> to vector<120x128xbf16>
    %cst_10 = arith.constant dense<0.000000e+00> : vector<120x8xf32>
    %14 = tpu.matmul %13, %5, %cst_10 {dimension_numbers = #tpu.dot_dimension_numbers<[1], [0], [0], [1], [0, 0, 1, 1], [], []>} : vector<120x128xbf16>, vector<128x8xbf16>, vector<120x8xf32> -> vector<120x8xf32>
    %15 = arith.addf %11, %14 : vector<120x8xf32>
    %16 = tpu.concatenate %8, %15 in 1 : vector<120x8xf32>, vector<120x8xf32> -> vector<120x16xf32>
    %c0_11 = arith.constant 0 : index
    %c0_12 = arith.constant 0 : index
    %17 = vector.load %arg4[%c0_11, %c0_12] : memref<120x16xf32, #tpu.memory_space<vmem>>, vector<120x16xf32>
    %18 = arith.addf %16, %17 : vector<120x16xf32>
    %cst_13 = arith.constant 0.000000e+00 : f32
    %19 = vector.broadcast %cst_13 : f32 to vector<120x16xf32>
    %20 = arith.maximumf %18, %19 : vector<120x16xf32>
    %21 = arith.truncf %20 : vector<120x16xf32> to vector<120x16xbf16>
    %c0_14 = arith.constant 0 : index
    %c0_15 = arith.constant 0 : index
    %22 = vector.load %arg3[%c0_14, %c0_15] : memref<16x16xbf16, #tpu.memory_space<vmem>>, vector<16x16xbf16>
    %cst_16 = arith.constant dense<0.000000e+00> : vector<120x16xf32>
    %23 = tpu.matmul %21, %22, %cst_16 {dimension_numbers = #tpu.dot_dimension_numbers<[1], [0], [0], [1], [0, 0, 1, 1], [], []>} : vector<120x16xbf16>, vector<16x16xbf16>, vector<120x16xf32> -> vector<120x16xf32>
    %24 = arith.truncf %23 : vector<120x16xf32> to vector<120x16xbf16>
    %25 = vector.extract_strided_slice %24 {offsets = [0, 1], sizes = [120, 15], strides = [1, 1]} : vector<120x16xbf16> to vector<120x15xbf16>
    %26 = vector.extract_strided_slice %24 {offsets = [0, 0], sizes = [120, 1], strides = [1, 1]} : vector<120x16xbf16> to vector<120x1xbf16>
    %27 = tpu.concatenate %25, %26 in 1 : vector<120x15xbf16>, vector<120x1xbf16> -> vector<120x16xbf16>
    %c0_17 = arith.constant 0 : index
    %c0_18 = arith.constant 0 : index
    %c0_19 = arith.constant 0 : index
    %28 = vector.load %arg5[%c0_17, %c0_18, %c0_19] : memref<3x120x120xbf16, #tpu.memory_space<vmem>>, vector<1x120x120xbf16>
    %29 = vector.shape_cast %28 : vector<1x120x120xbf16> to vector<120x120xbf16>
    %cst_20 = arith.constant dense<0.000000e+00> : vector<120x16xf32>
    %30 = tpu.matmul %29, %24, %cst_20 {dimension_numbers = #tpu.dot_dimension_numbers<[1], [0], [0], [1], [0, 0, 1, 1], [], []>} : vector<120x120xbf16>, vector<120x16xbf16>, vector<120x16xf32> -> vector<120x16xf32>
    %c1_21 = arith.constant 1 : index
    %c0_22 = arith.constant 0 : index
    %c0_23 = arith.constant 0 : index
    %31 = vector.load %arg5[%c1_21, %c0_22, %c0_23] : memref<3x120x120xbf16, #tpu.memory_space<vmem>>, vector<1x120x120xbf16>
    %32 = vector.shape_cast %31 : vector<1x120x120xbf16> to vector<120x120xbf16>
    %cst_24 = arith.constant dense<0.000000e+00> : vector<120x16xf32>
    %33 = tpu.matmul %32, %24, %cst_24 {dimension_numbers = #tpu.dot_dimension_numbers<[1], [0], [0], [1], [0, 0, 1, 1], [], []>} : vector<120x120xbf16>, vector<120x16xbf16>, vector<120x16xf32> -> vector<120x16xf32>
    %c2_25 = arith.constant 2 : index
    %c0_26 = arith.constant 0 : index
    %c0_27 = arith.constant 0 : index
    %34 = vector.load %arg5[%c2_25, %c0_26, %c0_27] : memref<3x120x120xbf16, #tpu.memory_space<vmem>>, vector<1x120x120xbf16>
    %35 = vector.shape_cast %34 : vector<1x120x120xbf16> to vector<120x120xbf16>
    %cst_28 = arith.constant dense<0.000000e+00> : vector<120x16xf32>
    %36 = tpu.matmul %35, %27, %cst_28 {dimension_numbers = #tpu.dot_dimension_numbers<[1], [0], [0], [1], [0, 0, 1, 1], [], []>} : vector<120x120xbf16>, vector<120x16xbf16>, vector<120x16xf32> -> vector<120x16xf32>
    %37 = arith.addf %33, %36 : vector<120x16xf32>
    %38 = tpu.concatenate %30, %37 in 1 : vector<120x16xf32>, vector<120x16xf32> -> vector<120x32xf32>
    %c0_29 = arith.constant 0 : index
    %c0_30 = arith.constant 0 : index
    %39 = vector.load %arg7[%c0_29, %c0_30] : memref<120x32xf32, #tpu.memory_space<vmem>>, vector<120x32xf32>
    %40 = arith.addf %38, %39 : vector<120x32xf32>
    %cst_31 = arith.constant 0.000000e+00 : f32
    %41 = vector.broadcast %cst_31 : f32 to vector<120x32xf32>
    %42 = arith.maximumf %40, %41 : vector<120x32xf32>
    %43 = arith.truncf %42 : vector<120x32xf32> to vector<120x32xbf16>
    %c0_32 = arith.constant 0 : index
    %c0_33 = arith.constant 0 : index
    %44 = vector.load %arg6[%c0_32, %c0_33] : memref<32x32xbf16, #tpu.memory_space<vmem>>, vector<32x32xbf16>
    %cst_34 = arith.constant dense<0.000000e+00> : vector<120x32xf32>
    %45 = tpu.matmul %43, %44, %cst_34 {dimension_numbers = #tpu.dot_dimension_numbers<[1], [0], [0], [1], [0, 0, 1, 1], [], []>} : vector<120x32xbf16>, vector<32x32xbf16>, vector<120x32xf32> -> vector<120x32xf32>
    %46 = arith.truncf %45 : vector<120x32xf32> to vector<120x32xbf16>
    %47 = vector.extract_strided_slice %46 {offsets = [0, 1], sizes = [120, 31], strides = [1, 1]} : vector<120x32xbf16> to vector<120x31xbf16>
    %48 = vector.extract_strided_slice %46 {offsets = [0, 0], sizes = [120, 1], strides = [1, 1]} : vector<120x32xbf16> to vector<120x1xbf16>
    %49 = tpu.concatenate %47, %48 in 1 : vector<120x31xbf16>, vector<120x1xbf16> -> vector<120x32xbf16>
    %c0_35 = arith.constant 0 : index
    %c0_36 = arith.constant 0 : index
    %c0_37 = arith.constant 0 : index
    %50 = vector.load %arg8[%c0_35, %c0_36, %c0_37] : memref<3x120x120xbf16, #tpu.memory_space<vmem>>, vector<1x120x120xbf16>
    %51 = vector.shape_cast %50 : vector<1x120x120xbf16> to vector<120x120xbf16>
    %cst_38 = arith.constant dense<0.000000e+00> : vector<120x32xf32>
    %52 = tpu.matmul %51, %46, %cst_38 {dimension_numbers = #tpu.dot_dimension_numbers<[1], [0], [0], [1], [0, 0, 1, 1], [], []>} : vector<120x120xbf16>, vector<120x32xbf16>, vector<120x32xf32> -> vector<120x32xf32>
    %c1_39 = arith.constant 1 : index
    %c0_40 = arith.constant 0 : index
    %c0_41 = arith.constant 0 : index
    %53 = vector.load %arg8[%c1_39, %c0_40, %c0_41] : memref<3x120x120xbf16, #tpu.memory_space<vmem>>, vector<1x120x120xbf16>
    %54 = vector.shape_cast %53 : vector<1x120x120xbf16> to vector<120x120xbf16>
    %cst_42 = arith.constant dense<0.000000e+00> : vector<120x32xf32>
    %55 = tpu.matmul %54, %46, %cst_42 {dimension_numbers = #tpu.dot_dimension_numbers<[1], [0], [0], [1], [0, 0, 1, 1], [], []>} : vector<120x120xbf16>, vector<120x32xbf16>, vector<120x32xf32> -> vector<120x32xf32>
    %c2_43 = arith.constant 2 : index
    %c0_44 = arith.constant 0 : index
    %c0_45 = arith.constant 0 : index
    %56 = vector.load %arg8[%c2_43, %c0_44, %c0_45] : memref<3x120x120xbf16, #tpu.memory_space<vmem>>, vector<1x120x120xbf16>
    %57 = vector.shape_cast %56 : vector<1x120x120xbf16> to vector<120x120xbf16>
    %cst_46 = arith.constant dense<0.000000e+00> : vector<120x32xf32>
    %58 = tpu.matmul %57, %49, %cst_46 {dimension_numbers = #tpu.dot_dimension_numbers<[1], [0], [0], [1], [0, 0, 1, 1], [], []>} : vector<120x120xbf16>, vector<120x32xbf16>, vector<120x32xf32> -> vector<120x32xf32>
    %59 = arith.addf %55, %58 : vector<120x32xf32>
    %60 = tpu.concatenate %52, %59 in 1 : vector<120x32xf32>, vector<120x32xf32> -> vector<120x64xf32>
    %c0_47 = arith.constant 0 : index
    %c0_48 = arith.constant 0 : index
    %61 = vector.load %arg10[%c0_47, %c0_48] : memref<120x64xf32, #tpu.memory_space<vmem>>, vector<120x64xf32>
    %62 = arith.addf %60, %61 : vector<120x64xf32>
    %cst_49 = arith.constant 0.000000e+00 : f32
    %63 = vector.broadcast %cst_49 : f32 to vector<120x64xf32>
    %64 = arith.maximumf %62, %63 : vector<120x64xf32>
    %65 = arith.truncf %64 : vector<120x64xf32> to vector<120x64xbf16>
    %c0_50 = arith.constant 0 : index
    %c0_51 = arith.constant 0 : index
    %66 = vector.load %arg9[%c0_50, %c0_51] : memref<64x64xbf16, #tpu.memory_space<vmem>>, vector<64x64xbf16>
    %cst_52 = arith.constant dense<0.000000e+00> : vector<120x64xf32>
    %67 = tpu.matmul %65, %66, %cst_52 {dimension_numbers = #tpu.dot_dimension_numbers<[1], [0], [0], [1], [0, 0, 1, 1], [], []>} : vector<120x64xbf16>, vector<64x64xbf16>, vector<120x64xf32> -> vector<120x64xf32>
    %68 = arith.truncf %67 : vector<120x64xf32> to vector<120x64xbf16>
    %69 = vector.extract_strided_slice %68 {offsets = [0, 1], sizes = [120, 63], strides = [1, 1]} : vector<120x64xbf16> to vector<120x63xbf16>
    %70 = vector.extract_strided_slice %68 {offsets = [0, 0], sizes = [120, 1], strides = [1, 1]} : vector<120x64xbf16> to vector<120x1xbf16>
    %71 = tpu.concatenate %69, %70 in 1 : vector<120x63xbf16>, vector<120x1xbf16> -> vector<120x64xbf16>
    %c0_53 = arith.constant 0 : index
    %c0_54 = arith.constant 0 : index
    %c0_55 = arith.constant 0 : index
    %72 = vector.load %arg11[%c0_53, %c0_54, %c0_55] : memref<3x120x120xbf16, #tpu.memory_space<vmem>>, vector<1x120x120xbf16>
    %73 = vector.shape_cast %72 : vector<1x120x120xbf16> to vector<120x120xbf16>
    %cst_56 = arith.constant dense<0.000000e+00> : vector<120x64xf32>
    %74 = tpu.matmul %73, %68, %cst_56 {dimension_numbers = #tpu.dot_dimension_numbers<[1], [0], [0], [1], [0, 0, 1, 1], [], []>} : vector<120x120xbf16>, vector<120x64xbf16>, vector<120x64xf32> -> vector<120x64xf32>
    %c1_57 = arith.constant 1 : index
    %c0_58 = arith.constant 0 : index
    %c0_59 = arith.constant 0 : index
    %75 = vector.load %arg11[%c1_57, %c0_58, %c0_59] : memref<3x120x120xbf16, #tpu.memory_space<vmem>>, vector<1x120x120xbf16>
    %76 = vector.shape_cast %75 : vector<1x120x120xbf16> to vector<120x120xbf16>
    %cst_60 = arith.constant dense<0.000000e+00> : vector<120x64xf32>
    %77 = tpu.matmul %76, %68, %cst_60 {dimension_numbers = #tpu.dot_dimension_numbers<[1], [0], [0], [1], [0, 0, 1, 1], [], []>} : vector<120x120xbf16>, vector<120x64xbf16>, vector<120x64xf32> -> vector<120x64xf32>
    %c2_61 = arith.constant 2 : index
    %c0_62 = arith.constant 0 : index
    %c0_63 = arith.constant 0 : index
    %78 = vector.load %arg11[%c2_61, %c0_62, %c0_63] : memref<3x120x120xbf16, #tpu.memory_space<vmem>>, vector<1x120x120xbf16>
    %79 = vector.shape_cast %78 : vector<1x120x120xbf16> to vector<120x120xbf16>
    %cst_64 = arith.constant dense<0.000000e+00> : vector<120x64xf32>
    %80 = tpu.matmul %79, %71, %cst_64 {dimension_numbers = #tpu.dot_dimension_numbers<[1], [0], [0], [1], [0, 0, 1, 1], [], []>} : vector<120x120xbf16>, vector<120x64xbf16>, vector<120x64xf32> -> vector<120x64xf32>
    %81 = arith.addf %77, %80 : vector<120x64xf32>
    %82 = tpu.concatenate %74, %81 in 1 : vector<120x64xf32>, vector<120x64xf32> -> vector<120x128xf32>
    %c0_65 = arith.constant 0 : index
    %c0_66 = arith.constant 0 : index
    %83 = vector.load %arg13[%c0_65, %c0_66] : memref<120x128xf32, #tpu.memory_space<vmem>>, vector<120x128xf32>
    %84 = arith.addf %82, %83 : vector<120x128xf32>
    %cst_67 = arith.constant 0.000000e+00 : f32
    %85 = vector.broadcast %cst_67 : f32 to vector<120x128xf32>
    %86 = arith.maximumf %84, %85 : vector<120x128xf32>
    %87 = arith.truncf %86 : vector<120x128xf32> to vector<120x128xbf16>
    %c0_68 = arith.constant 0 : index
    %c0_69 = arith.constant 0 : index
    %88 = vector.load %arg12[%c0_68, %c0_69] : memref<128x128xbf16, #tpu.memory_space<vmem>>, vector<128x128xbf16>
    %cst_70 = arith.constant dense<0.000000e+00> : vector<120x128xf32>
    %89 = tpu.matmul %87, %88, %cst_70 {dimension_numbers = #tpu.dot_dimension_numbers<[1], [0], [0], [1], [0, 0, 1, 1], [], []>} : vector<120x128xbf16>, vector<128x128xbf16>, vector<120x128xf32> -> vector<120x128xf32>
    %90 = arith.truncf %89 : vector<120x128xf32> to vector<120x128xbf16>
    %91 = vector.extract_strided_slice %90 {offsets = [0, 1], sizes = [120, 127], strides = [1, 1]} : vector<120x128xbf16> to vector<120x127xbf16>
    %92 = vector.extract_strided_slice %90 {offsets = [0, 0], sizes = [120, 1], strides = [1, 1]} : vector<120x128xbf16> to vector<120x1xbf16>
    %93 = tpu.concatenate %91, %92 in 1 : vector<120x127xbf16>, vector<120x1xbf16> -> vector<120x128xbf16>
    %c0_71 = arith.constant 0 : index
    %c0_72 = arith.constant 0 : index
    %c0_73 = arith.constant 0 : index
    %94 = vector.load %arg14[%c0_71, %c0_72, %c0_73] : memref<3x232x120xbf16, #tpu.memory_space<vmem>>, vector<1x232x120xbf16>
    %95 = vector.shape_cast %94 : vector<1x232x120xbf16> to vector<232x120xbf16>
    %cst_74 = arith.constant dense<0.000000e+00> : vector<232x128xf32>
    %96 = tpu.matmul %95, %90, %cst_74 {dimension_numbers = #tpu.dot_dimension_numbers<[1], [0], [0], [1], [0, 0, 1, 1], [], []>} : vector<232x120xbf16>, vector<120x128xbf16>, vector<232x128xf32> -> vector<232x128xf32>
    %c1_75 = arith.constant 1 : index
    %c0_76 = arith.constant 0 : index
    %c0_77 = arith.constant 0 : index
    %97 = vector.load %arg14[%c1_75, %c0_76, %c0_77] : memref<3x232x120xbf16, #tpu.memory_space<vmem>>, vector<1x232x120xbf16>
    %98 = vector.shape_cast %97 : vector<1x232x120xbf16> to vector<232x120xbf16>
    %cst_78 = arith.constant dense<0.000000e+00> : vector<232x128xf32>
    %99 = tpu.matmul %98, %90, %cst_78 {dimension_numbers = #tpu.dot_dimension_numbers<[1], [0], [0], [1], [0, 0, 1, 1], [], []>} : vector<232x120xbf16>, vector<120x128xbf16>, vector<232x128xf32> -> vector<232x128xf32>
    %c2_79 = arith.constant 2 : index
    %c0_80 = arith.constant 0 : index
    %c0_81 = arith.constant 0 : index
    %100 = vector.load %arg14[%c2_79, %c0_80, %c0_81] : memref<3x232x120xbf16, #tpu.memory_space<vmem>>, vector<1x232x120xbf16>
    %101 = vector.shape_cast %100 : vector<1x232x120xbf16> to vector<232x120xbf16>
    %cst_82 = arith.constant dense<0.000000e+00> : vector<232x128xf32>
    %102 = tpu.matmul %101, %93, %cst_82 {dimension_numbers = #tpu.dot_dimension_numbers<[1], [0], [0], [1], [0, 0, 1, 1], [], []>} : vector<232x120xbf16>, vector<120x128xbf16>, vector<232x128xf32> -> vector<232x128xf32>
    %103 = arith.addf %99, %102 : vector<232x128xf32>
    %104 = tpu.concatenate %96, %103 in 1 : vector<232x128xf32>, vector<232x128xf32> -> vector<232x256xf32>
    %c0_83 = arith.constant 0 : index
    %c0_84 = arith.constant 0 : index
    %105 = vector.load %arg15[%c0_83, %c0_84] : memref<232x256xf32, #tpu.memory_space<vmem>>, vector<232x256xf32>
    %106 = arith.addf %104, %105 : vector<232x256xf32>
    %107 = vector.extract_strided_slice %106 {offsets = [0, 0], sizes = [224, 256], strides = [1, 1]} : vector<232x256xf32> to vector<224x256xf32>
    %c0_85 = arith.constant 0 : index
    %c0_86 = arith.constant 0 : index
    %c0_87 = arith.constant 0 : index
    %108 = vector.load %arg16[%c0_85, %c0_86, %c0_87] : memref<1x224x256xf32, #tpu.memory_space<vmem>>, vector<1x224x256xf32>
    %109 = vector.shape_cast %108 : vector<1x224x256xf32> to vector<224x256xf32>
    %110 = vector.shape_cast %107 : vector<224x256xf32> to vector<1x224x256xf32>
    tpu.vector_store %arg16[%c0_85, %c0_86, %c0_87], %110 {strides = array<i32>} : memref<1x224x256xf32, #tpu.memory_space<vmem>>, vector<1x224x256xf32>,
    return
  }
  func.func @transform_0(%arg0: i32) -> (i32, i32, i32) {
    %c0_i32 = arith.constant 0 : i32
    %c0_i32_0 = arith.constant 0 : i32
    %c0_i32_1 = arith.constant 0 : i32
    return %arg0, %c0_i32, %c0_i32_0 : i32, i32, i32
  }
  func.func @transform_1(%arg0: i32) -> (i32, i32, i32) {
    %c0_i32 = arith.constant 0 : i32
    %c0_i32_0 = arith.constant 0 : i32
    %c0_i32_1 = arith.constant 0 : i32
    %c0_i32_2 = arith.constant 0 : i32
    return %c0_i32, %c0_i32_0, %c0_i32_1 : i32, i32, i32
  }
  func.func @transform_2(%arg0: i32) -> (i32, i32) {
    %c0_i32 = arith.constant 0 : i32
    %c0_i32_0 = arith.constant 0 : i32
    %c0_i32_1 = arith.constant 0 : i32
    return %c0_i32, %c0_i32_0 : i32, i32
  }
  func.func @transform_3(%arg0: i32) -> (i32, i32) {
    %c0_i32 = arith.constant 0 : i32
    %c0_i32_0 = arith.constant 0 : i32
    %c0_i32_1 = arith.constant 0 : i32
    return %c0_i32, %c0_i32_0 : i32, i32
  }
  func.func @transform_4(%arg0: i32) -> (i32, i32, i32) {
    %c0_i32 = arith.constant 0 : i32
    %c0_i32_0 = arith.constant 0 : i32
    %c0_i32_1 = arith.constant 0 : i32
    %c0_i32_2 = arith.constant 0 : i32
    return %c0_i32, %c0_i32_0, %c0_i32_1 : i32, i32, i32
  }
  func.func @transform_5(%arg0: i32) -> (i32, i32) {
    %c0_i32 = arith.constant 0 : i32
    %c0_i32_0 = arith.constant 0 : i32
    %c0_i32_1 = arith.constant 0 : i32
    return %c0_i32, %c0_i32_0 : i32, i32
  }
  func.func @transform_6(%arg0: i32) -> (i32, i32) {
    %c0_i32 = arith.constant 0 : i32
    %c0_i32_0 = arith.constant 0 : i32
    %c0_i32_1 = arith.constant 0 : i32
    return %c0_i32, %c0_i32_0 : i32, i32
  }
  func.func @transform_7(%arg0: i32) -> (i32, i32, i32) {
    %c0_i32 = arith.constant 0 : i32
    %c0_i32_0 = arith.constant 0 : i32
    %c0_i32_1 = arith.constant 0 : i32
    %c0_i32_2 = arith.constant 0 : i32
    return %c0_i32, %c0_i32_0, %c0_i32_1 : i32, i32, i32
  }
  func.func @transform_8(%arg0: i32) -> (i32, i32) {
    %c0_i32 = arith.constant 0 : i32
    %c0_i32_0 = arith.constant 0 : i32
    %c0_i32_1 = arith.constant 0 : i32
    return %c0_i32, %c0_i32_0 : i32, i32
  }
  func.func @transform_9(%arg0: i32) -> (i32, i32) {
    %c0_i32 = arith.constant 0 : i32
    %c0_i32_0 = arith.constant 0 : i32
    %c0_i32_1 = arith.constant 0 : i32
    return %c0_i32, %c0_i32_0 : i32, i32
  }
  func.func @transform_10(%arg0: i32) -> (i32, i32, i32) {
    %c0_i32 = arith.constant 0 : i32
    %c0_i32_0 = arith.constant 0 : i32
    %c0_i32_1 = arith.constant 0 : i32
    %c0_i32_2 = arith.constant 0 : i32
    return %c0_i32, %c0_i32_0, %c0_i32_1 : i32, i32, i32
  }
  func.func @transform_11(%arg0: i32) -> (i32, i32) {
    %c0_i32 = arith.constant 0 : i32
    %c0_i32_0 = arith.constant 0 : i32
    %c0_i32_1 = arith.constant 0 : i32
    return %c0_i32, %c0_i32_0 : i32, i32
  }
  func.func @transform_12(%arg0: i32) -> (i32, i32) {
    %c0_i32 = arith.constant 0 : i32
    %c0_i32_0 = arith.constant 0 : i32
    %c0_i32_1 = arith.constant 0 : i32
    return %c0_i32, %c0_i32_0 : i32, i32
  }
  func.func @transform_13(%arg0: i32) -> (i32, i32, i32) {
    %c0_i32 = arith.constant 0 : i32
    %c0_i32_0 = arith.constant 0 : i32
    %c0_i32_1 = arith.constant 0 : i32
    %c0_i32_2 = arith.constant 0 : i32
    return %c0_i32, %c0_i32_0, %c0_i32_1 : i32, i32, i32
  }
  func.func @transform_14(%arg0: i32) -> (i32, i32) {
    %c0_i32 = arith.constant 0 : i32
    %c0_i32_0 = arith.constant 0 : i32
    %c0_i32_1 = arith.constant 0 : i32
    return %c0_i32, %c0_i32_0 : i32, i32
  }
  func.func @transform_15(%arg0: i32) -> (i32, i32, i32) {
    %c0_i32 = arith.constant 0 : i32
    %c0_i32_0 = arith.constant 0 : i32
    %c0_i32_1 = arith.constant 0 : i32
    return %arg0, %c0_i32, %c0_i32_0 : i32, i32, i32
  }
}

</mosaic_0001>

<bundles_post_ra>
// kernel: my_cnn_coarse_forward.2
= control target key start
LH: loop header
LB: loop body
LE: loop exit
PB: predicated region body
PF: predicated region fallthrough
CT: control target
= control target key end

     0   :  { %8 = vsyncpa [#allocation3], 0  ;;  %s2248_s0 = inlined_call_operand.hbm [shape: f32[2,512], index: 0, kind: input, shape index: {}]   ;;  %s2249_s1 = inlined_call_operand.hbm [shape: bf16[512,1024], index: 1, kind: input, shape index: {}]   ;;  %s2250_s2 = inlined_call_operand.hbm [shape: f32[1,1024], index: 2, kind: input, shape index: {}]   ;;  %s2251_s3 = inlined_call_operand.vmem [shape: f32[2,1024], index: 3, kind: output, shape index: {}]  }
   0x1   :  { %9 = vsyncpa [#allocation5], 0 }
   0x2   :  { %11 = vsyncpa [#allocation5 + $0x1], 0  ;;  %s1913_s12 = smov 0   ;;  %s1915_s13 = smov 0  }
   0x3   :  { %s1917_s14 = smov 0   ;;  %s1919_s15 = smov 0  }
   0x4 LB: > { %s1934_s16 = sadd.s32 1, %s1884_s15   ;;  %s45_s17 = sadd.s32 1, %s1880_s14  ;;  %s1884_s15 = sphi %s1919_s15, %s2272_s15   ;;  %s1880_s14 = sphi %s1917_s14, %s2271_s14   ;;  %s1876_s13 = sphi %s1915_s13, %s2270_s13   ;;  %s1872_s12 = sphi %s1913_s12, %s2269_s12  }
   0x5   : > { %s42_s18 = ssub.s32 %s1884_s15, %s1934_s16  ;;  %p52_p0 = scmp.ne.s32.totalorder %s1880_s14, %s1876_s13 }
   0x6   : > { %p43_p1 = scmp.eq.s32.totalorder %s42_s18, 0  ;;  %p53_p2 = scmp.eq.s32.totalorder %s1884_s15, 0 }
   0x7   : > { %p1526_p3 = scmp.lt.s32.totalorder %s1884_s15, 2  ;;  %s145_s20 = sand.u32 1, %s1884_s15  }
   0x8   : > { %s1944_s19 = scalar_select %p43_p1, %s1880_s14, %s45_s17  }
   0x9   : > { %p54_p4 = por %p53_p2, %p52_p0  ;;  %s147_s21 = sand.u32 1, %s1880_s14  }
   0xa   : > { %s1350_s22 = sshll.u32 %s147_s21, 10  ;;  %s1492_s23 = sshll.u32 %s1884_s15, 8 }
   0xb   : > { %s1954_s26 = scalar_lea.hbm %s2249_s1, %s1492_s23  ;;  %s149_s27 = scalar_lea.vmem [#allocation4], %s1350_s22 }
   0xc   : > { %s156_s28 = sshll.u32 %s149_s27, 4  ;;  %p1956_p5 = pnand %p1526_p3, %p54_p4  ;;  %s1960_s28 = int_to_ptr.vmem [resolvable:$true] %s156_s28 }
   0xd   : > { %s1962_s30 = scalar_lea.sflag [#allocation5], %s145_s20  ;;  %s1758_s4 = scalar_lea.hbm %s1954_s26, 16384 }
   0xe   : > { %s2258_s29 = scalar_select %p1956_p5, 1, 0 }
   0xf   : > { %p1759_p6 = scmp.ne.s32.totalorder %s1954_s26, %s1758_s4  ;;  %p2253_p7 = pneg %p1956_p5 }
  0x10   : > { %s1763_s7 = scalar_lea.hbm %s2249_s1, 32768  ;;  %p1764_p10 = scmp.lt.u32.totalorder %s1954_s26, %s2249_s1 }
  0x11   : > { %p1761_p8 = pnand %p2253_p7, %p1759_p6  ;;  %p1765_p11 = scmp.lt.u32.totalorder %s1763_s7, %s1758_s4 }
  0x12   : > { %p1767_p13 = scmp.lt.u32.totalorder %s1758_s4, %s1954_s26 }
  0x13   : > { %p1762_p9 = pneg %p1761_p8  ;;  %p1766_p12 = por %p1765_p11, %p1764_p10 }
  0x15   : > { %p1768_p0 = por %p1767_p13, %p1766_p12 }
  0x17   : > { %p1769_p1 = pnand %p1768_p0, %p1762_p9 }
  0x19   : > { %1772 = shalt.err (!%p1769_p1)
}
  0x1a   : > { %s1773_s10 = scalar_lea.vmem %s1960_s28, 16384  ;;  %s1886_s11 = smov [#allocation4]  }
  0x1b   : > { %p1774_p2 = scmp.ne.s32.totalorder %s1960_s28, %s1773_s10  ;;  %s1778_s17 = sshll.u32 %s1886_s11, 4  ;;  %s1779_s17 = int_to_ptr.vmem [resolvable:$false] %s1778_s17 }
  0x1c   : > { %s1780_s18 = scalar_lea.vmem %s1779_s17, 32768  ;;  %p1781_p6 = scmp.lt.s32.totalorder %s1960_s28, %s1779_s17 }
  0x1d   : > { %p1776_p3 = pnand %p1774_p2, %p2253_p7  ;;  %p1782_p8 = scmp.lt.s32.totalorder %s1780_s18, %s1773_s10 }
  0x1f   : > { %p1777_p4 = pneg %p1776_p3  ;;  %p1783_p10 = por %p1782_p8, %p1781_p6 }
  0x21   : > { %p1784_p11 = pnand %p1783_p10, %p1777_p4 }
  0x23   : > { %1787 = shalt.err (!%p1784_p11)
}
  0x24   : > { %s1887_s20 = smov 512   ;;  %s1888_s22 = smov 256  }
  0x25   : > { %s1889_s23 = smov 16   ;;  %s1991_s24 = sadd.s32 4294967295, %s1884_s15  }
  0x26   : > { %1521 = dma.hbm_to_vmem [thread:$0]  (!%p1956_p5), %s1954_s26, 16384, %s1960_s28, %s1962_s30, %s1887_s20, %s1888_s22, %s1889_s23  }
  0x27   : > { %p58_p9 = scmp.ne.s32.totalorder %s1876_s13, %s1872_s12  ;;  %p2252_p12 = scmp.eq.s32.totalorder %s1991_s24, 0 }
  0x28   : > { %p1347_p13 = scmp.ge.s32.totalorder %s1884_s15, 1  ;;  %p121_p0 = scmp.lt.s32.totalorder %s1884_s15, 3 }
  0x29   : > { %p2000_p1 = por %p2252_p12, %p58_p9  ;;  %s1890_s26 = smov [#allocation2]  }
  0x2a   : > { %p2004_p2 = pnand %p1347_p13, %p121_p0  ;;  %s134_s28 = sshll.u32 %s1890_s26, 4  ;;  %s135_s28 = int_to_ptr.vmem [resolvable:$true] %s134_s28 }
  0x2b   : > { %s2259_s25 = scalar_select %p2000_p1, 1, 0 }
  0x2c   : > { %s2260_s27 = scalar_select %p2004_p2, 1, 0 }
  0x2d   : > { %s1353_s4 = sshll.u32 %s147_s21, 2  ;;  %p1514_p3 = pneg %p2004_p2 }
  0x2e   : > { %s1493_s12 = sshll.u32 %s1884_s15, 6  ;;  %s170_s9 = scalar_lea.vmem [#allocation6], %s1353_s4 }
  0x2f   : > { %p2015_p4 = pnand %p1514_p3, %p2252_p12  ;;  %s2022_s8 = scalar_lea.hbm %s2250_s2, %s1493_s12 }
  0x30   : > { %s178_s10 = sshll.u32 %s170_s9, 4  ;;  %s1788_s15 = scalar_lea.hbm %s2248_s0, 128  ;;  %s2024_s10 = int_to_ptr.vmem [resolvable:$true] %s178_s10 }
  0x31   : > { %p1789_p6 = scmp.ne.s32.totalorder %s2248_s0, %s1788_s15  ;;  %p1790_p8 = pneg %p2015_p4 }
  0x32   : > { %p1795_p9 = scmp.lt.u32.totalorder %s1788_s15, %s2248_s0 }
  0x33   : > { %p1791_p10 = pnand %p1790_p8, %p1789_p6 }
  0x35   : > { %p1792_p11 = pneg %p1791_p10 }
  0x37   : > { %p1797_p13 = pnand %p1795_p9, %p1792_p11 }
  0x39   : > { %1800 = shalt.err (!%p1797_p13)
}
  0x3a   : > { %s1801_s23 = scalar_lea.vmem %s135_s28, 128  ;;  %p1809_p7 = scmp.lt.s32.totalorder %s135_s28, %s135_s28 }
  0x3b   : > { %p1802_p0 = scmp.ne.s32.totalorder %s135_s28, %s1801_s23  ;;  %p1810_p1 = scmp.lt.s32.totalorder %s1801_s23, %s1801_s23 }
  0x3d   : > { %p1804_p3 = pnand %p1802_p0, %p1790_p8  ;;  %p1811_p2 = por %p1810_p1, %p1809_p7 }
  0x3f   : > { %p1805_p12 = pneg %p1804_p3 }
  0x41   : > { %p1812_p5 = pnand %p1811_p2, %p1805_p12 }
  0x43   : > { %1815 = shalt.err (!%p1812_p5)
}
  0x44   : > { %1517 = dma.hbm_to_vmem [thread:$0]  (!%p2015_p4), %s2248_s0, 128, %s135_s28, [#allocation3]  }
  0x45   : > { %s1816_s12 = scalar_lea.hbm %s2022_s8, 64  ;;  %p2262_p8 = scmp.ne.s32.totalorder %s2258_s29, 0 }
  0x46   : > { %p1817_p6 = scmp.ne.s32.totalorder %s2022_s8, %s1816_s12  ;;  %s1821_s9 = scalar_lea.hbm %s2250_s2, 128 }
  0x47   : > { %p2263_p10 = pneg %p2262_p8  ;;  %p1822_p5 = scmp.lt.u32.totalorder %s2022_s8, %s2250_s2 }
  0x48   : > { %p1823_p7 = scmp.lt.u32.totalorder %s1821_s9, %s1816_s12  ;;  %p1825_p1 = scmp.lt.u32.totalorder %s1816_s12, %s2022_s8 }
  0x49   : > { %p1819_p11 = pnand %p1817_p6, %p2263_p10 }
  0x4a   : > { %p1824_p12 = por %p1823_p7, %p1822_p5 }
  0x4b   : > { %p1820_p9 = pneg %p1819_p11 }
  0x4c   : > { %p1826_p2 = por %p1825_p1, %p1824_p12 }
  0x4e   : > { %p1827_p13 = pnand %p1826_p2, %p1820_p9 }
  0x50   : > { %1830 = shalt.err (!%p1827_p13)
}
  0x51   : > { %s1831_s28 = scalar_lea.vmem %s2024_s10, 64  ;;  %p2264_p0 = pmov %p2263_p10 }
  0x52   : > { %p1832_p4 = scmp.ne.s32.totalorder %s2024_s10, %s1831_s28  ;;  %s1891_s11 = smov [#allocation6]  }
  0x53   : > { %s1836_s15 = sshll.u32 %s1891_s11, 4  ;;  %s1837_s15 = int_to_ptr.vmem [resolvable:$false] %s1836_s15 }
  0x54   : > { %p1834_p3 = pnand %p1832_p4, %p2264_p0  ;;  %s1838_s17 = scalar_lea.vmem %s1837_s15, 128 }
  0x55   : > { %p1839_p10 = scmp.lt.s32.totalorder %s2024_s10, %s1837_s15  ;;  %p1840_p11 = scmp.lt.s32.totalorder %s1838_s17, %s1831_s28 }
  0x56   : > { %p1835_p6 = pneg %p1834_p3 }
  0x57   : > { %p1841_p5 = por %p1840_p11, %p1839_p10 }
  0x59   : > { %p1842_p7 = pnand %p1841_p5, %p1835_p6 }
  0x5b   : > { %1845 = shalt.err (!%p1842_p7)
}
  0x5c   : > { %1524 = dma.hbm_to_vmem [thread:$0]  (!%p2262_p8), %s2022_s8, 64, %s2024_s10, %s1962_s30  }
  0x5d   : > { %p2265_p9 = scmp.ne.s32.totalorder %s2260_s27, 0 }
  0x5e   : > { %p2266_p12 = scmp.eq.s32.totalorder (!%p2265_p9), %s1991_s24, 0 }
  0x5f   : > { %187 = sbr.rel (%p2265_p9) target bundleno = 459 (0x1cb), region = 32 }
  0x66   : > { %1863 = dma.done.wait (%p2266_p12), [#allocation3], 128   ;;  %p2267_p1 = pmov %p2266_p12 }
  0x67   : > { %s193_s18 = sand.u32 1, %s1991_s24   ;;  %s195_s20 = sand.u32 1, %s1876_s13  }
  0x68   : > { %1865 = vsyncadd (%p2267_p1), [#allocation3], 4294967168  ;;  %s1358_s29 = sshll.u32 %s195_s20, 10  ;;  %s194_s22 = scalar_lea.sflag [#allocation5], %s193_s18 }
  0x69   : > { %s2076_s23 = scalar_lea.vmem [#allocation4], %s1358_s29  ;;  %p2268_p8 = scmp.ne.s32.totalorder %s2259_s25, 0 }
  0x6b   : > { %1867 = dma.done.wait (%p2268_p8), %s194_s22, 16448  }
  0x6c   : > { %1869 = vsyncadd (%p2268_p8), %s194_s22, 4294950848  ;;  %v1565_v0 = vld [vmem:[%s2076_s23 + $0x4] ss:$16 sps:$4 sm:$0xff]   ;;  %v1567_v1 = vld [vmem:[%s2076_s23 + $0xc] ss:$16 sps:$4 sm:$0xff]   ;;  %v248_v38 = vlaneseq  ;;  %s1359_s30 = sshll.u32 %s195_s20, 2 }
  0x6d   : > { %1059 = vmatprep.subr.bf16.mxu0 %v1565_v0  ;;  %v1569_v2 = vld [vmem:[%s2076_s23] ss:$16 sps:$4 sm:$0xff]   ;;  %v1570_v3 = vld [vmem:[%s2076_s23 + $0x8] ss:$16 sps:$4 sm:$0xff]   ;;  %1141 = vmatprep.subr.bf16.mxu1 %v1567_v1  ;;  %v1571_v4 = vld [vmem:[%s2076_s23 + $0x24] ss:$16 sps:$4 sm:$0xff]  }
  0x6e   : > { %1060 = vmatpush1.bf16.msra.mxu0 %v1569_v2  ;;  %1142 = vmatpush1.bf16.msra.mxu1 %v1570_v3  ;;  %v1573_v5 = vld [vmem:[%s2076_s23 + $0x2c] ss:$16 sps:$4 sm:$0xff]   ;;  %v1575_v6 = vld [vmem:[%s2076_s23 + $0x20] ss:$16 sps:$4 sm:$0xff]   ;;  %v1576_v7 = vld [vmem:[%s2076_s23 + $0x28] ss:$16 sps:$4 sm:$0xff]  }
  0x6f   : > { %1061 = vmatprep.subr.bf16.mxu0 %v1571_v4  ;;  %1143 = vmatprep.subr.bf16.mxu1 %v1573_v5  ;;  %v1577_v8 = vld [vmem:[%s2076_s23 + $0x44] ss:$16 sps:$4 sm:$0xff]   ;;  %v1579_v9 = vld [vmem:[%s2076_s23 + $0x4c] ss:$16 sps:$4 sm:$0xff]   ;;  %v1581_v10 = vld [vmem:[%s2076_s23 + $0x40] ss:$16 sps:$4 sm:$0xff]  }
  0x70   : > { %v1582_v11 = vld [vmem:[%s2076_s23 + $0x48] ss:$16 sps:$4 sm:$0xff]   ;;  %v1583_v12 = vld [vmem:[%s2076_s23 + $0x64] ss:$16 sps:$4 sm:$0xff]   ;;  %v1585_v13 = vld [vmem:[%s2076_s23 + $0x6c] ss:$16 sps:$4 sm:$0xff]  }
  0x71   : > { %v1587_v14 = vld [vmem:[%s2076_s23 + $0x60] ss:$16 sps:$4 sm:$0xff]   ;;  %v1588_v15 = vld [vmem:[%s2076_s23 + $0x68] ss:$16 sps:$4 sm:$0xff]   ;;  %v1589_v16 = vld [vmem:[%s2076_s23 + $0x84] ss:$16 sps:$4 sm:$0xff]  }
  0x72   : > { %1062 = vmatpush1.bf16.msra.mxu0 %v1575_v6  ;;  %1144 = vmatpush1.bf16.msra.mxu1 %v1576_v7  ;;  %v1591_v17 = vld [vmem:[%s2076_s23 + $0x8c] ss:$16 sps:$4 sm:$0xff]   ;;  %v1593_v18 = vld [vmem:[%s2076_s23 + $0x80] ss:$16 sps:$4 sm:$0xff]   ;;  %v1594_v19 = vld [vmem:[%s2076_s23 + $0x88] ss:$16 sps:$4 sm:$0xff]  }
  0x73   : > { %1063 = vmatprep.subr.bf16.mxu0 %v1577_v8  ;;  %1145 = vmatprep.subr.bf16.mxu1 %v1579_v9  ;;  %v1595_v20 = vld [vmem:[%s2076_s23 + $0xa4] ss:$16 sps:$4 sm:$0xff]   ;;  %v1597_v21 = vld [vmem:[%s2076_s23 + $0xac] ss:$16 sps:$4 sm:$0xff]   ;;  %v1599_v22 = vld [vmem:[%s2076_s23 + $0xa0] ss:$16 sps:$4 sm:$0xff]  }
  0x74   : > { %v1600_v23 = vld [vmem:[%s2076_s23 + $0xa8] ss:$16 sps:$4 sm:$0xff]   ;;  %v1601_v24 = vld [vmem:[%s2076_s23 + $0xc4] ss:$16 sps:$4 sm:$0xff]   ;;  %v1603_v25 = vld [vmem:[%s2076_s23 + $0xcc] ss:$16 sps:$4 sm:$0xff]  }
  0x75   : > { %v1605_v26 = vld [vmem:[%s2076_s23 + $0xc0] ss:$16 sps:$4 sm:$0xff]   ;;  %v1606_v27 = vld [vmem:[%s2076_s23 + $0xc8] ss:$16 sps:$4 sm:$0xff]   ;;  %v1607_v28 = vld [vmem:[%s2076_s23 + $0xe4] ss:$16 sps:$4 sm:$0xff]  }
  0x76   : > { %1064 = vmatpush1.bf16.msra.mxu0 %v1581_v10  ;;  %1146 = vmatpush1.bf16.msra.mxu1 %v1582_v11  ;;  %v1609_v29 = vld [vmem:[%s2076_s23 + $0xec] ss:$16 sps:$4 sm:$0xff]   ;;  %v1611_v30 = vld [vmem:[%s2076_s23 + $0xe0] ss:$16 sps:$4 sm:$0xff]   ;;  %v1612_v31 = vld [vmem:[%s2076_s23 + $0xe8] ss:$16 sps:$4 sm:$0xff]  }
  0x77   : > { %1065 = vmatprep.subr.bf16.mxu0 %v1583_v12  ;;  %1147 = vmatprep.subr.bf16.mxu1 %v1585_v13  ;;  %v1613_v32 = vld [vmem:[%s2076_s23 + $0x104] ss:$16 sps:$4 sm:$0xff]   ;;  %v1615_v33 = vld [vmem:[%s2076_s23 + $0x10c] ss:$16 sps:$4 sm:$0xff]   ;;  %v1617_v34 = vld [vmem:[%s2076_s23 + $0x100] ss:$16 sps:$4 sm:$0xff]  }
  0x78   : > { %v1618_v35 = vld [vmem:[%s2076_s23 + $0x108] ss:$16 sps:$4 sm:$0xff]   ;;  %v1892_v36 = vmov 1983009808   ;;  %v1619_v39 = vld [vmem:[%s2076_s23 + $0x124] ss:$16 sps:$4 sm:$0xff]  }
  0x79   : > { %v246_v37 = vunpack.c.l.s4 %v1892_v36  ;;  %v1621_v40 = vld [vmem:[%s2076_s23 + $0x12c] ss:$16 sps:$4 sm:$0xff]   ;;  %v1623_v41 = vld [vmem:[%s2076_s23 + $0x120] ss:$16 sps:$4 sm:$0xff]   ;;  %v2121_v43 = vshrl.u32 %v248_v38, 7  ;;  %s1360_s25 = sshll.u32 %s1991_s24, 2 }
  0x7a   : > { %1066 = vmatpush1.bf16.msra.mxu0 %v1587_v14  ;;  %1148 = vmatpush1.bf16.msra.mxu1 %v1588_v15  ;;  %v1624_v44 = vld [vmem:[%s2076_s23 + $0x128] ss:$16 sps:$4 sm:$0xff]   ;;  %v1625_v45 = vld [vmem:[%s2076_s23 + $0x144] ss:$16 sps:$4 sm:$0xff]   ;;  %v1627_v46 = vld [vmem:[%s2076_s23 + $0x14c] ss:$16 sps:$4 sm:$0xff]  }
  0x7b   : > { %1067 = vmatprep.subr.bf16.mxu0 %v1589_v16  ;;  %1149 = vmatprep.subr.bf16.mxu1 %v1591_v17  ;;  %v247_v42 = vunpack.c.0.s8 %v246_v37  ;;  %v1629_v47 = vld [vmem:[%s2076_s23 + $0x140] ss:$16 sps:$4 sm:$0xff]   ;;  %v1630_v48 = vld [vmem:[%s2076_s23 + $0x148] ss:$16 sps:$4 sm:$0xff]   ;;  %v1631_v50 = vld [vmem:[%s2076_s23 + $0x164] ss:$16 sps:$4 sm:$0xff]  }
  0x7c   : > { %v1633_v51 = vld [vmem:[%s2076_s23 + $0x16c] ss:$16 sps:$4 sm:$0xff]   ;;  %v1635_v53 = vld [vmem:[%s2076_s23 + $0x160] ss:$16 sps:$4 sm:$0xff]   ;;  %v1636_v55 = vld [vmem:[%s2076_s23 + $0x168] ss:$16 sps:$4 sm:$0xff]  }
  0x7d   : > { %v2129_v49 = vsub.s32 %v247_v42, %v2121_v43  ;;  %v242_v52 = vld [vmem:[#allocation2] sm:$0xff]  ;;  %v1637_v56 = vld [vmem:[%s2076_s23 + $0x184] ss:$16 sps:$4 sm:$0xff]   ;;  %v1641_v59 = vld [vmem:[%s2076_s23 + $0x180] ss:$16 sps:$4 sm:$0xff]   ;;  %s206_s27 = scalar_lea.vmem [#allocation6], %s1359_s30 }
  0x7e   : > { %1068 = vmatpush1.bf16.msra.mxu0 %v1593_v18  ;;  %1150 = vmatpush1.bf16.msra.mxu1 %v1594_v19  ;;  %v1639_v57 = vld [vmem:[%s2076_s23 + $0x18c] ss:$16 sps:$4 sm:$0xff]   ;;  %v1642_v61 = vld [vmem:[%s2076_s23 + $0x188] ss:$16 sps:$4 sm:$0xff]   ;;  %v1643_v62 = vld [vmem:[%s2076_s23 + $0x1a4] ss:$16 sps:$4 sm:$0xff]   ;;  %v244_v4 = vcombine.high %v242_v52, %v242_v52 }
  0x7f   : > { %1069 = vmatprep.subr.bf16.mxu0 %v1595_v20  ;;  %1151 = vmatprep.subr.bf16.mxu1 %v1597_v21  ;;  %v251_v54 = vrot.slane %v242_v52, %v2129_v49  ;;  %v1645_v63 = vld [vmem:[%s2076_s23 + $0x1ac] ss:$16 sps:$4 sm:$0xff]   ;;  %v1647_v0 = vld [vmem:[%s2076_s23 + $0x1a0] ss:$16 sps:$4 sm:$0xff]   ;;  %v1648_v1 = vld [vmem:[%s2076_s23 + $0x1a8] ss:$16 sps:$4 sm:$0xff]  }
  0x80   : > { %v1649_v2 = vld [vmem:[%s2076_s23 + $0x1c4] ss:$16 sps:$4 sm:$0xff]   ;;  %v1651_v3 = vld [vmem:[%s2076_s23 + $0x1cc] ss:$16 sps:$4 sm:$0xff]   ;;  %v1653_v5 = vld [vmem:[%s2076_s23 + $0x1c0] ss:$16 sps:$4 sm:$0xff]   ;;  %v2151_v9 = vrot.slane %v244_v4, %v2129_v49 }
  0x81   : > { %v259_v58 = vcombine.high %v251_v54, %v251_v54  ;;  %v1654_v6 = vld [vmem:[%s2076_s23 + $0x1c8] ss:$16 sps:$4 sm:$0xff]   ;;  %v1655_v7 = vld [vmem:[%s2076_s23 + $0x1e4] ss:$16 sps:$4 sm:$0xff]   ;;  %v1657_v8 = vld [vmem:[%s2076_s23 + $0x1ec] ss:$16 sps:$4 sm:$0xff]   ;;  %v265_v16 = vpack.c.bf16 %v251_v54, %v251_v54 }
  0x82   : > { %1070 = vmatpush1.bf16.msra.mxu0 %v1599_v22  ;;  %1152 = vmatpush1.bf16.msra.mxu1 %v1600_v23  ;;  %v1659_v10 = vld [vmem:[%s2076_s23 + $0x1e0] ss:$16 sps:$4 sm:$0xff]   ;;  %v1660_v11 = vld [vmem:[%s2076_s23 + $0x1e8] ss:$16 sps:$4 sm:$0xff]   ;;  %v1664_v12 = vld [vmem:[%s2076_s23 + $0x204] ss:$16 sps:$4 sm:$0xff]   ;;  %v260_v14 = vcombine.high %v2151_v9, %v2151_v9 }
  0x83   : > { %1071 = vmatprep.subr.bf16.mxu0 %v1601_v24  ;;  %1153 = vmatprep.subr.bf16.mxu1 %v1603_v25  ;;  %v266_v60 = vpack.c.bf16 %v259_v58, %v259_v58  ;;  %v1667_v13 = vld [vmem:[%s2076_s23 + $0x20c] ss:$16 sps:$4 sm:$0xff]   ;;  %v1662_v15 = vld [vmem:[%s2076_s23 + $0x200] ss:$16 sps:$4 sm:$0xff]   ;;  %v1665_v17 = vld [vmem:[%s2076_s23 + $0x208] ss:$16 sps:$4 sm:$0xff]  }
  0x84   : > { %v1670_v18 = vld [vmem:[%s2076_s23 + $0x224] ss:$16 sps:$4 sm:$0xff]   ;;  %v1673_v19 = vld [vmem:[%s2076_s23 + $0x22c] ss:$16 sps:$4 sm:$0xff]   ;;  %v268_v20 = vpack.c.bf16 %v260_v14, %v260_v14  ;;  %v1668_v21 = vld [vmem:[%s2076_s23 + $0x220] ss:$16 sps:$4 sm:$0xff]  }
  0x85   : > { %1091 = vmatprep.mubr.bf16.mxu0 %v266_v60  ;;  %1173 = vmatprep.mubr.bf16.mxu1 %v266_v60  ;;  %v1671_v22 = vld [vmem:[%s2076_s23 + $0x228] ss:$16 sps:$4 sm:$0xff]   ;;  %v1676_v23 = vld [vmem:[%s2076_s23 + $0x244] ss:$16 sps:$4 sm:$0xff]   ;;  %v1679_v24 = vld [vmem:[%s2076_s23 + $0x24c] ss:$16 sps:$4 sm:$0xff]  }
  0x86   : > { %1072 = vmatpush1.bf16.msra.mxu0 %v1605_v26  ;;  %1154 = vmatpush1.bf16.msra.mxu1 %v1606_v27  ;;  %v1674_v25 = vld [vmem:[%s2076_s23 + $0x240] ss:$16 sps:$4 sm:$0xff]   ;;  %v1677_v26 = vld [vmem:[%s2076_s23 + $0x248] ss:$16 sps:$4 sm:$0xff]   ;;  %v1682_v27 = vld [vmem:[%s2076_s23 + $0x264] ss:$16 sps:$4 sm:$0xff]  }
  0x87   : > { %1073 = vmatprep.subr.bf16.mxu0 %v1607_v28  ;;  %1155 = vmatprep.subr.bf16.mxu1 %v1609_v29  ;;  %v1685_v28 = vld [vmem:[%s2076_s23 + $0x26c] ss:$16 sps:$4 sm:$0xff]   ;;  %v1680_v29 = vld [vmem:[%s2076_s23 + $0x260] ss:$16 sps:$4 sm:$0xff]   ;;  %v1695_v38 = vld [vmem:[%s2076_s23 + $0x2a8] ss:$16 sps:$4 sm:$0xff]  }
  0x88   : > { %v1697_v36 = vld [vmem:[%s2076_s23 + $0x2ac] ss:$16 sps:$4 sm:$0xff]   ;;  %v1692_v37 = vld [vmem:[%s2076_s23 + $0x2a0] ss:$16 sps:$4 sm:$0xff]   ;;  %v1701_v42 = vld [vmem:[%s2076_s23 + $0x2c8] ss:$16 sps:$4 sm:$0xff]  }
  0x89   : > { %v1713_v52 = vld [vmem:[%s2076_s23 + $0x308] ss:$16 sps:$4 sm:$0xff]   ;;  %v1721_v54 = vld [vmem:[%s2076_s23 + $0x32c] ss:$16 sps:$4 sm:$0xff]   ;;  %v1754_v14 = vld [vmem:[%s2076_s23 + $0x3e4] ss:$16 sps:$4 sm:$0xff]  }
  0x8a   : > { %1074 = vmatpush1.bf16.msra.mxu0 %v1611_v30  ;;  %1156 = vmatpush1.bf16.msra.mxu1 %v1612_v31  ;;  %v1683_v30 = vld [vmem:[%s2076_s23 + $0x268] ss:$16 sps:$4 sm:$0xff]   ;;  %v1688_v31 = vld [vmem:[%s2076_s23 + $0x284] ss:$16 sps:$4 sm:$0xff]   ;;  %v1727_v58 = vld [vmem:[%s2076_s23 + $0x34c] ss:$16 sps:$4 sm:$0xff]  }
  0x8b   : > { %1075 = vmatprep.subr.bf16.mxu0 %v1613_v32  ;;  %1157 = vmatprep.subr.bf16.mxu1 %v1615_v33  ;;  %v1691_v32 = vld [vmem:[%s2076_s23 + $0x28c] ss:$16 sps:$4 sm:$0xff]   ;;  %v1686_v33 = vld [vmem:[%s2076_s23 + $0x280] ss:$16 sps:$4 sm:$0xff]   ;;  %v1725_v60 = vld [vmem:[%s2076_s23 + $0x348] ss:$16 sps:$4 sm:$0xff]  }
  0x8c   : > { %v1737_v4 = vld [vmem:[%s2076_s23 + $0x388] ss:$16 sps:$4 sm:$0xff]   ;;  %p237_p2 = scmp.lt.s32.totalorder %s1360_s25, 7 }
  0x8e   : > { %1076 = vmatpush1.bf16.msra.mxu0 %v1617_v34  ;;  %1158 = vmatpush1.bf16.msra.mxu1 %v1618_v35  ;;  %v1689_v34 = vld [vmem:[%s2076_s23 + $0x288] ss:$16 sps:$4 sm:$0xff]   ;;  %v1694_v35 = vld [vmem:[%s2076_s23 + $0x2a4] ss:$16 sps:$4 sm:$0xff]   ;;  %s2274_s25 = smov (!%p237_p2, %s1360_s25), 7 }
  0x8f   : > { %1077 = vmatprep.subr.bf16.mxu0 %v1619_v39  ;;  %1159 = vmatprep.subr.bf16.mxu1 %v1621_v40  ;;  %v1700_v39 = vld [vmem:[%s2076_s23 + $0x2c4] ss:$16 sps:$4 sm:$0xff]   ;;  %v1703_v40 = vld [vmem:[%s2076_s23 + $0x2cc] ss:$16 sps:$4 sm:$0xff]   ;;  %s1361_s24 = sshll.u32 %s2274_s25, 1 }
  0x90   : > { %s240_s26 = scalar_lea.vmem %s2251_s3, %s1361_s24 }
  0x92   : > { %1078 = vmatpush1.bf16.msra.mxu0 %v1623_v41  ;;  %1160 = vmatpush1.bf16.msra.mxu1 %v1624_v44  ;;  %v1698_v41 = vld [vmem:[%s2076_s23 + $0x2c0] ss:$16 sps:$4 sm:$0xff]   ;;  %v1706_v44 = vld [vmem:[%s2076_s23 + $0x2e4] ss:$16 sps:$4 sm:$0xff]  }
  0x93   : > { %1079 = vmatprep.subr.bf16.mxu0 %v1625_v45  ;;  %1161 = vmatprep.subr.bf16.mxu1 %v1627_v46  ;;  %v1709_v45 = vld [vmem:[%s2076_s23 + $0x2ec] ss:$16 sps:$4 sm:$0xff]   ;;  %v1704_v46 = vld [vmem:[%s2076_s23 + $0x2e0] ss:$16 sps:$4 sm:$0xff]  }
  0x96   : > { %1080 = vmatpush1.bf16.msra.mxu0 %v1629_v47  ;;  %1162 = vmatpush1.bf16.msra.mxu1 %v1630_v48  ;;  %v1707_v47 = vld [vmem:[%s2076_s23 + $0x2e8] ss:$16 sps:$4 sm:$0xff]   ;;  %v1712_v48 = vld [vmem:[%s2076_s23 + $0x304] ss:$16 sps:$4 sm:$0xff]  }
  0x97   : > { %1081 = vmatprep.subr.bf16.mxu0 %v1631_v50  ;;  %1163 = vmatprep.subr.bf16.mxu1 %v1633_v51  ;;  %v1715_v50 = vld [vmem:[%s2076_s23 + $0x30c] ss:$16 sps:$4 sm:$0xff]   ;;  %v1710_v51 = vld [vmem:[%s2076_s23 + $0x300] ss:$16 sps:$4 sm:$0xff]  }
  0x9a   : > { %1082 = vmatpush1.bf16.msra.mxu0 %v1635_v53  ;;  %1164 = vmatpush1.bf16.msra.mxu1 %v1636_v55  ;;  %v1718_v53 = vld [vmem:[%s2076_s23 + $0x324] ss:$16 sps:$4 sm:$0xff]   ;;  %v1716_v55 = vld [vmem:[%s2076_s23 + $0x320] ss:$16 sps:$4 sm:$0xff]  }
  0x9b   : > { %1083 = vmatprep.subr.bf16.mxu0 %v1637_v56  ;;  %1165 = vmatprep.subr.bf16.mxu1 %v1639_v57  ;;  %v1719_v56 = vld [vmem:[%s2076_s23 + $0x328] ss:$16 sps:$4 sm:$0xff]   ;;  %v1724_v57 = vld [vmem:[%s2076_s23 + $0x344] ss:$16 sps:$4 sm:$0xff]  }
  0x9e   : > { %1084 = vmatpush1.bf16.msra.mxu0 %v1641_v59  ;;  %1166 = vmatpush1.bf16.msra.mxu1 %v1642_v61  ;;  %v1722_v59 = vld [vmem:[%s2076_s23 + $0x340] ss:$16 sps:$4 sm:$0xff]   ;;  %v1730_v61 = vld [vmem:[%s2076_s23 + $0x364] ss:$16 sps:$4 sm:$0xff]  }
  0x9f   : > { %1085 = vmatprep.subr.bf16.mxu0 %v1643_v62  ;;  %1167 = vmatprep.subr.bf16.mxu1 %v1645_v63  ;;  %v1733_v62 = vld [vmem:[%s2076_s23 + $0x36c] ss:$16 sps:$4 sm:$0xff]   ;;  %v1728_v63 = vld [vmem:[%s2076_s23 + $0x360] ss:$16 sps:$4 sm:$0xff]  }
  0xa2   : > { %1086 = vmatpush1.bf16.msra.mxu0 %v1647_v0  ;;  %1168 = vmatpush1.bf16.msra.mxu1 %v1648_v1  ;;  %v1731_v0 = vld [vmem:[%s2076_s23 + $0x368] ss:$16 sps:$4 sm:$0xff]   ;;  %v1736_v1 = vld [vmem:[%s2076_s23 + $0x384] ss:$16 sps:$4 sm:$0xff]  }
  0xa3   : > { %1087 = vmatprep.subr.bf16.mxu0 %v1649_v2  ;;  %1169 = vmatprep.subr.bf16.mxu1 %v1651_v3  ;;  %v1739_v2 = vld [vmem:[%s2076_s23 + $0x38c] ss:$16 sps:$4 sm:$0xff]   ;;  %v1734_v3 = vld [vmem:[%s2076_s23 + $0x380] ss:$16 sps:$4 sm:$0xff]  }
  0xa6   : > { %1088 = vmatpush1.bf16.msra.mxu0 %v1653_v5  ;;  %1170 = vmatpush1.bf16.msra.mxu1 %v1654_v6  ;;  %v1742_v5 = vld [vmem:[%s2076_s23 + $0x3a4] ss:$16 sps:$4 sm:$0xff]   ;;  %v1745_v6 = vld [vmem:[%s2076_s23 + $0x3ac] ss:$16 sps:$4 sm:$0xff]  }
  0xa7   : > { %1089 = vmatprep.subr.bf16.mxu0 %v1655_v7  ;;  %1171 = vmatprep.subr.bf16.mxu1 %v1657_v8  ;;  %v1740_v7 = vld [vmem:[%s2076_s23 + $0x3a0] ss:$16 sps:$4 sm:$0xff]   ;;  %v1743_v8 = vld [vmem:[%s2076_s23 + $0x3a8] ss:$16 sps:$4 sm:$0xff]  }
  0xaa   : > { %1090 = vmatpush1.bf16.msra.mxu0 %v1659_v10  ;;  %1172 = vmatpush1.bf16.msra.mxu1 %v1660_v11  ;;  %v1748_v10 = vld [vmem:[%s2076_s23 + $0x3c4] ss:$16 sps:$4 sm:$0xff]   ;;  %v1751_v11 = vld [vmem:[%s2076_s23 + $0x3cc] ss:$16 sps:$4 sm:$0xff]  }
  0xab   : > { %1100 = vmatprep.subr.bf16.mxu0 %v1664_v12  ;;  %1182 = vmatprep.subr.bf16.mxu1 %v1667_v13  ;;  %v1746_v12 = vld [vmem:[%s2076_s23 + $0x3c0] ss:$16 sps:$4 sm:$0xff]   ;;  %v1749_v13 = vld [vmem:[%s2076_s23 + $0x3c8] ss:$16 sps:$4 sm:$0xff]  }
  0xad   : > { %1092 = vmatmul.mubr.bf16.vlgmr.msra.gmra.mrb[0].mxu0 %v265_v16  ;;  %1174 = vmatmul.mubr.bf16.vlgmr.msra.gmra.mrb[0].mxu1 %v265_v16  ;;  %v1752_v16 = vld [vmem:[%s2076_s23 + $0x3e0] ss:$16 sps:$4 sm:$0xff]  }
  0xae   : > { %1101 = vmatpush1.bf16.msra.mxu0 %v1662_v15  ;;  %1183 = vmatpush1.bf16.msra.mxu1 %v1665_v17  ;;  %v1757_v15 = vld [vmem:[%s2076_s23 + $0x3ec] ss:$16 sps:$4 sm:$0xff]   ;;  %v1755_v17 = vld [vmem:[%s2076_s23 + $0x3e8] ss:$16 sps:$4 sm:$0xff]  }
  0xaf   : > { %1102 = vmatprep.subr.bf16.mxu0 %v1670_v18  ;;  %1184 = vmatprep.subr.bf16.mxu1 %v1673_v19  ;;  %v267_v18 = vpack.c.bf16 %v2151_v9, %v2151_v9  ;;  %v401_v19 = vsub.s32 0, %v2121_v43 }
  0xb0   : > { %1132 = vmatprep.mubr.bf16.mxu0 %v268_v20  ;;  %1214 = vmatprep.mubr.bf16.mxu1 %v268_v20  ;;  %v409_v20 = vsub.s32 2, %v2121_v43 }
  0xb2   : > { %1103 = vmatpush1.bf16.msra.mxu0 %v1668_v21  ;;  %1185 = vmatpush1.bf16.msra.mxu1 %v1671_v22  ;;  %v397_v21 = vld [vmem:[%s206_s27] sm:$0xf]  ;;  %v405_v22 = vsub.s32 1, %v2121_v43 }
  0xb3   : > { %1104 = vmatprep.subr.bf16.mxu0 %v1676_v23  ;;  %1186 = vmatprep.subr.bf16.mxu1 %v1679_v24  ;;  %v413_v23 = vsub.s32 3, %v2121_v43  ;;  %v402_v24 = vrot.slane %v397_v21, %v401_v19  ;;  %v410_v9 = vrot.slane %v397_v21, %v409_v20 }
  0xb6   : > { %1105 = vmatpush1.bf16.msra.mxu0 %v1674_v25  ;;  %1187 = vmatpush1.bf16.msra.mxu1 %v1677_v26  ;;  %v406_v25 = vrot.slane %v397_v21, %v405_v22  ;;  %v414_v26 = vrot.slane %v397_v21, %v413_v23 }
  0xb7   : > { %1106 = vmatprep.subr.bf16.mxu0 %v1682_v27  ;;  %1188 = vmatprep.subr.bf16.mxu1 %v1685_v28 }
  0xba   : > { %1107 = vmatpush1.bf16.msra.mxu0 %v1680_v29  ;;  %1189 = vmatpush1.bf16.msra.mxu1 %v1683_v30 }
  0xbb   : > { %1108 = vmatprep.subr.bf16.mxu0 %v1688_v31  ;;  %1190 = vmatprep.subr.bf16.mxu1 %v1691_v32 }
  0xbe   : > { %1109 = vmatpush1.bf16.msra.mxu0 %v1686_v33  ;;  %1191 = vmatpush1.bf16.msra.mxu1 %v1689_v34 }
  0xbf   : > { %1110 = vmatprep.subr.bf16.mxu0 %v1694_v35  ;;  %1192 = vmatprep.subr.bf16.mxu1 %v1697_v36 }
  0xc2   : > { %1111 = vmatpush1.bf16.msra.mxu0 %v1692_v37  ;;  %1193 = vmatpush1.bf16.msra.mxu1 %v1695_v38 }
  0xc3   : > { %1112 = vmatprep.subr.bf16.mxu0 %v1700_v39  ;;  %1194 = vmatprep.subr.bf16.mxu1 %v1703_v40 }
  0xc6   : > { %1113 = vmatpush1.bf16.msra.mxu0 %v1698_v41  ;;  %1195 = vmatpush1.bf16.msra.mxu1 %v1701_v42 }
  0xc7   : > { %1114 = vmatprep.subr.bf16.mxu0 %v1706_v44  ;;  %1196 = vmatprep.subr.bf16.mxu1 %v1709_v45 }
  0xca   : > { %1115 = vmatpush1.bf16.msra.mxu0 %v1704_v46  ;;  %1197 = vmatpush1.bf16.msra.mxu1 %v1707_v47 }
  0xcb   : > { %1116 = vmatprep.subr.bf16.mxu0 %v1712_v48  ;;  %1198 = vmatprep.subr.bf16.mxu1 %v1715_v50 }
  0xce   : > { %1117 = vmatpush1.bf16.msra.mxu0 %v1710_v51  ;;  %1199 = vmatpush1.bf16.msra.mxu1 %v1713_v52 }
  0xcf   : > { %1118 = vmatprep.subr.bf16.mxu0 %v1718_v53  ;;  %1200 = vmatprep.subr.bf16.mxu1 %v1721_v54 }
  0xd2   : > { %1119 = vmatpush1.bf16.msra.mxu0 %v1716_v55  ;;  %1201 = vmatpush1.bf16.msra.mxu1 %v1719_v56 }
  0xd3   : > { %1120 = vmatprep.subr.bf16.mxu0 %v1724_v57  ;;  %1202 = vmatprep.subr.bf16.mxu1 %v1727_v58 }
  0xd6   : > { %1121 = vmatpush1.bf16.msra.mxu0 %v1722_v59  ;;  %1203 = vmatpush1.bf16.msra.mxu1 %v1725_v60 }
  0xd7   : > { %1122 = vmatprep.subr.bf16.mxu0 %v1730_v61  ;;  %1204 = vmatprep.subr.bf16.mxu1 %v1733_v62 }
  0xda   : > { %1123 = vmatpush1.bf16.msra.mxu0 %v1728_v63  ;;  %1205 = vmatpush1.bf16.msra.mxu1 %v1731_v0 }
  0xdb   : > { %1124 = vmatprep.subr.bf16.mxu0 %v1736_v1  ;;  %1206 = vmatprep.subr.bf16.mxu1 %v1739_v2 }
  0xde   : > { %1125 = vmatpush1.bf16.msra.mxu0 %v1734_v3  ;;  %1207 = vmatpush1.bf16.msra.mxu1 %v1737_v4 }
  0xdf   : > { %1126 = vmatprep.subr.bf16.mxu0 %v1742_v5  ;;  %1208 = vmatprep.subr.bf16.mxu1 %v1745_v6 }
  0xe2   : > { %1127 = vmatpush1.bf16.msra.mxu0 %v1740_v7  ;;  %1209 = vmatpush1.bf16.msra.mxu1 %v1743_v8 }
  0xe3   : > { %1128 = vmatprep.subr.bf16.mxu0 %v1748_v10  ;;  %1210 = vmatprep.subr.bf16.mxu1 %v1751_v11 }
  0xe6   : > { %1129 = vmatpush1.bf16.msra.mxu0 %v1746_v12  ;;  %1211 = vmatpush1.bf16.msra.mxu1 %v1749_v13 }
  0xe7   : > { %1130 = vmatprep.subr.bf16.mxu0 %v1754_v14  ;;  %1212 = vmatprep.subr.bf16.mxu1 %v1757_v15 }
  0xea   : > { %1131 = vmatpush1.bf16.msra.mxu0 %v1752_v16  ;;  %1213 = vmatpush1.bf16.msra.mxu1 %v1755_v17 }
  0xed   : > { %1133 = vmatmul.mubr.bf16.vlgmr.msra.gmra.mrb[0].mxu0 %v267_v18  ;;  %1215 = vmatmul.mubr.bf16.vlgmr.msra.gmra.mrb[0].mxu1 %v267_v18 }
 0x1c0   : > { %v1134_v27 = vpop.f32.mrb[0].mxu0  ;;  %v1216_v28 = vpop.f32.mrb[0].mxu1 }
 0x1c1   : > { %v1494_v29 = vadd.f32 %v1134_v27, %v402_v24  ;;  %v1496_v30 = vadd.f32 %v1216_v28, %v410_v9  ;;  %v1136_v31 = vpop.f32.mrb[1].mxu0  ;;  %v1218_v32 = vpop.f32.mrb[1].mxu1 }
 0x1c2   : > { %v1495_v33 = vadd.f32 %v1136_v31, %v406_v25  ;;  %v1497_v34 = vadd.f32 %v1218_v32, %v414_v26  ;;  %v1138_v35 = vpop.f32.mrb[2].mxu0  ;;  %v1220_v36 = vpop.f32.mrb[2].mxu1 }
 0x1c3   : > { %v1139_v37 = vpop.f32.mrb[3].mxu0  ;;  %v1221_v38 = vpop.f32.mrb[3].mxu1 }
 0x1c4   : > { %v1227_v39 = vcombine.low %v1494_v29, %v1495_v33  ;;  %v1228_v43 = vcombine.low %v1496_v30, %v1497_v34 }
 0x1c6   : > { %v1235_v40 = vrot.slane %v1227_v39, %v2129_v49  ;;  %v1242_v41 = vrot.slane %v1228_v43, %v2129_v49 }
 0x1c8   : > { %v1243_v42 = vcombine.low %v1235_v40, %v1242_v41 }
 0x1ca   : > { %1245 = vst [vmem:[%s240_s26] sm:$0xff] %v1243_v42 }
 0x1cb PF: > { %p14_p13 = scmp.ge.s32.totalorder %s1934_s16, 4   ;;  %s2269_s12 = smov %s1876_s13 }
 0x1cc   : > { %s2270_s13 = smov %s1880_s14  ;;  %s2271_s14 = smov %s1944_s19 }
 0x1cd   : > { %s2272_s15 = smov %s1934_s16  ;;  %16 = sbr.rel (!%p14_p13) target bundleno = 4 (0x4), region = 88 }
 0x1d4   :  { %1268 = vsyncpa [#allocation3], 1 }
 0x1d5   :  { %1270 = vsyncpa [#allocation3 + $0x1], 1 }
 0x1d6   :  { %1271 = vsyncpa [#allocation5], 1 }
 0x1d7   :  { %1273 = vsyncpa [#allocation5 + $0x1], 1 }

// kernel: my_cnn_coarse_forward.3
= control target key start
LH: loop header
LB: loop body
LE: loop exit
PB: predicated region body
PF: predicated region fallthrough
CT: control target
= control target key end

     0   :  { %s7013_s18 = smov 0   ;;  %s8886_s0 = inlined_call_operand.vmem [shape: f32[2,128,8], index: 0, kind: input, shape index: {}]   ;;  %s8887_s1 = inlined_call_operand.vmem [shape: bf16[3,120,128], index: 1, kind: input, shape index: {}]   ;;  %s8888_s2 = inlined_call_operand.vmem [shape: bf16[16,16], index: 2, kind: input, shape index: {}]   ;;  %s8889_s3 = inlined_call_operand.vmem [shape: f32[120,16], index: 3, kind: input, shape index: {}]   ;;  %s8890_s4 = inlined_call_operand.vmem [shape: bf16[3,120,120], index: 4, kind: input, shape index: {}]   ;;  %s8891_s5 = inlined_call_operand.vmem [shape: bf16[32,32], index: 5, kind: input, shape index: {}]   ;;  %s8892_s6 = inlined_call_operand.vmem [shape: f32[120,32], index: 6, kind: input, shape index: {}]   ;;  %s8893_s7 = inlined_call_operand.vmem [shape: bf16[3,120,120], index: 7, kind: input, shape index: {}]   ;;  %s8894_s8 = inlined_call_operand.vmem [shape: bf16[64,64], index: 8, kind: input, shape index: {}]   ;;  %s8895_s9 = inlined_call_operand.vmem [shape: f32[120,64], index: 9, kind: input, shape index: {}]   ;;  %s8896_s10 = inlined_call_operand.vmem [shape: bf16[3,120,120], index: 10, kind: input, shape index: {}]   ;;  %s8897_s11 = inlined_call_operand.vmem [shape: bf16[128,128], index: 11, kind: input, shape index: {}]   ;;  %s8898_s12 = inlined_call_operand.vmem [shape: f32[120,128], index: 12, kind: input, shape index: {}]   ;;  %s8899_s13 = inlined_call_operand.vmem [shape: bf16[3,232,120], index: 13, kind: input, shape index: {}]   ;;  %s8900_s14 = inlined_call_operand.vmem [shape: f32[232,256], index: 14, kind: input, shape index: {}]   ;;  %s8901_s15 = inlined_call_operand.vmem [shape: f32[2,224,256], index: 15, kind: output, shape index: {}]  }
   0x1 LB: > { %s5149_s19 = sadd.s32 4294967295, %s6920_s18   ;;  %p5153_p0 = scmp.ge.s32.totalorder %s6920_s18, 1  ;;  %s6920_s18 = sphi %s7013_s18, %s25_s18  }
   0x2   : > { %p437_p1 = scmp.lt.s32.totalorder %s6920_s18, 3 }
   0x4   : > { %p438_p2 = pnand %p5153_p0, %p437_p1 }
   0x5   : > { %p485_p3 = scmp.lt.s32.totalorder (!%p438_p2), %s5149_s19, 1  ;;  %v6758_v0 = vld [vmem:[%s8887_s1] sm:$0xff] (!%p438_p2)   ;;  %s6922_s26 = smov (!%p438_p2), 127   ;;  %v6759_v25 = vld [vmem:[%s8887_s1 + $0x8] sm:$0xff] (!%p438_p2)   ;;  %v6760_v26 = vld [vmem:[%s8887_s1 + $0x10] sm:$0xff] (!%p438_p2)   ;;  %vm560_vm0 = vcmask (!%p438_p2), 56320  }
   0x6   : > { %441 = sbr.rel (%p438_p2) target bundleno = 3460 (0xd84), region = 80  ;;  %5959 = vmatprep.mubr.bf16.mxu1 (!%p438_p2), %v6758_v0  ;;  %s6923_s27 = smov (!%p438_p2), 7   ;;  %v6761_v27 = vld [vmem:[%s8887_s1 + $0x18] sm:$0xff] (!%p438_p2)   ;;  %v6762_v28 = vld [vmem:[%s8887_s1 + $0x20] sm:$0xff] (!%p438_p2)   ;;  %v6763_v29 = vld [vmem:[%s8887_s1 + $0x28] sm:$0xff] (!%p438_p2)   ;;  %vm1126_vm1 = vcmask (!%p438_p2), 64512  }
   0x7   : > { %v6764_v30 = vld [vmem:[%s8887_s1 + $0x30] sm:$0xff] (!%p438_p2)   ;;  %v6765_v31 = vld [vmem:[%s8887_s1 + $0x38] ss:$0 sps:$4 sm:$0xff] (!%p438_p2)   ;;  %v6767_v57 = vld [vmem:[%s8887_s1 + $0x80] sm:$0xff] (!%p438_p2)   ;;  %s6924_s28 = smov (!%p438_p2), 8   ;;  %vm1203_vm2 = vcmask (!%p438_p2), 130048  }
   0x8   : > { %v6766_v32 = vld [vmem:[%s8887_s1 + $0x78] sm:$0xff] (!%p438_p2)   ;;  %v6768_v58 = vld [vmem:[%s8887_s1 + $0x88] sm:$0xff] (!%p438_p2)   ;;  %v6769_v59 = vld [vmem:[%s8887_s1 + $0x90] sm:$0xff] (!%p438_p2)   ;;  %vm1457_vm3 = vcmask (!%p438_p2), 982016   ;;  %vm1482_vm4 = vcmask (!%p438_p2), 1043456   ;;  %vm1372_vm5 = vcmask (!%p438_p2), 121856  }
   0x9   : > { %v6770_v60 = vld [vmem:[%s8887_s1 + $0x98] sm:$0xff] (!%p438_p2)   ;;  %v6771_v61 = vld [vmem:[%s8887_s1 + $0xa0] sm:$0xff] (!%p438_p2)   ;;  %v6772_v62 = vld [vmem:[%s8887_s1 + $0xa8] sm:$0xff] (!%p438_p2)   ;;  %vm2076_vm6 = vcmask (!%p438_p2), 261120   ;;  %vm2245_vm7 = vcmask (!%p438_p2), 252928   ;;  %s6928_s17 = smov (!%p438_p2), 32  }
   0xa   : > { %v6773_v63 = vld [vmem:[%s8887_s1 + $0xb0] ss:$0 sps:$4 sm:$0xff] (!%p438_p2)   ;;  %v6774_v0 = vld [vmem:[%s8887_s1 + $0x3c] sm:$0xff] (!%p438_p2)   ;;  %vm2963_vm8 = vcmask (!%p438_p2), 523264   ;;  %vm3132_vm9 = vcmask (!%p438_p2), 515072   ;;  %vm6932_vm10 = vmmov (!%p438_p2), 0  }
   0xd   : > { %s8903_s19 = smov (!%p485_p3, %s5149_s19), 1 }
   0xe   : > { %s5634_s22 = sshll.u32 %s8903_s19, 7 }
   0xf   : > { %s7030_s25 = scalar_lea.vmem %s8886_s0, %s5634_s22  ;;  %s6925_s22 = smov 15  }
  0x10   : > { %v498_v1 = vld [vmem:[%s7030_s25 + $0x10] sm:$0xff]  ;;  %v499_v2 = vld [vmem:[%s7030_s25 + $0x18] sm:$0xff]  ;;  %v496_v3 = vld [vmem:[%s7030_s25] sm:$0xff] }
  0x11   : > { %v7035_v4 = vpack.c.bf16 %v499_v2, %v498_v1  ;;  %v497_v5 = vld [vmem:[%s7030_s25 + $0x8] sm:$0xff]  ;;  %v500_v7 = vld [vmem:[%s7030_s25 + $0x20] sm:$0xff]  ;;  %v502_v9 = vld [vmem:[%s7030_s25 + $0x30] sm:$0xff] }
  0x12   : > { %v7038_v6 = vpack.c.bf16 %v497_v5, %v496_v3  ;;  %v501_v8 = vld [vmem:[%s7030_s25 + $0x28] sm:$0xff]  ;;  %v503_v10 = vld [vmem:[%s7030_s25 + $0x38] sm:$0xff]  ;;  %v504_v12 = vld [vmem:[%s7030_s25 + $0x40] sm:$0xff] }
  0x13   : > { %530 = vrot.lane.b32.xlu1 %v7035_v4, %s6922_s26  ;;  %v7053_v11 = vpack.c.bf16 %v501_v8, %v500_v7  ;;  %v505_v13 = vld [vmem:[%s7030_s25 + $0x48] sm:$0xff]  ;;  %v7063_v14 = vpack.c.bf16 %v503_v10, %v502_v9  ;;  %v506_v15 = vld [vmem:[%s7030_s25 + $0x50] sm:$0xff]  ;;  %v507_v16 = vld [vmem:[%s7030_s25 + $0x58] sm:$0xff] }
  0x14   : > { %528 = vrot.lane.b32.xlu0 %v7038_v6, %s6922_s26  ;;  %5943 = vmatprep.subr.bf16.mxu1 %v7038_v6  ;;  %v7073_v17 = vpack.c.bf16 %v505_v13, %v504_v12  ;;  %v508_v18 = vld [vmem:[%s7030_s25 + $0x60] sm:$0xff]  ;;  %v509_v19 = vld [vmem:[%s7030_s25 + $0x68] sm:$0xff]  ;;  %v7083_v20 = vpack.c.bf16 %v507_v16, %v506_v15  ;;  %v510_v21 = vld [vmem:[%s7030_s25 + $0x70] sm:$0xff] }
  0x15   : > { %5944 = vmatpush3.bf16.msra.mxu1 %v7038_v6  ;;  %v511_v22 = vld [vmem:[%s7030_s25 + $0x78] sm:$0xff]  ;;  %v7093_v23 = vpack.c.bf16 %v509_v19, %v508_v18  ;;  %v6775_v1 = vld [vmem:[%s8887_s1 + $0x44] sm:$0xff]   ;;  %v6776_v2 = vld [vmem:[%s8887_s1 + $0x4c] sm:$0xff]  }
  0x16   : > { %5945 = vmatprep.subr.bf16.mxu1 %v7035_v4  ;;  %v7101_v24 = vpack.c.bf16 %v511_v22, %v510_v21  ;;  %v6777_v3 = vld [vmem:[%s8887_s1 + $0x54] sm:$0xff]   ;;  %v6779_v5 = vld [vmem:[%s8887_s1 + $0x64] sm:$0xff]  }
  0x17   : > { %546 = vrot.lane.b32.xlu1 %v7035_v4, %s6923_s27  ;;  %v6781_v7 = vld [vmem:[%s8887_s1 + $0x74] ss:$0 sps:$4 sm:$0xff]  }
  0x18   : > { %544 = vrot.lane.b32.xlu0 %v7038_v6, %s6923_s27 }
  0x19   : > { %5946 = vmatpush3.bf16.msra.mxu1 %v7035_v4 }
  0x1a   : > { %5947 = vmatprep.subr.bf16.mxu1 %v7053_v11 }
  0x1b   : > { %548 = vrot.lane.b32.xlu1 %v7053_v11, %s6923_s27 }
  0x1c   : > { %532 = vrot.lane.b32.xlu0 %v7053_v11, %s6922_s26 }
  0x1d   : > { %5948 = vmatpush3.bf16.msra.mxu1 %v7053_v11 }
  0x1e   : > { %5949 = vmatprep.subr.bf16.mxu1 %v7063_v14 }
  0x1f   : > { %550 = vrot.lane.b32.xlu1 %v7063_v14, %s6923_s27 }
  0x20   : > { %534 = vrot.lane.b32.xlu0 %v7063_v14, %s6922_s26 }
  0x21   : > { %5950 = vmatpush3.bf16.msra.mxu1 %v7063_v14 }
  0x22   : > { %5951 = vmatprep.subr.bf16.mxu1 %v7073_v17 }
  0x23   : > { %552 = vrot.lane.b32.xlu1 %v7073_v17, %s6923_s27 }
  0x24   : > { %536 = vrot.lane.b32.xlu0 %v7073_v17, %s6922_s26 }
  0x25   : > { %5952 = vmatpush3.bf16.msra.mxu1 %v7073_v17 }
  0x26   : > { %5953 = vmatprep.subr.bf16.mxu1 %v7083_v20 }
  0x27   : > { %554 = vrot.lane.b32.xlu1 %v7083_v20, %s6923_s27 }
  0x28   : > { %538 = vrot.lane.b32.xlu0 %v7083_v20, %s6922_s26 }
  0x29   : > { %5954 = vmatpush3.bf16.msra.mxu1 %v7083_v20 }
  0x2a   : > { %5955 = vmatprep.subr.bf16.mxu1 %v7093_v23 }
  0x2b   : > { %556 = vrot.lane.b32.xlu1 %v7093_v23, %s6923_s27 }
  0x2c   : > { %540 = vrot.lane.b32.xlu0 %v7093_v23, %s6922_s26 }
  0x2d   : > { %5956 = vmatpush3.bf16.msra.mxu1 %v7093_v23 }
  0x2e   : > { %5957 = vmatprep.subr.bf16.mxu1 %v7101_v24 }
  0x2f   : > { %558 = vrot.lane.b32.xlu1 %v7101_v24, %s6923_s27  ;;  %s6929_s27 = smov 63  }
  0x30   : > { %542 = vrot.lane.b32.xlu0 %v7101_v24, %s6922_s26 }
  0x31   : > { %5958 = vmatpush3.bf16.msra.mxu1 %v7101_v24 }
  0x34   : > { %5960 = vmatmul.mubr.bf16.vlgmr.msra.gmra.mrb[0].mxu1 %v6759_v25 }
  0x35   : > { %5963 = vmatprep.mubr.bf16.mxu1 %v6760_v26 }
  0x3c   : > { %5964 = vmatmul.mubr.bf16.gmra.mrb[4].mxu1 %v6761_v27 }
  0x3d   : > { %5967 = vmatprep.mubr.bf16.mxu1 %v6762_v28 }
  0x44   : > { %5968 = vmatmul.mubr.bf16.gmra.mrb[8].mxu1 %v6763_v29 }
  0x45   : > { %5971 = vmatprep.mubr.bf16.mxu1 %v6764_v30 }
  0x4c   : > { %5972 = vmatmul.mubr.bf16.gmra.mrb[12].mxu1 %v6765_v31 }
  0x4d   : > { %5991 = vmatprep.mubr.bf16.mxu1 %v6766_v32 }
  0x85   : > { %v531_v33 = vpop.permute.xlu1 %530 }
  0x86   : > { %v529_v34 = vpop.permute.xlu0 %528 }
  0x89   : > { %v547_v35 = vpop.permute.xlu1 %546 }
  0x8a   : > { %v545_v36 = vpop.permute.xlu0 %544  ;;  %v567_v38 = vsel %vm560_vm0, %v531_v33, %v547_v35 }
  0x8b   : > { %v563_v37 = vsel %vm560_vm0, %v529_v34, %v545_v36 }
  0x8c   : > { %5975 = vmatprep.subr.bf16.mxu1 %v563_v37 }
  0x8d   : > { %5976 = vmatpush3.bf16.msra.mxu1 %v563_v37  ;;  %v549_v39 = vpop.permute.xlu1 %548 }
  0x8e   : > { %5977 = vmatprep.subr.bf16.mxu1 %v567_v38  ;;  %v533_v40 = vpop.permute.xlu0 %532 }
  0x8f   : > { %v571_v41 = vsel %vm560_vm0, %v533_v40, %v549_v39 }
  0x91   : > { %5978 = vmatpush3.bf16.msra.mxu1 %v567_v38  ;;  %v551_v42 = vpop.permute.xlu1 %550 }
  0x92   : > { %5979 = vmatprep.subr.bf16.mxu1 %v571_v41  ;;  %v535_v43 = vpop.permute.xlu0 %534 }
  0x93   : > { %v575_v44 = vsel %vm560_vm0, %v535_v43, %v551_v42 }
  0x95   : > { %5980 = vmatpush3.bf16.msra.mxu1 %v571_v41  ;;  %v553_v45 = vpop.permute.xlu1 %552  ;;  %v1142_v41 = vld [vmem:[%s8889_s3] sm:$0xff] }
  0x96   : > { %5981 = vmatprep.subr.bf16.mxu1 %v575_v44  ;;  %v537_v46 = vpop.permute.xlu0 %536 }
  0x97   : > { %v579_v47 = vsel %vm560_vm0, %v537_v46, %v553_v45 }
  0x99   : > { %5982 = vmatpush3.bf16.msra.mxu1 %v575_v44  ;;  %v555_v48 = vpop.permute.xlu1 %554  ;;  %v1143_v44 = vld [vmem:[%s8889_s3 + $0x8] sm:$0xff] }
  0x9a   : > { %5983 = vmatprep.subr.bf16.mxu1 %v579_v47  ;;  %v539_v49 = vpop.permute.xlu0 %538 }
  0x9b   : > { %v583_v50 = vsel %vm560_vm0, %v539_v49, %v555_v48  ;;  %v1144_v48 = vld [vmem:[%s8889_s3 + $0x10] sm:$0xff] }
  0x9d   : > { %5984 = vmatpush3.bf16.msra.mxu1 %v579_v47  ;;  %v557_v51 = vpop.permute.xlu1 %556 }
  0x9e   : > { %5985 = vmatprep.subr.bf16.mxu1 %v583_v50  ;;  %v541_v52 = vpop.permute.xlu0 %540 }
  0x9f   : > { %v587_v53 = vsel %vm560_vm0, %v541_v52, %v557_v51  ;;  %v1145_v52 = vld [vmem:[%s8889_s3 + $0x18] sm:$0xff] }
  0xa1   : > { %5986 = vmatpush3.bf16.msra.mxu1 %v583_v50  ;;  %v559_v54 = vpop.permute.xlu1 %558 }
  0xa2   : > { %5987 = vmatprep.subr.bf16.mxu1 %v587_v53  ;;  %v543_v55 = vpop.permute.xlu0 %542 }
  0xa3   : > { %v591_v56 = vsel %vm560_vm0, %v543_v55, %v559_v54 }
  0xa5   : > { %5988 = vmatpush3.bf16.msra.mxu1 %v587_v53 }
  0xa6   : > { %5989 = vmatprep.subr.bf16.mxu1 %v591_v56 }
  0xa9   : > { %5990 = vmatpush3.bf16.msra.mxu1 %v591_v56 }
  0xaa   : > { %6007 = vmatprep.subr.bf16.mxu1 %v7038_v6 }
  0xac   : > { %5992 = vmatmul.mubr.bf16.vlgmr.msra.gmra.mrb[16].mxu1 %v6767_v57 }
  0xad   : > { %6008 = vmatpush3.bf16.msra.mxu1 %v7038_v6  ;;  %5995 = vmatprep.mubr.bf16.mxu1 %v6768_v58  ;;  %v6780_v6 = vld [vmem:[%s8887_s1 + $0x6c] sm:$0xff]   ;;  %v1146_v58 = vld [vmem:[%s8889_s3 + $0x20] sm:$0xff] }
  0xae   : > { %6009 = vmatprep.subr.bf16.mxu1 %v7035_v4 }
  0xb1   : > { %6010 = vmatpush3.bf16.msra.mxu1 %v7035_v4  ;;  %v6778_v4 = vld [vmem:[%s8887_s1 + $0x5c] sm:$0xff]  }
  0xb2   : > { %6011 = vmatprep.subr.bf16.mxu1 %v7053_v11 }
  0xb4   : > { %5996 = vmatmul.mubr.bf16.gmra.mrb[20].mxu1 %v6769_v59 }
  0xb5   : > { %6012 = vmatpush3.bf16.msra.mxu1 %v7053_v11  ;;  %5999 = vmatprep.mubr.bf16.mxu1 %v6770_v60 }
  0xb6   : > { %6013 = vmatprep.subr.bf16.mxu1 %v7063_v14 }
  0xb9   : > { %6014 = vmatpush3.bf16.msra.mxu1 %v7063_v14 }
  0xba   : > { %6015 = vmatprep.subr.bf16.mxu1 %v7073_v17 }
  0xbc   : > { %6000 = vmatmul.mubr.bf16.gmra.mrb[24].mxu1 %v6771_v61 }
  0xbd   : > { %6016 = vmatpush3.bf16.msra.mxu1 %v7073_v17  ;;  %6003 = vmatprep.mubr.bf16.mxu1 %v6772_v62 }
  0xbe   : > { %6017 = vmatprep.subr.bf16.mxu1 %v7083_v20 }
  0xc1   : > { %6018 = vmatpush3.bf16.msra.mxu1 %v7083_v20 }
  0xc2   : > { %6019 = vmatprep.subr.bf16.mxu1 %v7093_v23 }
  0xc4   : > { %6004 = vmatmul.mubr.bf16.gmra.mrb[28].mxu1 %v6773_v63  ;;  %v1147_v63 = vld [vmem:[%s8889_s3 + $0x28] sm:$0xff] }
  0xc5   : > { %6020 = vmatpush3.bf16.msra.mxu1 %v7093_v23  ;;  %6023 = vmatprep.mubr.bf16.mxu1 %v6774_v0 }
  0xc6   : > { %6021 = vmatprep.subr.bf16.mxu1 %v7101_v24 }
  0xc9   : > { %6022 = vmatpush3.bf16.msra.mxu1 %v7101_v24  ;;  %v6782_v24 = vld [vmem:[%s8888_s2] sm:$0xff]  }
  0xca   : > { %6039 = vmatprep.subr.bf16.mxu0 %v6782_v24 }
  0xcb   : > { %6040 = vmatpush3.bf16.msra.mxu0 %v6782_v24 }
  0xcc   : > { %6024 = vmatmul.mubr.bf16.vlgmr.msra.gmra.mrb[16].mxu1 %v6775_v1 }
  0xcd   : > { %6027 = vmatprep.mubr.bf16.mxu1 %v6776_v2 }
  0xd4   : > { %6028 = vmatmul.mubr.bf16.gmra.mrb[20].mxu1 %v6777_v3 }
  0xd5   : > { %6031 = vmatprep.mubr.bf16.mxu1 %v6778_v4 }
  0xdc   : > { %6032 = vmatmul.mubr.bf16.gmra.mrb[24].mxu1 %v6779_v5  ;;  %v1148_v5 = vld [vmem:[%s8889_s3 + $0x30] sm:$0xff] }
  0xdd   : > { %6035 = vmatprep.mubr.bf16.mxu1 %v6780_v6 }
  0xe4   : > { %6036 = vmatmul.mubr.bf16.gmra.mrb[28].mxu1 %v6781_v7 }
 0x107   : > { %v7205_v8 = vpop.f32.mrb[0].mxu1 }
 0x108   : > { %v688_v9 = vpop.f32.mrb[1].mxu1 }
 0x109   : > { %v7207_v10 = vpop.f32.mrb[2].mxu1 }
 0x10a   : > { %v691_v11 = vpop.f32.mrb[3].mxu1 }
 0x10f   : > { %v7209_v12 = vpop.f32.mrb[4].mxu1 }
 0x110   : > { %v7211_v13 = vpop.f32.mrb[5].mxu1 }
 0x111   : > { %v7213_v14 = vpop.f32.mrb[6].mxu1 }
 0x112   : > { %v7215_v15 = vpop.f32.mrb[7].mxu1 }
 0x117   : > { %v7217_v16 = vpop.f32.mrb[8].mxu1 }
 0x118   : > { %v7219_v17 = vpop.f32.mrb[9].mxu1 }
 0x119   : > { %v7221_v18 = vpop.f32.mrb[10].mxu1 }
 0x11a   : > { %v7223_v19 = vpop.f32.mrb[11].mxu1 }
 0x11f   : > { %v7225_v20 = vpop.f32.mrb[12].mxu1 }
 0x120   : > { %v7227_v21 = vpop.f32.mrb[13].mxu1 }
 0x121   : > { %v5974_v22 = vpop.f32.mrb[14].mxu1 }
 0x122   : > { %v7229_v23 = vpop.f32.mrb[15].mxu1 }
 0x19f   : > { %v6025_v25 = vpop.f32.mrb[16].mxu1 }
 0x1a0   : > { %v1004_v26 = vpop.f32.mrb[17].mxu1 }
 0x1a1   : > { %1081 = vrot.lane.b32.xlu0 %v1004_v26, %s6924_s28  ;;  %v6026_v27 = vpop.f32.mrb[18].mxu1 }
 0x1a2   : > { %v1007_v28 = vpop.f32.mrb[19].mxu1 }
 0x1a3   : > { %1083 = vrot.lane.b32.xlu1 %v1007_v28, %s6924_s28 }
 0x1a5   : > { %1085 = vrot.lane.b32.xlu0 %v6025_v25, %s6924_s28  ;;  %v1150_v25 = vld [vmem:[%s8889_s3 + $0x40] sm:$0xff] }
 0x1a7   : > { %1087 = vrot.lane.b32.xlu1 %v6026_v27, %s6924_s28  ;;  %v6029_v29 = vpop.f32.mrb[20].mxu1 }
 0x1a8   : > { %v1020_v30 = vpop.f32.mrb[21].mxu1 }
 0x1a9   : > { %1089 = vrot.lane.b32.xlu0 %v1020_v30, %s6924_s28  ;;  %v6030_v31 = vpop.f32.mrb[22].mxu1 }
 0x1aa   : > { %v1023_v32 = vpop.f32.mrb[23].mxu1 }
 0x1ab   : > { %1091 = vrot.lane.b32.xlu1 %v1023_v32, %s6924_s28 }
 0x1ad   : > { %1093 = vrot.lane.b32.xlu0 %v6029_v29, %s6924_s28  ;;  %v1151_v29 = vld [vmem:[%s8889_s3 + $0x48] sm:$0xff] }
 0x1af   : > { %1095 = vrot.lane.b32.xlu1 %v6030_v31, %s6924_s28  ;;  %v6033_v33 = vpop.f32.mrb[24].mxu1 }
 0x1b0   : > { %v1036_v34 = vpop.f32.mrb[25].mxu1 }
 0x1b1   : > { %1097 = vrot.lane.b32.xlu0 %v1036_v34, %s6924_s28  ;;  %v6034_v35 = vpop.f32.mrb[26].mxu1  ;;  %v1152_v34 = vld [vmem:[%s8889_s3 + $0x50] sm:$0xff] }
 0x1b2   : > { %v1039_v36 = vpop.f32.mrb[27].mxu1 }
 0x1b3   : > { %1099 = vrot.lane.b32.xlu1 %v1039_v36, %s6924_s28 }
 0x1b5   : > { %1101 = vrot.lane.b32.xlu0 %v6033_v33, %s6924_s28 }
 0x1b7   : > { %1103 = vrot.lane.b32.xlu1 %v6034_v35, %s6924_s28  ;;  %v6037_v37 = vpop.f32.mrb[28].mxu1 }
 0x1b8   : > { %v1052_v38 = vpop.f32.mrb[29].mxu1 }
 0x1b9   : > { %1105 = vrot.lane.b32.xlu0 %v1052_v38, %s6924_s28  ;;  %v6038_v39 = vpop.f32.mrb[30].mxu1  ;;  %v1153_v38 = vld [vmem:[%s8889_s3 + $0x58] sm:$0xff] }
 0x1ba   : > { %v1055_v40 = vpop.f32.mrb[31].mxu1 }
 0x1bb   : > { %1107 = vrot.lane.b32.xlu1 %v1055_v40, %s6924_s28 }
 0x1bd   : > { %1109 = vrot.lane.b32.xlu0 %v6037_v37, %s6924_s28  ;;  %s6926_s28 = smov 16  }
 0x213   : > { %v1082_v42 = vpop.permute.xlu0 %1081 }
 0x214   : > { %v1127_v43 = vsel %vm1126_vm1, %v688_v9, %v1082_v42 }
 0x215   : > { %v1157_v45 = vadd.f32 %v1142_v41, %v1127_v43  ;;  %v1084_v46 = vpop.permute.xlu1 %1083  ;;  %v1154_v43 = vld [vmem:[%s8889_s3 + $0x60] sm:$0xff] }
 0x216   : > { %v1128_v47 = vsel %vm1126_vm1, %v691_v11, %v1084_v46 }
 0x217   : > { %v1158_v49 = vadd.f32 %v1143_v44, %v1128_v47  ;;  %v1086_v50 = vpop.permute.xlu0 %1085  ;;  %v1172_v53 = vmax.f32 %v1157_v45, 0.0  ;;  %v1155_v47 = vld [vmem:[%s8889_s3 + $0x68] sm:$0xff] }
 0x218   : > { %v1129_v51 = vsel %vm1126_vm1, %v7205_v8, %v1086_v50 }
 0x219   : > { %v1173_v54 = vmax.f32 %v1158_v49, 0.0  ;;  %v1159_v55 = vadd.f32 %v1144_v48, %v1129_v51  ;;  %v1088_v56 = vpop.permute.xlu1 %1087 }
 0x21a   : > { %v1130_v57 = vsel %vm1126_vm1, %v7207_v10, %v1088_v56  ;;  %v1149_v10 = vld [vmem:[%s8889_s3 + $0x38] sm:$0xff] }
 0x21b   : > { %v1160_v59 = vadd.f32 %v1145_v52, %v1130_v57  ;;  %v1090_v60 = vpop.permute.xlu0 %1089  ;;  %v1187_v61 = vpack.c.bf16 %v1173_v54, %v1172_v53  ;;  %v1174_v0 = vmax.f32 %v1159_v55, 0.0  ;;  %v1156_v52 = vld [vmem:[%s8889_s3 + $0x70] sm:$0xff] }
 0x21c   : > { %v1131_v62 = vsel %vm1126_vm1, %v7211_v13, %v1090_v60 }
 0x21d   : > { %v1175_v1 = vmax.f32 %v1160_v59, 0.0  ;;  %v1161_v2 = vadd.f32 %v1146_v58, %v1131_v62  ;;  %6041 = vmatprep.mubr.msk.bf16.mxu0 %vm1203_vm2, %v1187_v61  ;;  %v1092_v3 = vpop.permute.xlu1 %1091 }
 0x21e   : > { %v1132_v4 = vsel %vm1126_vm1, %v7215_v15, %v1092_v3 }
 0x21f   : > { %v1188_v6 = vpack.c.bf16 %v1175_v1, %v1174_v0  ;;  %v1162_v7 = vadd.f32 %v1147_v63, %v1132_v4  ;;  %v1094_v8 = vpop.permute.xlu0 %1093  ;;  %v1176_v11 = vmax.f32 %v1161_v2, 0.0 }
 0x220   : > { %v1133_v9 = vsel %vm1126_vm1, %v7209_v12, %v1094_v8 }
 0x221   : > { %v1177_v13 = vmax.f32 %v1162_v7, 0.0  ;;  %v1163_v22 = vadd.f32 %v1148_v5, %v1133_v9  ;;  %6042 = vmatmul.mubr.msk.bf16.vlgmr.msra.gmra.mrb[0].mxu0 %vm1203_vm2, %v1188_v6  ;;  %v1096_v15 = vpop.permute.xlu1 %1095 }
 0x222   : > { %v1134_v24 = vsel %vm1126_vm1, %v7213_v14, %v1096_v15 }
 0x223   : > { %v1189_v26 = vpack.c.bf16 %v1177_v13, %v1176_v11  ;;  %v1164_v27 = vadd.f32 %v1149_v10, %v1134_v24  ;;  %v1098_v12 = vpop.permute.xlu0 %1097  ;;  %v1178_v30 = vmax.f32 %v1163_v22, 0.0  ;;  %v6783_v24 = vld [vmem:[%s8890_s4 + $0x78] sm:$0xff]  }
 0x224   : > { %v1135_v28 = vsel %vm1126_vm1, %v7219_v17, %v1098_v12  ;;  %6105 = vmatprep.mubr.msk.bf16.mxu1 %vm1457_vm3, %v6783_v24 }
 0x225   : > { %v1179_v31 = vmax.f32 %v1164_v27, 0.0  ;;  %v1165_v32 = vadd.f32 %v1150_v25, %v1135_v28  ;;  %6045 = vmatprep.mubr.msk.bf16.mxu0 %vm1203_vm2, %v1189_v26  ;;  %v1100_v14 = vpop.permute.xlu1 %1099 }
 0x226   : > { %v1136_v33 = vsel %vm1126_vm1, %v7223_v19, %v1100_v14  ;;  %v6802_v14 = vld [vmem:[%s8890_s4 + $0x18] sm:$0xff]  }
 0x227   : > { %v1190_v35 = vpack.c.bf16 %v1179_v31, %v1178_v30  ;;  %v1166_v36 = vadd.f32 %v1151_v29, %v1136_v33  ;;  %v1102_v17 = vpop.permute.xlu0 %1101  ;;  %v1180_v39 = vmax.f32 %v1165_v32, 0.0  ;;  %v6799_v30 = vld [vmem:[%s8890_s4] sm:$0xff]   ;;  %v6800_v31 = vld [vmem:[%s8890_s4 + $0x8] sm:$0xff]   ;;  %v6801_v32 = vld [vmem:[%s8890_s4 + $0x10] sm:$0xff]  }
 0x228   : > { %v1137_v37 = vsel %vm1126_vm1, %v7217_v16, %v1102_v17  ;;  %v6803_v33 = vld [vmem:[%s8890_s4 + $0x20] sm:$0xff]  }
 0x229   : > { %v1181_v40 = vmax.f32 %v1166_v36, 0.0  ;;  %v1167_v41 = vadd.f32 %v1152_v34, %v1137_v37  ;;  %6046 = vmatmul.mubr.msk.bf16.gmra.mrb[4].mxu0 %vm1203_vm2, %v1190_v35  ;;  %v1104_v19 = vpop.permute.xlu1 %1103  ;;  %v6804_v34 = vld [vmem:[%s8890_s4 + $0x28] sm:$0xff]   ;;  %v6805_v35 = vld [vmem:[%s8890_s4 + $0x30] sm:$0xff]   ;;  %v6806_v36 = vld [vmem:[%s8890_s4 + $0x38] ss:$0 sps:$4 sm:$0xff]  }
 0x22a   : > { %v1138_v42 = vsel %vm1126_vm1, %v7221_v18, %v1104_v19 }
 0x22b   : > { %v1191_v44 = vpack.c.bf16 %v1181_v40, %v1180_v39  ;;  %v1168_v45 = vadd.f32 %v1153_v38, %v1138_v42  ;;  %v1106_v16 = vpop.permute.xlu0 %1105  ;;  %v1182_v48 = vmax.f32 %v1167_v41, 0.0 }
 0x22c   : > { %v1139_v46 = vsel %vm1126_vm1, %v7227_v21, %v1106_v16 }
 0x22d   : > { %v1183_v49 = vmax.f32 %v1168_v45, 0.0  ;;  %v1169_v50 = vadd.f32 %v1154_v43, %v1139_v46  ;;  %6049 = vmatprep.mubr.msk.bf16.mxu0 %vm1203_vm2, %v1191_v44  ;;  %v1108_v18 = vpop.permute.xlu1 %1107 }
 0x22e   : > { %v1140_v51 = vsel %vm1126_vm1, %v7229_v23, %v1108_v18 }
 0x22f   : > { %v1192_v53 = vpack.c.bf16 %v1183_v49, %v1182_v48  ;;  %v1170_v54 = vadd.f32 %v1155_v47, %v1140_v51  ;;  %v1110_v21 = vpop.permute.xlu0 %1109  ;;  %v1184_v56 = vmax.f32 %v1169_v50, 0.0 }
 0x230   : > { %v1141_v55 = vsel %vm1126_vm1, %v7225_v20, %v1110_v21 }
 0x231   : > { %v1185_v57 = vmax.f32 %v1170_v54, 0.0  ;;  %v1171_v58 = vadd.f32 %v1156_v52, %v1141_v55  ;;  %6050 = vmatmul.mubr.msk.bf16.gmra.mrb[8].mxu0 %vm1203_vm2, %v1192_v53 }
 0x233   : > { %v1193_v59 = vpack.c.bf16 %v1185_v57, %v1184_v56  ;;  %v1186_v60 = vmax.f32 %v1171_v58, 0.0  ;;  %v6784_v57 = vld [vmem:[%s8890_s4 + $0x80] sm:$0xff]   ;;  %v6785_v58 = vld [vmem:[%s8890_s4 + $0x88] sm:$0xff]  }
 0x235   : > { %6053 = vmatprep.mubr.msk.bf16.mxu0 %vm1203_vm2, %v1193_v59  ;;  %v1194_v23 = vpack.c.bf16 %v1186_v60, %v1186_v60  ;;  %v6786_v59 = vld [vmem:[%s8890_s4 + $0x90] sm:$0xff]   ;;  %v6787_v60 = vld [vmem:[%s8890_s4 + $0x98] sm:$0xff]  }
 0x239   : > { %6054 = vmatmul.mubr.msk.bf16.gmra.mrb[12].mxu0 %vm1203_vm2, %v1194_v23  ;;  %v6788_v23 = vld [vmem:[%s8890_s4 + $0xa0] sm:$0xff]  }
 0x23a   : > { %6073 = vmatprep.mubr.msk.bf16.mxu0 %vm1457_vm3, %v6799_v30 }
 0x2f4   : > { %v6043_v61 = vpop.f32.mrb[0].mxu0 }
 0x2f5   : > { %v1262_v62 = vpop.f32.mrb[1].mxu0 }
 0x2f6   : > { %v6044_v63 = vpop.f32.mrb[2].mxu0 }
 0x2f7   : > { %v7315_v0 = vpack.c.bf16 %v6044_v63, %v6043_v61  ;;  %v1265_v1 = vpop.f32.mrb[3].mxu0  ;;  %v6789_v61 = vld [vmem:[%s8890_s4 + $0xa8] sm:$0xff]   ;;  %v6791_v63 = vld [vmem:[%s8890_s4 + $0x3c] sm:$0xff]  }
 0x2f8   : > { %v7317_v2 = vpack.c.bf16 %v1265_v1, %v1262_v62  ;;  %v6790_v62 = vld [vmem:[%s8890_s4 + $0xb0] ss:$0 sps:$4 sm:$0xff]  }
 0x2f9   : > { %v6793_v1 = vld [vmem:[%s8890_s4 + $0x4c] sm:$0xff]  }
 0x2fa   : > { %6057 = vmatprep.subr.bf16.mxu0 %v7317_v2  ;;  %1356 = vrot.lane.b32.xlu0 %v7317_v2, %s6925_s22 }
 0x2fb   : > { %1340 = vrot.lane.b32.xlu1 %v7317_v2, %s6922_s26  ;;  %6058 = vmatpush3.bf16.msra.mxu0 %v7317_v2 }
 0x2fc   : > { %v6047_v20 = vpop.f32.mrb[4].mxu0  ;;  %6059 = vmatprep.subr.bf16.mxu0 %v7315_v0 }
 0x2fd   : > { %v1278_v3 = vpop.f32.mrb[5].mxu0 }
 0x2fe   : > { %v6048_v4 = vpop.f32.mrb[6].mxu0  ;;  %1358 = vrot.lane.b32.xlu0 %v7315_v0, %s6925_s22 }
 0x2ff   : > { %v7328_v5 = vpack.c.bf16 %v6048_v4, %v6047_v20  ;;  %1342 = vrot.lane.b32.xlu1 %v7315_v0, %s6922_s26  ;;  %v1281_v6 = vpop.f32.mrb[7].mxu0  ;;  %6060 = vmatpush3.bf16.msra.mxu0 %v7315_v0  ;;  %v6795_v20 = vld [vmem:[%s8890_s4 + $0x5c] sm:$0xff]   ;;  %v6797_v4 = vld [vmem:[%s8890_s4 + $0x6c] sm:$0xff]  }
 0x300   : > { %v7333_v7 = vpack.c.bf16 %v1281_v6, %v1278_v3  ;;  %v6796_v3 = vld [vmem:[%s8890_s4 + $0x64] sm:$0xff]  }
 0x301   : > { %v6807_v6 = vld [vmem:[%s8891_s5] sm:$0xff]  }
 0x302   : > { %6061 = vmatprep.subr.bf16.mxu0 %v7333_v7  ;;  %1360 = vrot.lane.b32.xlu0 %v7333_v7, %s6925_s22 }
 0x303   : > { %1344 = vrot.lane.b32.xlu1 %v7333_v7, %s6922_s26  ;;  %6062 = vmatpush3.bf16.msra.mxu0 %v7333_v7 }
 0x304   : > { %v6051_v8 = vpop.f32.mrb[8].mxu0  ;;  %6063 = vmatprep.subr.bf16.mxu0 %v7328_v5 }
 0x305   : > { %v1294_v9 = vpop.f32.mrb[9].mxu0 }
 0x306   : > { %v6052_v10 = vpop.f32.mrb[10].mxu0  ;;  %1362 = vrot.lane.b32.xlu0 %v7328_v5, %s6925_s22 }
 0x307   : > { %v7344_v11 = vpack.c.bf16 %v6052_v10, %v6051_v8  ;;  %1346 = vrot.lane.b32.xlu1 %v7328_v5, %s6922_s26  ;;  %v1297_v13 = vpop.f32.mrb[11].mxu0  ;;  %6064 = vmatpush3.bf16.msra.mxu0 %v7328_v5 }
 0x308   : > { %v7349_v22 = vpack.c.bf16 %v1297_v13, %v1294_v9 }
 0x30a   : > { %6065 = vmatprep.subr.bf16.mxu0 %v7349_v22  ;;  %1364 = vrot.lane.b32.xlu0 %v7349_v22, %s6925_s22 }
 0x30b   : > { %1348 = vrot.lane.b32.xlu1 %v7349_v22, %s6922_s26  ;;  %6066 = vmatpush3.bf16.msra.mxu0 %v7349_v22 }
 0x30c   : > { %v6055_v15 = vpop.f32.mrb[12].mxu0  ;;  %6067 = vmatprep.subr.bf16.mxu0 %v7344_v11 }
 0x30d   : > { %v1310_v25 = vpop.f32.mrb[13].mxu0  ;;  %v7369_v28 = vpack.c.bf16 %v6055_v15, %v6055_v15 }
 0x30e   : > { %1366 = vrot.lane.b32.xlu0 %v7344_v11, %s6925_s22  ;;  %v6056_v26 = vpop.f32.mrb[14].mxu0 }
 0x30f   : > { %1350 = vrot.lane.b32.xlu1 %v7344_v11, %s6922_s26  ;;  %v1313_v27 = vpop.f32.mrb[15].mxu0  ;;  %6068 = vmatpush3.bf16.msra.mxu0 %v7344_v11  ;;  %v7383_v29 = vsel %vm1482_vm4, %v7369_v28, 0 }
 0x310   : > { %v7367_v12 = vpack.c.bf16 %v1313_v27, %v1310_v25 }
 0x312   : > { %1368 = vrot.lane.b32.xlu0 %v7367_v12, %s6925_s22  ;;  %6069 = vmatprep.subr.bf16.mxu0 %v7367_v12 }
 0x313   : > { %1352 = vrot.lane.b32.xlu1 %v7367_v12, %s6922_s26  ;;  %6070 = vmatpush3.bf16.msra.mxu0 %v7367_v12 }
 0x314   : > { %6729 = vmatprep.subr.msk.bf16.mxu0 %vm1482_vm4, %v7369_v28 }
 0x316   : > { %1370 = vrot.lane.b32.xlu0 %v7369_v28, %s6925_s22  ;;  %s6927_s22 = smov 31  }
 0x317   : > { %1354 = vrot.lane.b32.xlu1 %v7369_v28, %s6922_s26  ;;  %6072 = vmatpush3.bf16.msra.mxu0 %v7383_v29 }
 0x318   : > { %6153 = vmatprep.subr.bf16.mxu0 %v6807_v6 }
 0x31a   : > { %6074 = vmatmul.mubr.msk.bf16.vlgmr.msra.gmra.mrb[16].mxu0 %vm1457_vm3, %v6800_v31 }
 0x31b   : > { %6077 = vmatprep.mubr.msk.bf16.mxu0 %vm1457_vm3, %v6801_v32  ;;  %6154 = vmatpush3.bf16.msra.mxu0 %v6807_v6 }
 0x322   : > { %6078 = vmatmul.mubr.msk.bf16.gmra.mrb[20].mxu0 %vm1457_vm3, %v6802_v14 }
 0x323   : > { %6081 = vmatprep.mubr.msk.bf16.mxu0 %vm1457_vm3, %v6803_v33 }
 0x32a   : > { %6082 = vmatmul.mubr.msk.bf16.gmra.mrb[24].mxu0 %vm1457_vm3, %v6804_v34 }
 0x32b   : > { %6085 = vmatprep.mubr.msk.bf16.mxu0 %vm1457_vm3, %v6805_v35 }
 0x332   : > { %6086 = vmatmul.mubr.msk.bf16.gmra.mrb[28].mxu0 %vm1457_vm3, %v6806_v36 }
 0x36c   : > { %v1357_v17 = vpop.permute.xlu0 %1356 }
 0x36d   : > { %v1341_v37 = vpop.permute.xlu1 %1340 }
 0x36e   : > { %v1375_v38 = vsel %vm1372_vm5, %v1341_v37, %v1357_v17 }
 0x36f   : > { %6089 = vmatprep.subr.bf16.mxu1 %v1375_v38 }
 0x370   : > { %6090 = vmatpush3.bf16.msra.mxu1 %v1375_v38  ;;  %v1359_v39 = vpop.permute.xlu0 %1358 }
 0x371   : > { %v1343_v40 = vpop.permute.xlu1 %1342 }
 0x372   : > { %v1379_v41 = vsel %vm1372_vm5, %v1343_v40, %v1359_v39 }
 0x373   : > { %6091 = vmatprep.subr.bf16.mxu1 %v1379_v41 }
 0x374   : > { %6092 = vmatpush3.bf16.msra.mxu1 %v1379_v41  ;;  %v1361_v19 = vpop.permute.xlu0 %1360 }
 0x375   : > { %v1345_v42 = vpop.permute.xlu1 %1344 }
 0x376   : > { %v1383_v43 = vsel %vm1372_vm5, %v1345_v42, %v1361_v19 }
 0x377   : > { %6093 = vmatprep.subr.bf16.mxu1 %v1383_v43 }
 0x378   : > { %6094 = vmatpush3.bf16.msra.mxu1 %v1383_v43  ;;  %v1363_v44 = vpop.permute.xlu0 %1362 }
 0x379   : > { %v1347_v45 = vpop.permute.xlu1 %1346 }
 0x37a   : > { %v1387_v16 = vsel %vm1372_vm5, %v1347_v45, %v1363_v44  ;;  %v2007_v45 = vld [vmem:[%s8892_s6] sm:$0xff] }
 0x37b   : > { %6095 = vmatprep.subr.bf16.mxu1 %v1387_v16 }
 0x37c   : > { %6096 = vmatpush3.bf16.msra.mxu1 %v1387_v16  ;;  %v1365_v46 = vpop.permute.xlu0 %1364 }
 0x37d   : > { %v1349_v47 = vpop.permute.xlu1 %1348 }
 0x37e   : > { %v1391_v48 = vsel %vm1372_vm5, %v1349_v47, %v1365_v46  ;;  %v2008_v47 = vld [vmem:[%s8892_s6 + $0x8] sm:$0xff] }
 0x37f   : > { %6097 = vmatprep.subr.bf16.mxu1 %v1391_v48 }
 0x380   : > { %6098 = vmatpush3.bf16.msra.mxu1 %v1391_v48  ;;  %v1367_v49 = vpop.permute.xlu0 %1366 }
 0x381   : > { %v1351_v50 = vpop.permute.xlu1 %1350 }
 0x382   : > { %v1395_v18 = vsel %vm1372_vm5, %v1351_v50, %v1367_v49 }
 0x383   : > { %6099 = vmatprep.subr.bf16.mxu1 %v1395_v18 }
 0x384   : > { %6100 = vmatpush3.bf16.msra.mxu1 %v1395_v18  ;;  %v1369_v51 = vpop.permute.xlu0 %1368  ;;  %v2009_v18 = vld [vmem:[%s8892_s6 + $0x10] sm:$0xff] }
 0x385   : > { %v1353_v52 = vpop.permute.xlu1 %1352 }
 0x386   : > { %v1399_v53 = vsel %vm1372_vm5, %v1353_v52, %v1369_v51 }
 0x387   : > { %6101 = vmatprep.subr.bf16.mxu1 %v1399_v53 }
 0x388   : > { %6102 = vmatpush3.bf16.msra.mxu1 %v1399_v53  ;;  %v1371_v54 = vpop.permute.xlu0 %1370 }
 0x389   : > { %v1355_v21 = vpop.permute.xlu1 %1354 }
 0x38a   : > { %v1403_v55 = vsel %vm1372_vm5, %v1355_v21, %v1371_v54  ;;  %v2010_v54 = vld [vmem:[%s8892_s6 + $0x18] sm:$0xff] }
 0x38b   : > { %v1676_v56 = vsel %vm1482_vm4, %v1403_v55, 0  ;;  %6730 = vmatprep.subr.msk.bf16.mxu1 %vm1482_vm4, %v1403_v55 }
 0x38c   : > { %6104 = vmatpush3.bf16.msra.mxu1 %v1676_v56 }
 0x38d   : > { %6121 = vmatprep.subr.bf16.mxu1 %v7317_v2 }
 0x38f   : > { %6106 = vmatmul.mubr.msk.bf16.vlgmr.msra.gmra.mrb[32].mxu1 %vm1457_vm3, %v6784_v57 }
 0x390   : > { %6122 = vmatpush3.bf16.msra.mxu1 %v7317_v2  ;;  %6109 = vmatprep.mubr.msk.bf16.mxu1 %vm1457_vm3, %v6785_v58  ;;  %v6794_v2 = vld [vmem:[%s8890_s4 + $0x54] sm:$0xff]  }
 0x391   : > { %6123 = vmatprep.subr.bf16.mxu1 %v7315_v0 }
 0x394   : > { %6124 = vmatpush3.bf16.msra.mxu1 %v7315_v0  ;;  %v6792_v0 = vld [vmem:[%s8890_s4 + $0x44] sm:$0xff]  }
 0x395   : > { %6125 = vmatprep.subr.bf16.mxu1 %v7333_v7 }
 0x397   : > { %6110 = vmatmul.mubr.msk.bf16.gmra.mrb[36].mxu1 %vm1457_vm3, %v6786_v59  ;;  %v2011_v59 = vld [vmem:[%s8892_s6 + $0x20] sm:$0xff] }
 0x398   : > { %6126 = vmatpush3.bf16.msra.mxu1 %v7333_v7  ;;  %6113 = vmatprep.mubr.msk.bf16.mxu1 %vm1457_vm3, %v6787_v60  ;;  %v6808_v7 = vld [vmem:[%s8891_s5 + $0x8] sm:$0xff]  }
 0x399   : > { %6127 = vmatprep.subr.bf16.mxu1 %v7328_v5  ;;  %6155 = vmatprep.subr.bf16.mxu0 %v6808_v7 }
 0x39a   : > { %6156 = vmatpush3.bf16.msra.mxu0 %v6808_v7 }
 0x39c   : > { %6128 = vmatpush3.bf16.msra.mxu1 %v7328_v5  ;;  %v6798_v5 = vld [vmem:[%s8890_s4 + $0x74] ss:$0 sps:$4 sm:$0xff]  }
 0x39d   : > { %6129 = vmatprep.subr.bf16.mxu1 %v7349_v22 }
 0x39f   : > { %6114 = vmatmul.mubr.msk.bf16.gmra.mrb[40].mxu1 %vm1457_vm3, %v6788_v23 }
 0x3a0   : > { %6130 = vmatpush3.bf16.msra.mxu1 %v7349_v22  ;;  %6117 = vmatprep.mubr.msk.bf16.mxu1 %vm1457_vm3, %v6789_v61 }
 0x3a1   : > { %6131 = vmatprep.subr.bf16.mxu1 %v7344_v11 }
 0x3a4   : > { %6132 = vmatpush3.bf16.msra.mxu1 %v7344_v11 }
 0x3a5   : > { %6133 = vmatprep.subr.bf16.mxu1 %v7367_v12 }
 0x3a7   : > { %6118 = vmatmul.mubr.msk.bf16.gmra.mrb[44].mxu1 %vm1457_vm3, %v6790_v62 }
 0x3a8   : > { %6134 = vmatpush3.bf16.msra.mxu1 %v7367_v12  ;;  %6137 = vmatprep.mubr.msk.bf16.mxu1 %vm1457_vm3, %v6791_v63  ;;  %v2012_v63 = vld [vmem:[%s8892_s6 + $0x28] sm:$0xff] }
 0x3a9   : > { %6731 = vmatprep.subr.msk.bf16.mxu1 %vm1482_vm4, %v7369_v28 }
 0x3ac   : > { %6136 = vmatpush3.bf16.msra.mxu1 %v7383_v29 }
 0x3af   : > { %6138 = vmatmul.mubr.msk.bf16.vlgmr.msra.gmra.mrb[32].mxu1 %vm1457_vm3, %v6792_v0 }
 0x3b0   : > { %6141 = vmatprep.mubr.msk.bf16.mxu1 %vm1457_vm3, %v6793_v1 }
 0x3b7   : > { %6142 = vmatmul.mubr.msk.bf16.gmra.mrb[36].mxu1 %vm1457_vm3, %v6794_v2 }
 0x3b8   : > { %6145 = vmatprep.mubr.msk.bf16.mxu1 %vm1457_vm3, %v6795_v20 }
 0x3bf   : > { %6146 = vmatmul.mubr.msk.bf16.gmra.mrb[40].mxu1 %vm1457_vm3, %v6796_v3 }
 0x3c0   : > { %6149 = vmatprep.mubr.msk.bf16.mxu1 %vm1457_vm3, %v6797_v4  ;;  %v2013_v4 = vld [vmem:[%s8892_s6 + $0x30] sm:$0xff] }
 0x3c7   : > { %6150 = vmatmul.mubr.msk.bf16.gmra.mrb[44].mxu1 %vm1457_vm3, %v6798_v5 }
 0x3ed   : > { %v7513_v8 = vpop.f32.mrb[16].mxu0 }
 0x3ee   : > { %v1520_v9 = vpop.f32.mrb[17].mxu0 }
 0x3ef   : > { %v7515_v10 = vpop.f32.mrb[18].mxu0 }
 0x3f0   : > { %v1523_v11 = vpop.f32.mrb[19].mxu0 }
 0x3f5   : > { %v7517_v13 = vpop.f32.mrb[20].mxu0 }
 0x3f6   : > { %v7519_v22 = vpop.f32.mrb[21].mxu0 }
 0x3f7   : > { %v7521_v15 = vpop.f32.mrb[22].mxu0 }
 0x3f8   : > { %v7523_v24 = vpop.f32.mrb[23].mxu0 }
 0x3fd   : > { %v7526_v28 = vpop.f32.mrb[24].mxu0 }
 0x3fe   : > { %v7529_v29 = vpop.f32.mrb[25].mxu0 }
 0x3ff   : > { %v7531_v30 = vpop.f32.mrb[26].mxu0 }
 0x400   : > { %v7534_v31 = vpop.f32.mrb[27].mxu0 }
 0x405   : > { %v7538_v35 = vpop.f32.mrb[28].mxu0 }
 0x406   : > { %v7541_v36 = vpop.f32.mrb[29].mxu0 }
 0x407   : > { %v6088_v17 = vpop.f32.mrb[30].mxu0 }
 0x408   : > { %v7544_v37 = vpop.f32.mrb[31].mxu0 }
 0x482   : > { %v6139_v25 = vpop.f32.mrb[32].mxu1 }
 0x483   : > { %v1870_v26 = vpop.f32.mrb[33].mxu1 }
 0x484   : > { %1947 = vrot.lane.b32.xlu1 %v1870_v26, %s6926_s28  ;;  %v6140_v27 = vpop.f32.mrb[34].mxu1  ;;  %v2015_v26 = vld [vmem:[%s8892_s6 + $0x40] sm:$0xff] }
 0x485   : > { %v1873_v12 = vpop.f32.mrb[35].mxu1 }
 0x486   : > { %1949 = vrot.lane.b32.xlu0 %v1873_v12, %s6926_s28 }
 0x488   : > { %1951 = vrot.lane.b32.xlu1 %v6139_v25, %s6926_s28 }
 0x48a   : > { %1953 = vrot.lane.b32.xlu0 %v6140_v27, %s6926_s28  ;;  %v6143_v32 = vpop.f32.mrb[36].mxu1 }
 0x48b   : > { %v1886_v14 = vpop.f32.mrb[37].mxu1 }
 0x48c   : > { %1955 = vrot.lane.b32.xlu1 %v1886_v14, %s6926_s28  ;;  %v6144_v33 = vpop.f32.mrb[38].mxu1  ;;  %v2016_v14 = vld [vmem:[%s8892_s6 + $0x48] sm:$0xff] }
 0x48d   : > { %v1889_v34 = vpop.f32.mrb[39].mxu1 }
 0x48e   : > { %1957 = vrot.lane.b32.xlu0 %v1889_v34, %s6926_s28 }
 0x490   : > { %1959 = vrot.lane.b32.xlu1 %v6143_v32, %s6926_s28 }
 0x492   : > { %1961 = vrot.lane.b32.xlu0 %v6144_v33, %s6926_s28  ;;  %v6147_v38 = vpop.f32.mrb[40].mxu1 }
 0x493   : > { %v1902_v39 = vpop.f32.mrb[41].mxu1 }
 0x494   : > { %1963 = vrot.lane.b32.xlu1 %v1902_v39, %s6926_s28  ;;  %v6148_v40 = vpop.f32.mrb[42].mxu1  ;;  %v2017_v39 = vld [vmem:[%s8892_s6 + $0x50] sm:$0xff] }
 0x495   : > { %v1905_v41 = vpop.f32.mrb[43].mxu1 }
 0x496   : > { %1965 = vrot.lane.b32.xlu0 %v1905_v41, %s6926_s28 }
 0x498   : > { %1967 = vrot.lane.b32.xlu1 %v6147_v38, %s6926_s28 }
 0x49a   : > { %1969 = vrot.lane.b32.xlu0 %v6148_v40, %s6926_s28  ;;  %v6151_v19 = vpop.f32.mrb[44].mxu1 }
 0x49b   : > { %v1918_v42 = vpop.f32.mrb[45].mxu1 }
 0x49c   : > { %1971 = vrot.lane.b32.xlu1 %v1918_v42, %s6926_s28  ;;  %v6152_v43 = vpop.f32.mrb[46].mxu1  ;;  %v2018_v42 = vld [vmem:[%s8892_s6 + $0x58] sm:$0xff] }
 0x49d   : > { %v1921_v44 = vpop.f32.mrb[47].mxu1 }
 0x49e   : > { %1973 = vrot.lane.b32.xlu0 %v1921_v44, %s6926_s28 }
 0x4a0   : > { %1975 = vrot.lane.b32.xlu1 %v6151_v19, %s6926_s28 }
 0x4f6   : > { %v1948_v16 = vpop.permute.xlu1 %1947 }
 0x4f7   : > { %v1992_v46 = vsel %vm1203_vm2, %v1520_v9, %v1948_v16  ;;  %v2014_v9 = vld [vmem:[%s8892_s6 + $0x38] sm:$0xff] }
 0x4f8   : > { %v2022_v48 = vadd.f32 %v2007_v45, %v1992_v46  ;;  %v1950_v49 = vpop.permute.xlu0 %1949  ;;  %v2019_v46 = vld [vmem:[%s8892_s6 + $0x60] sm:$0xff] }
 0x4f9   : > { %v1993_v50 = vsel %vm1203_vm2, %v1523_v11, %v1950_v49 }
 0x4fa   : > { %v2023_v51 = vadd.f32 %v2008_v47, %v1993_v50  ;;  %v1952_v52 = vpop.permute.xlu1 %1951  ;;  %v2037_v21 = vmax.f32 %v2022_v48, 0.0  ;;  %v2020_v50 = vld [vmem:[%s8892_s6 + $0x68] sm:$0xff] }
 0x4fb   : > { %v1994_v53 = vsel %vm1203_vm2, %v7513_v8, %v1952_v52 }
 0x4fc   : > { %v2038_v55 = vmax.f32 %v2023_v51, 0.0  ;;  %v2024_v56 = vadd.f32 %v2009_v18, %v1994_v53  ;;  %v1954_v57 = vpop.permute.xlu0 %1953 }
 0x4fd   : > { %v1995_v58 = vsel %vm1203_vm2, %v7515_v10, %v1954_v57 }
 0x4fe   : > { %v2052_v60 = vpack.c.bf16 %v2038_v55, %v2037_v21  ;;  %v2025_v23 = vadd.f32 %v2010_v54, %v1995_v58  ;;  %v1956_v61 = vpop.permute.xlu1 %1955  ;;  %v2039_v0 = vmax.f32 %v2024_v56, 0.0  ;;  %v2021_v54 = vld [vmem:[%s8892_s6 + $0x70] sm:$0xff] }
 0x4ff   : > { %v1996_v62 = vsel %vm1203_vm2, %v7519_v22, %v1956_v61 }
 0x500   : > { %v2040_v1 = vmax.f32 %v2025_v23, 0.0  ;;  %v2026_v2 = vadd.f32 %v2011_v59, %v1996_v62  ;;  %6157 = vmatprep.mubr.msk.bf16.mxu0 %vm2076_vm6, %v2052_v60  ;;  %v1958_v20 = vpop.permute.xlu0 %1957 }
 0x501   : > { %v1997_v3 = vsel %vm1203_vm2, %v7523_v24, %v1958_v20 }
 0x502   : > { %v2053_v5 = vpack.c.bf16 %v2040_v1, %v2039_v0  ;;  %v2027_v6 = vadd.f32 %v2012_v63, %v1997_v3  ;;  %v1960_v7 = vpop.permute.xlu1 %1959  ;;  %v2041_v10 = vmax.f32 %v2026_v2, 0.0 }
 0x503   : > { %v1998_v8 = vsel %vm1203_vm2, %v7517_v13, %v1960_v7 }
 0x504   : > { %v2042_v11 = vmax.f32 %v2027_v6, 0.0  ;;  %v2028_v22 = vadd.f32 %v2013_v4, %v1998_v8  ;;  %6158 = vmatmul.mubr.msk.bf16.vlgmr.msra.gmra.mrb[32].mxu0 %vm2076_vm6, %v2053_v5  ;;  %v1962_v24 = vpop.permute.xlu0 %1961 }
 0x505   : > { %v1999_v25 = vsel %vm1203_vm2, %v7521_v15, %v1962_v24 }
 0x506   : > { %v2054_v27 = vpack.c.bf16 %v2042_v11, %v2041_v10  ;;  %v2029_v12 = vadd.f32 %v2014_v9, %v1999_v25  ;;  %v1964_v13 = vpop.permute.xlu1 %1963  ;;  %v2043_v33 = vmax.f32 %v2028_v22, 0.0  ;;  %v6809_v25 = vld [vmem:[%s8893_s7 + $0x78] sm:$0xff]  }
 0x507   : > { %v2000_v32 = vsel %vm1203_vm2, %v7529_v29, %v1964_v13  ;;  %6221 = vmatprep.mubr.msk.bf16.mxu1 %vm1457_vm3, %v6809_v25 }
 0x508   : > { %v2044_v34 = vmax.f32 %v2029_v12, 0.0  ;;  %v2030_v17 = vadd.f32 %v2015_v26, %v2000_v32  ;;  %6161 = vmatprep.mubr.msk.bf16.mxu0 %vm2076_vm6, %v2054_v27  ;;  %v1966_v15 = vpop.permute.xlu0 %1965 }
 0x509   : > { %v2001_v38 = vsel %vm1203_vm2, %v7534_v31, %v1966_v15  ;;  %v6828_v15 = vld [vmem:[%s8893_s7 + $0x18] sm:$0xff]  }
 0x50a   : > { %v2055_v40 = vpack.c.bf16 %v2044_v34, %v2043_v33  ;;  %v2031_v41 = vadd.f32 %v2016_v14, %v2001_v38  ;;  %v1968_v29 = vpop.permute.xlu1 %1967  ;;  %v2045_v43 = vmax.f32 %v2030_v17, 0.0  ;;  %v6825_v33 = vld [vmem:[%s8893_s7] sm:$0xff]   ;;  %v6826_v34 = vld [vmem:[%s8893_s7 + $0x8] sm:$0xff]   ;;  %v6827_v17 = vld [vmem:[%s8893_s7 + $0x10] sm:$0xff]  }
 0x50b   : > { %v2002_v19 = vsel %vm1203_vm2, %v7526_v28, %v1968_v29  ;;  %v6829_v38 = vld [vmem:[%s8893_s7 + $0x20] sm:$0xff]  }
 0x50c   : > { %v2046_v44 = vmax.f32 %v2031_v41, 0.0  ;;  %v2032_v45 = vadd.f32 %v2017_v39, %v2002_v19  ;;  %6162 = vmatmul.mubr.msk.bf16.gmra.mrb[36].mxu0 %vm2076_vm6, %v2055_v40  ;;  %v1970_v31 = vpop.permute.xlu0 %1969  ;;  %v6830_v39 = vld [vmem:[%s8893_s7 + $0x28] sm:$0xff]   ;;  %v6831_v40 = vld [vmem:[%s8893_s7 + $0x30] sm:$0xff]   ;;  %v6832_v41 = vld [vmem:[%s8893_s7 + $0x38] ss:$0 sps:$4 sm:$0xff]  }
 0x50d   : > { %v2003_v16 = vsel %vm1203_vm2, %v7531_v30, %v1970_v31 }
 0x50e   : > { %v2056_v47 = vpack.c.bf16 %v2046_v44, %v2045_v43  ;;  %v2033_v48 = vadd.f32 %v2018_v42, %v2003_v16  ;;  %v1972_v28 = vpop.permute.xlu1 %1971  ;;  %v2047_v18 = vmax.f32 %v2032_v45, 0.0 }
 0x50f   : > { %v2004_v49 = vsel %vm1203_vm2, %v7541_v36, %v1972_v28 }
 0x510   : > { %v2048_v51 = vmax.f32 %v2033_v48, 0.0  ;;  %v2034_v52 = vadd.f32 %v2019_v46, %v2004_v49  ;;  %6165 = vmatprep.mubr.msk.bf16.mxu0 %vm2076_vm6, %v2056_v47  ;;  %v1974_v30 = vpop.permute.xlu0 %1973 }
 0x511   : > { %v2005_v53 = vsel %vm1203_vm2, %v7544_v37, %v1974_v30 }
 0x512   : > { %v2057_v21 = vpack.c.bf16 %v2048_v51, %v2047_v18  ;;  %v2035_v55 = vadd.f32 %v2020_v50, %v2005_v53  ;;  %v1976_v36 = vpop.permute.xlu1 %1975  ;;  %v2049_v57 = vmax.f32 %v2034_v52, 0.0 }
 0x513   : > { %v2006_v56 = vsel %vm1203_vm2, %v7538_v35, %v1976_v36 }
 0x514   : > { %v2050_v58 = vmax.f32 %v2035_v55, 0.0  ;;  %v2036_v59 = vadd.f32 %v2021_v54, %v2006_v56  ;;  %6166 = vmatmul.mubr.msk.bf16.gmra.mrb[40].mxu0 %vm2076_vm6, %v2057_v21 }
 0x516   : > { %v2058_v60 = vpack.c.bf16 %v2050_v58, %v2049_v57  ;;  %v2051_v23 = vmax.f32 %v2036_v59, 0.0  ;;  %v6810_v58 = vld [vmem:[%s8893_s7 + $0x80] sm:$0xff]   ;;  %v6811_v59 = vld [vmem:[%s8893_s7 + $0x88] sm:$0xff]  }
 0x518   : > { %6169 = vmatprep.mubr.msk.bf16.mxu0 %vm2076_vm6, %v2058_v60  ;;  %v2059_v37 = vpack.c.bf16 %v2051_v23, %v2051_v23  ;;  %v6812_v60 = vld [vmem:[%s8893_s7 + $0x90] sm:$0xff]   ;;  %v6813_v23 = vld [vmem:[%s8893_s7 + $0x98] sm:$0xff]  }
 0x51c   : > { %6170 = vmatmul.mubr.msk.bf16.gmra.mrb[44].mxu0 %vm2076_vm6, %v2059_v37  ;;  %v6814_v37 = vld [vmem:[%s8893_s7 + $0xa0] sm:$0xff]  }
 0x51d   : > { %6189 = vmatprep.mubr.msk.bf16.mxu0 %vm1457_vm3, %v6825_v33 }
 0x5d7   : > { %v6159_v61 = vpop.f32.mrb[32].mxu0 }
 0x5d8   : > { %v2135_v62 = vpop.f32.mrb[33].mxu0 }
 0x5d9   : > { %v6160_v63 = vpop.f32.mrb[34].mxu0 }
 0x5da   : > { %v7635_v0 = vpack.c.bf16 %v6160_v63, %v6159_v61  ;;  %v2138_v1 = vpop.f32.mrb[35].mxu0  ;;  %v6815_v61 = vld [vmem:[%s8893_s7 + $0xa8] sm:$0xff]   ;;  %v6817_v63 = vld [vmem:[%s8893_s7 + $0x3c] sm:$0xff]  }
 0x5db   : > { %v7637_v2 = vpack.c.bf16 %v2138_v1, %v2135_v62  ;;  %v6816_v62 = vld [vmem:[%s8893_s7 + $0xb0] ss:$0 sps:$4 sm:$0xff]  }
 0x5dc   : > { %v6819_v1 = vld [vmem:[%s8893_s7 + $0x4c] sm:$0xff]  }
 0x5dd   : > { %6173 = vmatprep.subr.bf16.mxu0 %v7637_v2  ;;  %2229 = vrot.lane.b32.xlu1 %v7637_v2, %s6927_s22 }
 0x5de   : > { %2213 = vrot.lane.b32.xlu0 %v7637_v2, %s6922_s26  ;;  %6174 = vmatpush3.bf16.msra.mxu0 %v7637_v2 }
 0x5df   : > { %v6163_v35 = vpop.f32.mrb[36].mxu0  ;;  %6175 = vmatprep.subr.bf16.mxu0 %v7635_v0 }
 0x5e0   : > { %v2151_v20 = vpop.f32.mrb[37].mxu0 }
 0x5e1   : > { %v6164_v3 = vpop.f32.mrb[38].mxu0  ;;  %2231 = vrot.lane.b32.xlu1 %v7635_v0, %s6927_s22 }
 0x5e2   : > { %v7648_v4 = vpack.c.bf16 %v6164_v3, %v6163_v35  ;;  %2215 = vrot.lane.b32.xlu0 %v7635_v0, %s6922_s26  ;;  %v2154_v5 = vpop.f32.mrb[39].mxu0  ;;  %6176 = vmatpush3.bf16.msra.mxu0 %v7635_v0  ;;  %v6821_v35 = vld [vmem:[%s8893_s7 + $0x5c] sm:$0xff]   ;;  %v6823_v3 = vld [vmem:[%s8893_s7 + $0x6c] sm:$0xff]  }
 0x5e3   : > { %v7653_v6 = vpack.c.bf16 %v2154_v5, %v2151_v20  ;;  %v6822_v20 = vld [vmem:[%s8893_s7 + $0x64] sm:$0xff]  }
 0x5e4   : > { %v6833_v5 = vld [vmem:[%s8894_s8] sm:$0xff]  }
 0x5e5   : > { %6177 = vmatprep.subr.bf16.mxu0 %v7653_v6  ;;  %2233 = vrot.lane.b32.xlu1 %v7653_v6, %s6927_s22 }
 0x5e6   : > { %2217 = vrot.lane.b32.xlu0 %v7653_v6, %s6922_s26  ;;  %6178 = vmatpush3.bf16.msra.mxu0 %v7653_v6 }
 0x5e7   : > { %v6167_v7 = vpop.f32.mrb[40].mxu0  ;;  %6179 = vmatprep.subr.bf16.mxu0 %v7648_v4 }
 0x5e8   : > { %v2167_v8 = vpop.f32.mrb[41].mxu0 }
 0x5e9   : > { %v6168_v9 = vpop.f32.mrb[42].mxu0  ;;  %2235 = vrot.lane.b32.xlu1 %v7648_v4, %s6927_s22 }
 0x5ea   : > { %v7664_v10 = vpack.c.bf16 %v6168_v9, %v6167_v7  ;;  %2219 = vrot.lane.b32.xlu0 %v7648_v4, %s6922_s26  ;;  %v2170_v11 = vpop.f32.mrb[43].mxu0  ;;  %6180 = vmatpush3.bf16.msra.mxu0 %v7648_v4  ;;  %v6835_v9 = vld [vmem:[%s8894_s8 + $0x10] sm:$0xff]  }
 0x5eb   : > { %v7669_v22 = vpack.c.bf16 %v2170_v11, %v2167_v8 }
 0x5ed   : > { %6181 = vmatprep.subr.bf16.mxu0 %v7669_v22  ;;  %2237 = vrot.lane.b32.xlu1 %v7669_v22, %s6927_s22 }
 0x5ee   : > { %2221 = vrot.lane.b32.xlu0 %v7669_v22, %s6922_s26  ;;  %6182 = vmatpush3.bf16.msra.mxu0 %v7669_v22 }
 0x5ef   : > { %v6171_v24 = vpop.f32.mrb[44].mxu0  ;;  %6183 = vmatprep.subr.bf16.mxu0 %v7664_v10 }
 0x5f0   : > { %v2183_v26 = vpop.f32.mrb[45].mxu0  ;;  %v7689_v32 = vpack.c.bf16 %v6171_v24, %v6171_v24  ;;  %v6836_v24 = vld [vmem:[%s8894_s8 + $0x18] sm:$0xff]  }
 0x5f1   : > { %2239 = vrot.lane.b32.xlu1 %v7664_v10, %s6927_s22  ;;  %v6172_v27 = vpop.f32.mrb[46].mxu0 }
 0x5f2   : > { %2223 = vrot.lane.b32.xlu0 %v7664_v10, %s6922_s26  ;;  %v2186_v12 = vpop.f32.mrb[47].mxu0  ;;  %6184 = vmatpush3.bf16.msra.mxu0 %v7664_v10  ;;  %v7703_v14 = vsel %vm1482_vm4, %v7689_v32, 0 }
 0x5f3   : > { %v7687_v13 = vpack.c.bf16 %v2186_v12, %v2183_v26 }
 0x5f5   : > { %2241 = vrot.lane.b32.xlu1 %v7687_v13, %s6927_s22  ;;  %6185 = vmatprep.subr.bf16.mxu0 %v7687_v13 }
 0x5f6   : > { %2225 = vrot.lane.b32.xlu0 %v7687_v13, %s6922_s26  ;;  %6186 = vmatpush3.bf16.msra.mxu0 %v7687_v13 }
 0x5f7   : > { %6732 = vmatprep.subr.msk.bf16.mxu0 %vm1482_vm4, %v7689_v32 }
 0x5f9   : > { %2243 = vrot.lane.b32.xlu1 %v7689_v32, %s6927_s22 }
 0x5fa   : > { %2227 = vrot.lane.b32.xlu0 %v7689_v32, %s6922_s26  ;;  %6188 = vmatpush3.bf16.msra.mxu0 %v7703_v14 }
 0x5fb   : > { %6269 = vmatprep.subr.bf16.mxu0 %v6833_v5 }
 0x5fd   : > { %6190 = vmatmul.mubr.msk.bf16.vlgmr.msra.gmra.mrb[48].mxu0 %vm1457_vm3, %v6826_v34 }
 0x5fe   : > { %6193 = vmatprep.mubr.msk.bf16.mxu0 %vm1457_vm3, %v6827_v17  ;;  %6270 = vmatpush3.bf16.msra.mxu0 %v6833_v5  ;;  %v2884_v5 = vld [vmem:[%s8895_s9 + $0x30] sm:$0xff] }
 0x605   : > { %6194 = vmatmul.mubr.msk.bf16.gmra.mrb[52].mxu0 %vm1457_vm3, %v6828_v15 }
 0x606   : > { %6197 = vmatprep.mubr.msk.bf16.mxu0 %vm1457_vm3, %v6829_v38 }
 0x60d   : > { %6198 = vmatmul.mubr.msk.bf16.gmra.mrb[56].mxu0 %vm1457_vm3, %v6830_v39 }
 0x60e   : > { %6201 = vmatprep.mubr.msk.bf16.mxu0 %vm1457_vm3, %v6831_v40 }
 0x615   : > { %6202 = vmatmul.mubr.msk.bf16.gmra.mrb[60].mxu0 %vm1457_vm3, %v6832_v41 }
 0x64f   : > { %v2230_v29 = vpop.permute.xlu1 %2229 }
 0x650   : > { %v2214_v19 = vpop.permute.xlu0 %2213 }
 0x651   : > { %v2248_v42 = vsel %vm2245_vm7, %v2214_v19, %v2230_v29 }
 0x652   : > { %6205 = vmatprep.subr.bf16.mxu1 %v2248_v42 }
 0x653   : > { %6206 = vmatpush3.bf16.msra.mxu1 %v2248_v42  ;;  %v2232_v43 = vpop.permute.xlu1 %2231 }
 0x654   : > { %v2216_v44 = vpop.permute.xlu0 %2215 }
 0x655   : > { %v2252_v45 = vsel %vm2245_vm7, %v2216_v44, %v2232_v43 }
 0x656   : > { %6207 = vmatprep.subr.bf16.mxu1 %v2252_v45 }
 0x657   : > { %6208 = vmatpush3.bf16.msra.mxu1 %v2252_v45  ;;  %v2234_v31 = vpop.permute.xlu1 %2233 }
 0x658   : > { %v2218_v16 = vpop.permute.xlu0 %2217 }
 0x659   : > { %v2256_v46 = vsel %vm2245_vm7, %v2218_v16, %v2234_v31 }
 0x65a   : > { %6209 = vmatprep.subr.bf16.mxu1 %v2256_v46 }
 0x65b   : > { %6210 = vmatpush3.bf16.msra.mxu1 %v2256_v46  ;;  %v2236_v47 = vpop.permute.xlu1 %2235 }
 0x65c   : > { %v2220_v48 = vpop.permute.xlu0 %2219 }
 0x65d   : > { %v2260_v28 = vsel %vm2245_vm7, %v2220_v48, %v2236_v47 }
 0x65e   : > { %6211 = vmatprep.subr.bf16.mxu1 %v2260_v28 }
 0x65f   : > { %6212 = vmatpush3.bf16.msra.mxu1 %v2260_v28  ;;  %v2238_v49 = vpop.permute.xlu1 %2237 }
 0x660   : > { %v2222_v50 = vpop.permute.xlu0 %2221 }
 0x661   : > { %v2264_v18 = vsel %vm2245_vm7, %v2222_v50, %v2238_v49  ;;  %v2878_v49 = vld [vmem:[%s8895_s9] sm:$0xff] }
 0x662   : > { %6213 = vmatprep.subr.bf16.mxu1 %v2264_v18 }
 0x663   : > { %6214 = vmatpush3.bf16.msra.mxu1 %v2264_v18  ;;  %v2240_v51 = vpop.permute.xlu1 %2239 }
 0x664   : > { %v2224_v52 = vpop.permute.xlu0 %2223 }
 0x665   : > { %v2268_v30 = vsel %vm2245_vm7, %v2224_v52, %v2240_v51  ;;  %v2879_v51 = vld [vmem:[%s8895_s9 + $0x8] sm:$0xff] }
 0x666   : > { %6215 = vmatprep.subr.bf16.mxu1 %v2268_v30 }
 0x667   : > { %6216 = vmatpush3.bf16.msra.mxu1 %v2268_v30  ;;  %v2242_v53 = vpop.permute.xlu1 %2241 }
 0x668   : > { %v2226_v54 = vpop.permute.xlu0 %2225 }
 0x669   : > { %v2272_v21 = vsel %vm2245_vm7, %v2226_v54, %v2242_v53  ;;  %v2880_v54 = vld [vmem:[%s8895_s9 + $0x10] sm:$0xff] }
 0x66a   : > { %6217 = vmatprep.subr.bf16.mxu1 %v2272_v21 }
 0x66b   : > { %6218 = vmatpush3.bf16.msra.mxu1 %v2272_v21  ;;  %v2244_v55 = vpop.permute.xlu1 %2243 }
 0x66c   : > { %v2228_v36 = vpop.permute.xlu0 %2227 }
 0x66d   : > { %v2276_v56 = vsel %vm2245_vm7, %v2228_v36, %v2244_v55 }
 0x66e   : > { %v2547_v57 = vsel %vm1482_vm4, %v2276_v56, 0  ;;  %6733 = vmatprep.subr.msk.bf16.mxu1 %vm1482_vm4, %v2276_v56  ;;  %v2881_v56 = vld [vmem:[%s8895_s9 + $0x18] sm:$0xff] }
 0x66f   : > { %6220 = vmatpush3.bf16.msra.mxu1 %v2547_v57 }
 0x670   : > { %6237 = vmatprep.subr.bf16.mxu1 %v7637_v2 }
 0x672   : > { %6222 = vmatmul.mubr.msk.bf16.vlgmr.msra.gmra.mrb[48].mxu1 %vm1457_vm3, %v6810_v58 }
 0x673   : > { %6238 = vmatpush3.bf16.msra.mxu1 %v7637_v2  ;;  %6225 = vmatprep.mubr.msk.bf16.mxu1 %vm1457_vm3, %v6811_v59  ;;  %v6820_v2 = vld [vmem:[%s8893_s7 + $0x54] sm:$0xff]  }
 0x674   : > { %6239 = vmatprep.subr.bf16.mxu1 %v7635_v0 }
 0x677   : > { %6240 = vmatpush3.bf16.msra.mxu1 %v7635_v0  ;;  %v6818_v0 = vld [vmem:[%s8893_s7 + $0x44] sm:$0xff]  }
 0x678   : > { %6241 = vmatprep.subr.bf16.mxu1 %v7653_v6 }
 0x67a   : > { %6226 = vmatmul.mubr.msk.bf16.gmra.mrb[52].mxu1 %vm1457_vm3, %v6812_v60 }
 0x67b   : > { %6242 = vmatpush3.bf16.msra.mxu1 %v7653_v6  ;;  %6229 = vmatprep.mubr.msk.bf16.mxu1 %vm1457_vm3, %v6813_v23  ;;  %v6834_v6 = vld [vmem:[%s8894_s8 + $0x8] sm:$0xff]  }
 0x67c   : > { %6243 = vmatprep.subr.bf16.mxu1 %v7648_v4  ;;  %6271 = vmatprep.subr.bf16.mxu0 %v6834_v6 }
 0x67d   : > { %6272 = vmatpush3.bf16.msra.mxu0 %v6834_v6 }
 0x67e   : > { %6273 = vmatprep.subr.bf16.mxu0 %v6835_v9 }
 0x67f   : > { %6244 = vmatpush3.bf16.msra.mxu1 %v7648_v4  ;;  %v6824_v4 = vld [vmem:[%s8893_s7 + $0x74] ss:$0 sps:$4 sm:$0xff]  }
 0x680   : > { %6245 = vmatprep.subr.bf16.mxu1 %v7669_v22 }
 0x681   : > { %6274 = vmatpush3.bf16.msra.mxu0 %v6835_v9 }
 0x682   : > { %6230 = vmatmul.mubr.msk.bf16.gmra.mrb[56].mxu1 %vm1457_vm3, %v6814_v37  ;;  %6275 = vmatprep.subr.bf16.mxu0 %v6836_v24  ;;  %v2882_v37 = vld [vmem:[%s8895_s9 + $0x20] sm:$0xff] }
 0x683   : > { %6246 = vmatpush3.bf16.msra.mxu1 %v7669_v22  ;;  %6233 = vmatprep.mubr.msk.bf16.mxu1 %vm1457_vm3, %v6815_v61 }
 0x684   : > { %6247 = vmatprep.subr.bf16.mxu1 %v7664_v10 }
 0x685   : > { %6276 = vmatpush3.bf16.msra.mxu0 %v6836_v24 }
 0x687   : > { %6248 = vmatpush3.bf16.msra.mxu1 %v7664_v10 }
 0x688   : > { %6249 = vmatprep.subr.bf16.mxu1 %v7687_v13 }
 0x68a   : > { %6234 = vmatmul.mubr.msk.bf16.gmra.mrb[60].mxu1 %vm1457_vm3, %v6816_v62 }
 0x68b   : > { %6250 = vmatpush3.bf16.msra.mxu1 %v7687_v13  ;;  %6253 = vmatprep.mubr.msk.bf16.mxu1 %vm1457_vm3, %v6817_v63 }
 0x68c   : > { %6734 = vmatprep.subr.msk.bf16.mxu1 %vm1482_vm4, %v7689_v32 }
 0x68f   : > { %6252 = vmatpush3.bf16.msra.mxu1 %v7703_v14 }
 0x692   : > { %6254 = vmatmul.mubr.msk.bf16.vlgmr.msra.gmra.mrb[48].mxu1 %vm1457_vm3, %v6818_v0 }
 0x693   : > { %6257 = vmatprep.mubr.msk.bf16.mxu1 %vm1457_vm3, %v6819_v1  ;;  %v2883_v1 = vld [vmem:[%s8895_s9 + $0x28] sm:$0xff] }
 0x69a   : > { %6258 = vmatmul.mubr.msk.bf16.gmra.mrb[52].mxu1 %vm1457_vm3, %v6820_v2 }
 0x69b   : > { %6261 = vmatprep.mubr.msk.bf16.mxu1 %vm1457_vm3, %v6821_v35 }
 0x6a2   : > { %6262 = vmatmul.mubr.msk.bf16.gmra.mrb[56].mxu1 %vm1457_vm3, %v6822_v20 }
 0x6a3   : > { %6265 = vmatprep.mubr.msk.bf16.mxu1 %vm1457_vm3, %v6823_v3 }
 0x6aa   : > { %6266 = vmatmul.mubr.msk.bf16.gmra.mrb[60].mxu1 %vm1457_vm3, %v6824_v4 }
 0x6d0   : > { %v7833_v7 = vpop.f32.mrb[48].mxu0 }
 0x6d1   : > { %v2391_v8 = vpop.f32.mrb[49].mxu0 }
 0x6d2   : > { %v7838_v10 = vpop.f32.mrb[50].mxu0 }
 0x6d3   : > { %v2394_v11 = vpop.f32.mrb[51].mxu0 }
 0x6d8   : > { %v7840_v22 = vpop.f32.mrb[52].mxu0 }
 0x6d9   : > { %v7845_v25 = vpop.f32.mrb[53].mxu0 }
 0x6da   : > { %v7847_v26 = vpop.f32.mrb[54].mxu0 }
 0x6db   : > { %v7849_v27 = vpop.f32.mrb[55].mxu0 }
 0x6e0   : > { %v7852_v33 = vpop.f32.mrb[56].mxu0 }
 0x6e1   : > { %v7855_v34 = vpop.f32.mrb[57].mxu0 }
 0x6e2   : > { %v7857_v17 = vpop.f32.mrb[58].mxu0 }
 0x6e3   : > { %v7860_v15 = vpop.f32.mrb[59].mxu0 }
 0x6e8   : > { %v7864_v29 = vpop.f32.mrb[60].mxu0 }
 0x6e9   : > { %v7867_v19 = vpop.f32.mrb[61].mxu0 }
 0x6ea   : > { %v6204_v42 = vpop.f32.mrb[62].mxu0 }
 0x6eb   : > { %v7870_v43 = vpop.f32.mrb[63].mxu0 }
 0x765   : > { %v6255_v12 = vpop.f32.mrb[48].mxu1 }
 0x766   : > { %v2741_v13 = vpop.f32.mrb[49].mxu1 }
 0x767   : > { %2818 = vrot.lane.b32.xlu0 %v2741_v13, %s6928_s17  ;;  %v6256_v32 = vpop.f32.mrb[50].mxu1  ;;  %v2886_v13 = vld [vmem:[%s8895_s9 + $0x40] sm:$0xff] }
 0x768   : > { %v2744_v14 = vpop.f32.mrb[51].mxu1 }
 0x769   : > { %2820 = vrot.lane.b32.xlu1 %v2744_v14, %s6928_s17 }
 0x76b   : > { %2822 = vrot.lane.b32.xlu0 %v6255_v12, %s6928_s17 }
 0x76d   : > { %2824 = vrot.lane.b32.xlu1 %v6256_v32, %s6928_s17  ;;  %v6259_v38 = vpop.f32.mrb[52].mxu1 }
 0x76e   : > { %v2757_v39 = vpop.f32.mrb[53].mxu1 }
 0x76f   : > { %2826 = vrot.lane.b32.xlu0 %v2757_v39, %s6928_s17  ;;  %v6260_v40 = vpop.f32.mrb[54].mxu1  ;;  %v2887_v39 = vld [vmem:[%s8895_s9 + $0x48] sm:$0xff] }
 0x770   : > { %v2760_v41 = vpop.f32.mrb[55].mxu1 }
 0x771   : > { %2828 = vrot.lane.b32.xlu1 %v2760_v41, %s6928_s17 }
 0x773   : > { %2830 = vrot.lane.b32.xlu0 %v6259_v38, %s6928_s17 }
 0x775   : > { %2832 = vrot.lane.b32.xlu1 %v6260_v40, %s6928_s17  ;;  %v6263_v44 = vpop.f32.mrb[56].mxu1 }
 0x776   : > { %v2773_v45 = vpop.f32.mrb[57].mxu1 }
 0x777   : > { %2834 = vrot.lane.b32.xlu0 %v2773_v45, %s6928_s17  ;;  %v6264_v31 = vpop.f32.mrb[58].mxu1  ;;  %v2888_v45 = vld [vmem:[%s8895_s9 + $0x50] sm:$0xff] }
 0x778   : > { %v2776_v16 = vpop.f32.mrb[59].mxu1 }
 0x779   : > { %2836 = vrot.lane.b32.xlu1 %v2776_v16, %s6928_s17 }
 0x77b   : > { %2838 = vrot.lane.b32.xlu0 %v6263_v44, %s6928_s17 }
 0x77d   : > { %2840 = vrot.lane.b32.xlu1 %v6264_v31, %s6928_s17  ;;  %v6267_v46 = vpop.f32.mrb[60].mxu1 }
 0x77e   : > { %v2789_v47 = vpop.f32.mrb[61].mxu1 }
 0x77f   : > { %2842 = vrot.lane.b32.xlu0 %v2789_v47, %s6928_s17  ;;  %v6268_v48 = vpop.f32.mrb[62].mxu1  ;;  %v2889_v47 = vld [vmem:[%s8895_s9 + $0x58] sm:$0xff] }
 0x780   : > { %v2792_v28 = vpop.f32.mrb[63].mxu1 }
 0x781   : > { %2844 = vrot.lane.b32.xlu1 %v2792_v28, %s6928_s17 }
 0x783   : > { %2846 = vrot.lane.b32.xlu0 %v6267_v46, %s6928_s17  ;;  %s6930_s17 = smov 64  }
 0x7d9   : > { %v2819_v50 = vpop.permute.xlu0 %2818 }
 0x7da   : > { %v2863_v18 = vsel %vm2076_vm6, %v2391_v8, %v2819_v50 }
 0x7db   : > { %v2893_v52 = vadd.f32 %v2878_v49, %v2863_v18  ;;  %v2821_v30 = vpop.permute.xlu1 %2820  ;;  %v2890_v18 = vld [vmem:[%s8895_s9 + $0x60] sm:$0xff] }
 0x7dc   : > { %v2864_v53 = vsel %vm2076_vm6, %v2394_v11, %v2821_v30 }
 0x7dd   : > { %v2894_v21 = vadd.f32 %v2879_v51, %v2864_v53  ;;  %v2823_v55 = vpop.permute.xlu0 %2822  ;;  %v2908_v57 = vmax.f32 %v2893_v52, 0.0  ;;  %v2891_v53 = vld [vmem:[%s8895_s9 + $0x68] sm:$0xff] }
 0x7de   : > { %v2865_v36 = vsel %vm2076_vm6, %v7833_v7, %v2823_v55 }
 0x7df   : > { %v2909_v58 = vmax.f32 %v2894_v21, 0.0  ;;  %v2895_v59 = vadd.f32 %v2880_v54, %v2865_v36  ;;  %v2825_v60 = vpop.permute.xlu1 %2824 }
 0x7e0   : > { %v2866_v23 = vsel %vm2076_vm6, %v7838_v10, %v2825_v60  ;;  %v2885_v10 = vld [vmem:[%s8895_s9 + $0x38] sm:$0xff] }
 0x7e1   : > { %v2923_v61 = vpack.c.bf16 %v2909_v58, %v2908_v57  ;;  %v2896_v62 = vadd.f32 %v2881_v56, %v2866_v23  ;;  %v2827_v63 = vpop.permute.xlu0 %2826  ;;  %v2910_v2 = vmax.f32 %v2895_v59, 0.0  ;;  %v2892_v56 = vld [vmem:[%s8895_s9 + $0x70] sm:$0xff] }
 0x7e2   : > { %v2867_v0 = vsel %vm2076_vm6, %v7845_v25, %v2827_v63 }
 0x7e3   : > { %v2911_v35 = vmax.f32 %v2896_v62, 0.0  ;;  %v2897_v20 = vadd.f32 %v2882_v37, %v2867_v0  ;;  %6277 = vmatprep.mubr.msk.bf16.mxu0 %vm2963_vm8, %v2923_v61  ;;  %v2829_v3 = vpop.permute.xlu1 %2828 }
 0x7e4   : > { %v2868_v4 = vsel %vm2076_vm6, %v7849_v27, %v2829_v3 }
 0x7e5   : > { %v2924_v6 = vpack.c.bf16 %v2911_v35, %v2910_v2  ;;  %v2898_v7 = vadd.f32 %v2883_v1, %v2868_v4  ;;  %v2831_v8 = vpop.permute.xlu0 %2830  ;;  %v2912_v11 = vmax.f32 %v2897_v20, 0.0 }
 0x7e6   : > { %v2869_v9 = vsel %vm2076_vm6, %v7840_v22, %v2831_v8 }
 0x7e7   : > { %v2913_v24 = vmax.f32 %v2898_v7, 0.0  ;;  %v2899_v25 = vadd.f32 %v2884_v5, %v2869_v9  ;;  %6278 = vmatmul.mubr.msk.bf16.vlgmr.msra.gmra.mrb[64].mxu0 %vm2963_vm8, %v2924_v6  ;;  %v2833_v27 = vpop.permute.xlu1 %2832 }
 0x7e8   : > { %v2870_v12 = vsel %vm2076_vm6, %v7847_v26, %v2833_v27 }
 0x7e9   : > { %v2925_v32 = vpack.c.bf16 %v2913_v24, %v2912_v11  ;;  %v2900_v14 = vadd.f32 %v2885_v10, %v2870_v12  ;;  %v2835_v22 = vpop.permute.xlu0 %2834  ;;  %v2914_v40 = vmax.f32 %v2899_v25, 0.0  ;;  %v6837_v12 = vld [vmem:[%s8896_s10 + $0x78] sm:$0xff]  }
 0x7ea   : > { %v2871_v38 = vsel %vm2076_vm6, %v7855_v34, %v2835_v22  ;;  %6341 = vmatprep.mubr.msk.bf16.mxu1 %vm1457_vm3, %v6837_v12 }
 0x7eb   : > { %v2915_v41 = vmax.f32 %v2900_v14, 0.0  ;;  %v2901_v42 = vadd.f32 %v2886_v13, %v2871_v38  ;;  %6281 = vmatprep.mubr.msk.bf16.mxu0 %vm2963_vm8, %v2925_v32  ;;  %v2837_v26 = vpop.permute.xlu1 %2836 }
 0x7ec   : > { %v2872_v44 = vsel %vm2076_vm6, %v7860_v15, %v2837_v26  ;;  %v6856_v26 = vld [vmem:[%s8896_s10 + $0x18] sm:$0xff]  }
 0x7ed   : > { %v2926_v31 = vpack.c.bf16 %v2915_v41, %v2914_v40  ;;  %v2902_v16 = vadd.f32 %v2887_v39, %v2872_v44  ;;  %v2839_v34 = vpop.permute.xlu0 %2838  ;;  %v2916_v48 = vmax.f32 %v2901_v42, 0.0  ;;  %v6853_v40 = vld [vmem:[%s8896_s10] sm:$0xff]   ;;  %v6854_v41 = vld [vmem:[%s8896_s10 + $0x8] sm:$0xff]   ;;  %v6855_v42 = vld [vmem:[%s8896_s10 + $0x10] sm:$0xff]  }
 0x7ee   : > { %v2873_v46 = vsel %vm2076_vm6, %v7852_v33, %v2839_v34  ;;  %v6857_v44 = vld [vmem:[%s8896_s10 + $0x20] sm:$0xff]  }
 0x7ef   : > { %v2917_v28 = vmax.f32 %v2902_v16, 0.0  ;;  %v2903_v49 = vadd.f32 %v2888_v45, %v2873_v46  ;;  %6282 = vmatmul.mubr.msk.bf16.gmra.mrb[68].mxu0 %vm2963_vm8, %v2926_v31  ;;  %v2841_v15 = vpop.permute.xlu1 %2840  ;;  %v6858_v45 = vld [vmem:[%s8896_s10 + $0x28] sm:$0xff]   ;;  %v6859_v31 = vld [vmem:[%s8896_s10 + $0x30] sm:$0xff]   ;;  %v6860_v16 = vld [vmem:[%s8896_s10 + $0x38] ss:$0 sps:$4 sm:$0xff]  }
 0x7f0   : > { %v2874_v50 = vsel %vm2076_vm6, %v7857_v17, %v2841_v15 }
 0x7f1   : > { %v2927_v51 = vpack.c.bf16 %v2917_v28, %v2916_v48  ;;  %v2904_v52 = vadd.f32 %v2889_v47, %v2874_v50  ;;  %v2843_v33 = vpop.permute.xlu0 %2842  ;;  %v2918_v54 = vmax.f32 %v2903_v49, 0.0 }
 0x7f2   : > { %v2875_v30 = vsel %vm2076_vm6, %v7867_v19, %v2843_v33 }
 0x7f3   : > { %v2919_v21 = vmax.f32 %v2904_v52, 0.0  ;;  %v2905_v55 = vadd.f32 %v2890_v18, %v2875_v30  ;;  %6285 = vmatprep.mubr.msk.bf16.mxu0 %vm2963_vm8, %v2927_v51  ;;  %v2845_v17 = vpop.permute.xlu1 %2844 }
 0x7f4   : > { %v2876_v36 = vsel %vm2076_vm6, %v7870_v43, %v2845_v17 }
 0x7f5   : > { %v2928_v57 = vpack.c.bf16 %v2919_v21, %v2918_v54  ;;  %v2906_v58 = vadd.f32 %v2891_v53, %v2876_v36  ;;  %v2847_v19 = vpop.permute.xlu0 %2846  ;;  %v2920_v60 = vmax.f32 %v2905_v55, 0.0 }
 0x7f6   : > { %v2877_v59 = vsel %vm2076_vm6, %v7864_v29, %v2847_v19 }
 0x7f7   : > { %v2921_v23 = vmax.f32 %v2906_v58, 0.0  ;;  %v2907_v37 = vadd.f32 %v2892_v56, %v2877_v59  ;;  %6286 = vmatmul.mubr.msk.bf16.gmra.mrb[72].mxu0 %vm2963_vm8, %v2928_v57 }
 0x7f9   : > { %v2929_v61 = vpack.c.bf16 %v2921_v23, %v2920_v60  ;;  %v2922_v62 = vmax.f32 %v2907_v37, 0.0  ;;  %v6838_v23 = vld [vmem:[%s8896_s10 + $0x80] sm:$0xff]   ;;  %v6839_v37 = vld [vmem:[%s8896_s10 + $0x88] sm:$0xff]  }
 0x7fb   : > { %6289 = vmatprep.mubr.msk.bf16.mxu0 %vm2963_vm8, %v2929_v61  ;;  %v2930_v43 = vpack.c.bf16 %v2922_v62, %v2922_v62  ;;  %v6840_v61 = vld [vmem:[%s8896_s10 + $0x90] sm:$0xff]   ;;  %v6841_v62 = vld [vmem:[%s8896_s10 + $0x98] sm:$0xff]  }
 0x7ff   : > { %6290 = vmatmul.mubr.msk.bf16.gmra.mrb[76].mxu0 %vm2963_vm8, %v2930_v43  ;;  %v6842_v43 = vld [vmem:[%s8896_s10 + $0xa0] sm:$0xff]  }
 0x800   : > { %6309 = vmatprep.mubr.msk.bf16.mxu0 %vm1457_vm3, %v6853_v40 }
 0x8ba   : > { %v6279_v63 = vpop.f32.mrb[64].mxu0 }
 0x8bb   : > { %v3022_v0 = vpop.f32.mrb[65].mxu0 }
 0x8bc   : > { %v6280_v1 = vpop.f32.mrb[66].mxu0 }
 0x8bd   : > { %v7961_v2 = vpack.c.bf16 %v6280_v1, %v6279_v63  ;;  %v3025_v35 = vpop.f32.mrb[67].mxu0  ;;  %v6843_v63 = vld [vmem:[%s8896_s10 + $0xa8] sm:$0xff]   ;;  %v6845_v1 = vld [vmem:[%s8896_s10 + $0x3c] sm:$0xff]  }
 0x8be   : > { %v7963_v20 = vpack.c.bf16 %v3025_v35, %v3022_v0  ;;  %v6844_v0 = vld [vmem:[%s8896_s10 + $0xb0] ss:$0 sps:$4 sm:$0xff]  }
 0x8bf   : > { %v6847_v35 = vld [vmem:[%s8896_s10 + $0x4c] sm:$0xff]  }
 0x8c0   : > { %6293 = vmatprep.subr.bf16.mxu0 %v7963_v20  ;;  %3116 = vrot.lane.b32.xlu0 %v7963_v20, %s6929_s27 }
 0x8c1   : > { %3100 = vrot.lane.b32.xlu1 %v7963_v20, %s6922_s26  ;;  %6294 = vmatpush3.bf16.msra.mxu0 %v7963_v20 }
 0x8c2   : > { %v6283_v29 = vpop.f32.mrb[68].mxu0  ;;  %6295 = vmatprep.subr.bf16.mxu0 %v7961_v2 }
 0x8c3   : > { %v3038_v3 = vpop.f32.mrb[69].mxu0 }
 0x8c4   : > { %v6284_v4 = vpop.f32.mrb[70].mxu0  ;;  %3118 = vrot.lane.b32.xlu0 %v7961_v2, %s6929_s27 }
 0x8c5   : > { %v7974_v5 = vpack.c.bf16 %v6284_v4, %v6283_v29  ;;  %3102 = vrot.lane.b32.xlu1 %v7961_v2, %s6922_s26  ;;  %v3041_v6 = vpop.f32.mrb[71].mxu0  ;;  %6296 = vmatpush3.bf16.msra.mxu0 %v7961_v2  ;;  %v6849_v29 = vld [vmem:[%s8896_s10 + $0x5c] sm:$0xff]   ;;  %v6851_v4 = vld [vmem:[%s8896_s10 + $0x6c] sm:$0xff]  }
 0x8c6   : > { %v7979_v7 = vpack.c.bf16 %v3041_v6, %v3038_v3  ;;  %v6850_v3 = vld [vmem:[%s8896_s10 + $0x64] sm:$0xff]  }
 0x8c7   : > { %v6861_v6 = vld [vmem:[%s8897_s11] sm:$0xff]  }
 0x8c8   : > { %6297 = vmatprep.subr.bf16.mxu0 %v7979_v7  ;;  %3120 = vrot.lane.b32.xlu0 %v7979_v7, %s6929_s27 }
 0x8c9   : > { %3104 = vrot.lane.b32.xlu1 %v7979_v7, %s6922_s26  ;;  %6298 = vmatpush3.bf16.msra.mxu0 %v7979_v7 }
 0x8ca   : > { %v6287_v8 = vpop.f32.mrb[72].mxu0  ;;  %6299 = vmatprep.subr.bf16.mxu0 %v7974_v5 }
 0x8cb   : > { %v3054_v9 = vpop.f32.mrb[73].mxu0 }
 0x8cc   : > { %v6288_v10 = vpop.f32.mrb[74].mxu0  ;;  %3122 = vrot.lane.b32.xlu0 %v7974_v5, %s6929_s27 }
 0x8cd   : > { %v7990_v11 = vpack.c.bf16 %v6288_v10, %v6287_v8  ;;  %3106 = vrot.lane.b32.xlu1 %v7974_v5, %s6922_s26  ;;  %v3057_v24 = vpop.f32.mrb[75].mxu0  ;;  %6300 = vmatpush3.bf16.msra.mxu0 %v7974_v5  ;;  %v6863_v10 = vld [vmem:[%s8897_s11 + $0x10] sm:$0xff]  }
 0x8ce   : > { %v7995_v25 = vpack.c.bf16 %v3057_v24, %v3054_v9  ;;  %v6865_v24 = vld [vmem:[%s8897_s11 + $0x20] sm:$0xff]  }
 0x8d0   : > { %6301 = vmatprep.subr.bf16.mxu0 %v7995_v25  ;;  %3124 = vrot.lane.b32.xlu0 %v7995_v25, %s6929_s27 }
 0x8d1   : > { %3108 = vrot.lane.b32.xlu1 %v7995_v25, %s6922_s26  ;;  %6302 = vmatpush3.bf16.msra.mxu0 %v7995_v25 }
 0x8d2   : > { %v6291_v27 = vpop.f32.mrb[76].mxu0  ;;  %6303 = vmatprep.subr.bf16.mxu0 %v7990_v11 }
 0x8d3   : > { %v3070_v13 = vpop.f32.mrb[77].mxu0  ;;  %v8015_v38 = vpack.c.bf16 %v6291_v27, %v6291_v27 }
 0x8d4   : > { %3126 = vrot.lane.b32.xlu0 %v7990_v11, %s6929_s27  ;;  %v6292_v32 = vpop.f32.mrb[78].mxu0 }
 0x8d5   : > { %3110 = vrot.lane.b32.xlu1 %v7990_v11, %s6922_s26  ;;  %v3073_v14 = vpop.f32.mrb[79].mxu0  ;;  %6304 = vmatpush3.bf16.msra.mxu0 %v7990_v11  ;;  %v8029_v39 = vsel %vm1482_vm4, %v8015_v38, 0 }
 0x8d6   : > { %v8013_v22 = vpack.c.bf16 %v3073_v14, %v3070_v13  ;;  %v6867_v13 = vld [vmem:[%s8897_s11 + $0x30] sm:$0xff]  }
 0x8d8   : > { %3128 = vrot.lane.b32.xlu0 %v8013_v22, %s6929_s27  ;;  %6305 = vmatprep.subr.bf16.mxu0 %v8013_v22 }
 0x8d9   : > { %3112 = vrot.lane.b32.xlu1 %v8013_v22, %s6922_s26  ;;  %6306 = vmatpush3.bf16.msra.mxu0 %v8013_v22 }
 0x8da   : > { %6735 = vmatprep.subr.msk.bf16.mxu0 %vm1482_vm4, %v8015_v38 }
 0x8dc   : > { %3130 = vrot.lane.b32.xlu0 %v8015_v38, %s6929_s27  ;;  %s6738_s27 = smul.u32 448, %s8903_s19 }
 0x8dd   : > { %3114 = vrot.lane.b32.xlu1 %v8015_v38, %s6922_s26  ;;  %6308 = vmatpush3.bf16.msra.mxu0 %v8029_v39 }
 0x8de   : > { %6389 = vmatprep.subr.bf16.mxu0 %v6861_v6  ;;  %s8631_s20 = scalar_lea.vmem %s8901_s15, %s6738_s27 }
 0x8e0   : > { %6310 = vmatmul.mubr.msk.bf16.vlgmr.msra.gmra.mrb[80].mxu0 %vm1457_vm3, %v6854_v41 }
 0x8e1   : > { %6313 = vmatprep.mubr.msk.bf16.mxu0 %vm1457_vm3, %v6855_v42  ;;  %6390 = vmatpush3.bf16.msra.mxu0 %v6861_v6 }
 0x8e8   : > { %6314 = vmatmul.mubr.msk.bf16.gmra.mrb[84].mxu0 %vm1457_vm3, %v6856_v26 }
 0x8e9   : > { %6317 = vmatprep.mubr.msk.bf16.mxu0 %vm1457_vm3, %v6857_v44 }
 0x8f0   : > { %6318 = vmatmul.mubr.msk.bf16.gmra.mrb[88].mxu0 %vm1457_vm3, %v6858_v45 }
 0x8f1   : > { %6321 = vmatprep.mubr.msk.bf16.mxu0 %vm1457_vm3, %v6859_v31 }
 0x8f8   : > { %6322 = vmatmul.mubr.msk.bf16.gmra.mrb[92].mxu0 %vm1457_vm3, %v6860_v16 }
 0x932   : > { %v3117_v34 = vpop.permute.xlu0 %3116 }
 0x933   : > { %v3101_v46 = vpop.permute.xlu1 %3100 }
 0x934   : > { %v3135_v47 = vsel %vm3132_vm9, %v3101_v46, %v3117_v34 }
 0x935   : > { %6325 = vmatprep.subr.bf16.mxu1 %v3135_v47 }
 0x936   : > { %6326 = vmatpush3.bf16.msra.mxu1 %v3135_v47  ;;  %v3119_v48 = vpop.permute.xlu0 %3118 }
 0x937   : > { %v3103_v28 = vpop.permute.xlu1 %3102 }
 0x938   : > { %v3139_v49 = vsel %vm3132_vm9, %v3103_v28, %v3119_v48 }
 0x939   : > { %6327 = vmatprep.subr.bf16.mxu1 %v3139_v49 }
 0x93a   : > { %6328 = vmatpush3.bf16.msra.mxu1 %v3139_v49  ;;  %v3121_v15 = vpop.permute.xlu0 %3120 }
 0x93b   : > { %v3105_v50 = vpop.permute.xlu1 %3104 }
 0x93c   : > { %v3143_v18 = vsel %vm3132_vm9, %v3105_v50, %v3121_v15 }
 0x93d   : > { %6329 = vmatprep.subr.bf16.mxu1 %v3143_v18 }
 0x93e   : > { %6330 = vmatpush3.bf16.msra.mxu1 %v3143_v18  ;;  %v3123_v51 = vpop.permute.xlu0 %3122 }
 0x93f   : > { %v3107_v52 = vpop.permute.xlu1 %3106 }
 0x940   : > { %v3147_v33 = vsel %vm3132_vm9, %v3107_v52, %v3123_v51 }
 0x941   : > { %6331 = vmatprep.subr.bf16.mxu1 %v3147_v33 }
 0x942   : > { %6332 = vmatpush3.bf16.msra.mxu1 %v3147_v33  ;;  %v3125_v30 = vpop.permute.xlu0 %3124 }
 0x943   : > { %v3109_v53 = vpop.permute.xlu1 %3108 }
 0x944   : > { %v3151_v54 = vsel %vm3132_vm9, %v3109_v53, %v3125_v30 }
 0x945   : > { %6333 = vmatprep.subr.bf16.mxu1 %v3151_v54 }
 0x946   : > { %6334 = vmatpush3.bf16.msra.mxu1 %v3151_v54  ;;  %v3127_v21 = vpop.permute.xlu0 %3126 }
 0x947   : > { %v3111_v55 = vpop.permute.xlu1 %3110 }
 0x948   : > { %v3155_v17 = vsel %vm3132_vm9, %v3111_v55, %v3127_v21  ;;  %v3765_v55 = vld [vmem:[%s8898_s12] sm:$0xff] }
 0x949   : > { %6335 = vmatprep.subr.bf16.mxu1 %v3155_v17 }
 0x94a   : > { %6336 = vmatpush3.bf16.msra.mxu1 %v3155_v17  ;;  %v3129_v36 = vpop.permute.xlu0 %3128 }
 0x94b   : > { %v3113_v56 = vpop.permute.xlu1 %3112 }
 0x94c   : > { %v3159_v57 = vsel %vm3132_vm9, %v3113_v56, %v3129_v36  ;;  %v3766_v56 = vld [vmem:[%s8898_s12 + $0x8] sm:$0xff] }
 0x94d   : > { %6337 = vmatprep.subr.bf16.mxu1 %v3159_v57 }
 0x94e   : > { %6338 = vmatpush3.bf16.msra.mxu1 %v3159_v57  ;;  %v3131_v58 = vpop.permute.xlu0 %3130 }
 0x94f   : > { %v3115_v19 = vpop.permute.xlu1 %3114 }
 0x950   : > { %v3163_v59 = vsel %vm3132_vm9, %v3115_v19, %v3131_v58 }
 0x951   : > { %v3434_v60 = vsel %vm1482_vm4, %v3163_v59, 0  ;;  %6736 = vmatprep.subr.msk.bf16.mxu1 %vm1482_vm4, %v3163_v59  ;;  %v3767_v59 = vld [vmem:[%s8898_s12 + $0x10] sm:$0xff] }
 0x952   : > { %6340 = vmatpush3.bf16.msra.mxu1 %v3434_v60 }
 0x953   : > { %6357 = vmatprep.subr.bf16.mxu1 %v7963_v20 }
 0x955   : > { %6342 = vmatmul.mubr.msk.bf16.vlgmr.msra.gmra.mrb[64].mxu1 %vm1457_vm3, %v6838_v23 }
 0x956   : > { %6358 = vmatpush3.bf16.msra.mxu1 %v7963_v20  ;;  %6345 = vmatprep.mubr.msk.bf16.mxu1 %vm1457_vm3, %v6839_v37  ;;  %v6848_v20 = vld [vmem:[%s8896_s10 + $0x54] sm:$0xff]  }
 0x957   : > { %6359 = vmatprep.subr.bf16.mxu1 %v7961_v2 }
 0x95a   : > { %6360 = vmatpush3.bf16.msra.mxu1 %v7961_v2  ;;  %v6846_v2 = vld [vmem:[%s8896_s10 + $0x44] sm:$0xff]  }
 0x95b   : > { %6361 = vmatprep.subr.bf16.mxu1 %v7979_v7 }
 0x95d   : > { %6346 = vmatmul.mubr.msk.bf16.gmra.mrb[68].mxu1 %vm1457_vm3, %v6840_v61  ;;  %v3768_v61 = vld [vmem:[%s8898_s12 + $0x18] sm:$0xff] }
 0x95e   : > { %6362 = vmatpush3.bf16.msra.mxu1 %v7979_v7  ;;  %6349 = vmatprep.mubr.msk.bf16.mxu1 %vm1457_vm3, %v6841_v62  ;;  %v6862_v7 = vld [vmem:[%s8897_s11 + $0x8] sm:$0xff]  }
 0x95f   : > { %6363 = vmatprep.subr.bf16.mxu1 %v7974_v5  ;;  %6391 = vmatprep.subr.bf16.mxu0 %v6862_v7 }
 0x960   : > { %6392 = vmatpush3.bf16.msra.mxu0 %v6862_v7 }
 0x961   : > { %6393 = vmatprep.subr.bf16.mxu0 %v6863_v10 }
 0x962   : > { %6364 = vmatpush3.bf16.msra.mxu1 %v7974_v5  ;;  %v6852_v5 = vld [vmem:[%s8896_s10 + $0x74] ss:$0 sps:$4 sm:$0xff]  }
 0x963   : > { %6365 = vmatprep.subr.bf16.mxu1 %v7995_v25 }
 0x964   : > { %6394 = vmatpush3.bf16.msra.mxu0 %v6863_v10  ;;  %v3771_v10 = vld [vmem:[%s8898_s12 + $0x30] sm:$0xff] }
 0x965   : > { %6350 = vmatmul.mubr.msk.bf16.gmra.mrb[72].mxu1 %vm1457_vm3, %v6842_v43 }
 0x966   : > { %6366 = vmatpush3.bf16.msra.mxu1 %v7995_v25  ;;  %6353 = vmatprep.mubr.msk.bf16.mxu1 %vm1457_vm3, %v6843_v63  ;;  %v6866_v25 = vld [vmem:[%s8897_s11 + $0x28] sm:$0xff]  }
 0x967   : > { %6367 = vmatprep.subr.bf16.mxu1 %v7990_v11 }
 0x96a   : > { %6368 = vmatpush3.bf16.msra.mxu1 %v7990_v11  ;;  %v6864_v11 = vld [vmem:[%s8897_s11 + $0x18] sm:$0xff]  }
 0x96b   : > { %6369 = vmatprep.subr.bf16.mxu1 %v8013_v22  ;;  %6395 = vmatprep.subr.bf16.mxu0 %v6864_v11 }
 0x96c   : > { %6396 = vmatpush3.bf16.msra.mxu0 %v6864_v11 }
 0x96d   : > { %6354 = vmatmul.mubr.msk.bf16.gmra.mrb[76].mxu1 %vm1457_vm3, %v6844_v0  ;;  %6397 = vmatprep.subr.bf16.mxu0 %v6865_v24 }
 0x96e   : > { %6370 = vmatpush3.bf16.msra.mxu1 %v8013_v22  ;;  %6373 = vmatprep.mubr.msk.bf16.mxu1 %vm1457_vm3, %v6845_v1  ;;  %v6868_v22 = vld [vmem:[%s8897_s11 + $0x38] sm:$0xff]  }
 0x96f   : > { %6737 = vmatprep.subr.msk.bf16.mxu1 %vm1482_vm4, %v8015_v38 }
 0x970   : > { %6398 = vmatpush3.bf16.msra.mxu0 %v6865_v24 }
 0x971   : > { %6399 = vmatprep.subr.bf16.mxu0 %v6866_v25 }
 0x972   : > { %6372 = vmatpush3.bf16.msra.mxu1 %v8029_v39 }
 0x974   : > { %6400 = vmatpush3.bf16.msra.mxu0 %v6866_v25 }
 0x975   : > { %6374 = vmatmul.mubr.msk.bf16.vlgmr.msra.gmra.mrb[64].mxu1 %vm1457_vm3, %v6846_v2  ;;  %6401 = vmatprep.subr.bf16.mxu0 %v6867_v13  ;;  %v3769_v2 = vld [vmem:[%s8898_s12 + $0x20] sm:$0xff] }
 0x976   : > { %6377 = vmatprep.mubr.msk.bf16.mxu1 %vm1457_vm3, %v6847_v35 }
 0x978   : > { %6402 = vmatpush3.bf16.msra.mxu0 %v6867_v13 }
 0x979   : > { %6403 = vmatprep.subr.bf16.mxu0 %v6868_v22 }
 0x97c   : > { %6404 = vmatpush3.bf16.msra.mxu0 %v6868_v22 }
 0x97d   : > { %6378 = vmatmul.mubr.msk.bf16.gmra.mrb[68].mxu1 %vm1457_vm3, %v6848_v20 }
 0x97e   : > { %6381 = vmatprep.mubr.msk.bf16.mxu1 %vm1457_vm3, %v6849_v29 }
 0x985   : > { %6382 = vmatmul.mubr.msk.bf16.gmra.mrb[72].mxu1 %vm1457_vm3, %v6850_v3 }
 0x986   : > { %6385 = vmatprep.mubr.msk.bf16.mxu1 %vm1457_vm3, %v6851_v4  ;;  %v3770_v4 = vld [vmem:[%s8898_s12 + $0x28] sm:$0xff] }
 0x98d   : > { %6386 = vmatmul.mubr.msk.bf16.gmra.mrb[76].mxu1 %vm1457_vm3, %v6852_v5 }
 0x9b3   : > { %v8159_v8 = vpop.f32.mrb[80].mxu0 }
 0x9b4   : > { %v8161_v9 = vpop.f32.mrb[81].mxu0 }
 0x9b5   : > { %v8175_v27 = vpop.f32.mrb[82].mxu0 }
 0x9b6   : > { %v3281_v12 = vpop.f32.mrb[83].mxu0 }
 0x9bb   : > { %v8180_v32 = vpop.f32.mrb[84].mxu0 }
 0x9bc   : > { %v8182_v14 = vpop.f32.mrb[85].mxu0 }
 0x9bd   : > { %v8187_v38 = vpop.f32.mrb[86].mxu0 }
 0x9be   : > { %v8189_v39 = vpop.f32.mrb[87].mxu0 }
 0x9c3   : > { %v8192_v44 = vpop.f32.mrb[88].mxu0 }
 0x9c4   : > { %v8195_v45 = vpop.f32.mrb[89].mxu0 }
 0x9c5   : > { %v8197_v31 = vpop.f32.mrb[90].mxu0 }
 0x9c6   : > { %v8200_v16 = vpop.f32.mrb[91].mxu0 }
 0x9cb   : > { %v8204_v28 = vpop.f32.mrb[92].mxu0 }
 0x9cc   : > { %v8207_v49 = vpop.f32.mrb[93].mxu0 }
 0x9cd   : > { %v6324_v15 = vpop.f32.mrb[94].mxu0 }
 0x9ce   : > { %v8210_v50 = vpop.f32.mrb[95].mxu0 }
 0xa48   : > { %v6375_v40 = vpop.f32.mrb[64].mxu1 }
 0xa49   : > { %v3628_v41 = vpop.f32.mrb[65].mxu1 }
 0xa4a   : > { %3705 = vrot.lane.b32.xlu1 %v3628_v41, %s6930_s17  ;;  %v6376_v42 = vpop.f32.mrb[66].mxu1  ;;  %v3773_v41 = vld [vmem:[%s8898_s12 + $0x40] sm:$0xff] }
 0xa4b   : > { %v3631_v26 = vpop.f32.mrb[67].mxu1 }
 0xa4c   : > { %3707 = vrot.lane.b32.xlu0 %v3631_v26, %s6930_s17 }
 0xa4e   : > { %3709 = vrot.lane.b32.xlu1 %v6375_v40, %s6930_s17 }
 0xa50   : > { %3711 = vrot.lane.b32.xlu0 %v6376_v42, %s6930_s17  ;;  %v6379_v34 = vpop.f32.mrb[68].mxu1 }
 0xa51   : > { %v3644_v46 = vpop.f32.mrb[69].mxu1 }
 0xa52   : > { %3713 = vrot.lane.b32.xlu1 %v3644_v46, %s6930_s17  ;;  %v6380_v47 = vpop.f32.mrb[70].mxu1  ;;  %v3774_v46 = vld [vmem:[%s8898_s12 + $0x48] sm:$0xff] }
 0xa53   : > { %v3647_v48 = vpop.f32.mrb[71].mxu1 }
 0xa54   : > { %3715 = vrot.lane.b32.xlu0 %v3647_v48, %s6930_s17 }
 0xa56   : > { %3717 = vrot.lane.b32.xlu1 %v6379_v34, %s6930_s17 }
 0xa58   : > { %3719 = vrot.lane.b32.xlu0 %v6380_v47, %s6930_s17  ;;  %v6383_v18 = vpop.f32.mrb[72].mxu1 }
 0xa59   : > { %v3660_v51 = vpop.f32.mrb[73].mxu1 }
 0xa5a   : > { %3721 = vrot.lane.b32.xlu1 %v3660_v51, %s6930_s17  ;;  %v6384_v52 = vpop.f32.mrb[74].mxu1  ;;  %v3775_v51 = vld [vmem:[%s8898_s12 + $0x50] sm:$0xff] }
 0xa5b   : > { %v3663_v33 = vpop.f32.mrb[75].mxu1 }
 0xa5c   : > { %3723 = vrot.lane.b32.xlu0 %v3663_v33, %s6930_s17 }
 0xa5e   : > { %3725 = vrot.lane.b32.xlu1 %v6383_v18, %s6930_s17 }
 0xa60   : > { %3727 = vrot.lane.b32.xlu0 %v6384_v52, %s6930_s17  ;;  %v6387_v30 = vpop.f32.mrb[76].mxu1 }
 0xa61   : > { %v3676_v53 = vpop.f32.mrb[77].mxu1 }
 0xa62   : > { %3729 = vrot.lane.b32.xlu1 %v3676_v53, %s6930_s17  ;;  %v6388_v54 = vpop.f32.mrb[78].mxu1  ;;  %v3776_v53 = vld [vmem:[%s8898_s12 + $0x58] sm:$0xff] }
 0xa63   : > { %v3679_v21 = vpop.f32.mrb[79].mxu1 }
 0xa64   : > { %3731 = vrot.lane.b32.xlu0 %v3679_v21, %s6930_s17 }
 0xa66   : > { %3733 = vrot.lane.b32.xlu1 %v6387_v30, %s6930_s17 }
 0xabc   : > { %v3706_v17 = vpop.permute.xlu1 %3705 }
 0xabd   : > { %v3750_v36 = vsel %vm2963_vm8, %v8161_v9, %v3706_v17 }
 0xabe   : > { %v3780_v57 = vadd.f32 %v3765_v55, %v3750_v36  ;;  %v3708_v58 = vpop.permute.xlu0 %3707  ;;  %v3777_v36 = vld [vmem:[%s8898_s12 + $0x60] sm:$0xff] }
 0xabf   : > { %v3751_v19 = vsel %vm2963_vm8, %v3281_v12, %v3708_v58  ;;  %v3772_v12 = vld [vmem:[%s8898_s12 + $0x38] sm:$0xff] }
 0xac0   : > { %v3781_v60 = vadd.f32 %v3766_v56, %v3751_v19  ;;  %v3710_v23 = vpop.permute.xlu1 %3709  ;;  %v3795_v62 = vmax.f32 %v3780_v57, 0.0  ;;  %v3778_v19 = vld [vmem:[%s8898_s12 + $0x68] sm:$0xff] }
 0xac1   : > { %v3752_v37 = vsel %vm2963_vm8, %v8159_v8, %v3710_v23 }
 0xac2   : > { %v3796_v43 = vmax.f32 %v3781_v60, 0.0  ;;  %v3782_v63 = vadd.f32 %v3767_v59, %v3752_v37  ;;  %v3712_v0 = vpop.permute.xlu0 %3711 }
 0xac3   : > { %v3753_v1 = vsel %vm2963_vm8, %v8175_v27, %v3712_v0 }
 0xac4   : > { %v3783_v35 = vadd.f32 %v3768_v61, %v3753_v1  ;;  %v3714_v20 = vpop.permute.xlu1 %3713  ;;  %v3810_v29 = vpack.c.bf16 %v3796_v43, %v3795_v62  ;;  %v3797_v5 = vmax.f32 %v3782_v63, 0.0  ;;  %v3779_v61 = vld [vmem:[%s8898_s12 + $0x70] sm:$0xff] }
 0xac5   : > { %v3754_v3 = vsel %vm2963_vm8, %v8182_v14, %v3714_v20 }
 0xac6   : > { %v3798_v6 = vmax.f32 %v3783_v35, 0.0  ;;  %v3784_v7 = vadd.f32 %v3769_v2, %v3754_v3  ;;  %6405 = vmatprep.mubr.bf16.mxu0 %v3810_v29  ;;  %v3716_v8 = vpop.permute.xlu0 %3715 }
 0xac7   : > { %v3755_v9 = vsel %vm2963_vm8, %v8189_v39, %v3716_v8 }
 0xac8   : > { %v3811_v11 = vpack.c.bf16 %v3798_v6, %v3797_v5  ;;  %v3785_v24 = vadd.f32 %v3770_v4, %v3755_v9  ;;  %v3718_v25 = vpop.permute.xlu1 %3717  ;;  %v3799_v13 = vmax.f32 %v3784_v7, 0.0 }
 0xac9   : > { %v3756_v27 = vsel %vm2963_vm8, %v8180_v32, %v3718_v25 }
 0xaca   : > { %v3800_v14 = vmax.f32 %v3785_v24, 0.0  ;;  %v3786_v22 = vadd.f32 %v3771_v10, %v3756_v27  ;;  %6406 = vmatmul.mubr.bf16.vlgmr.msra.gmra.mrb[96].mxu0 %v3811_v11  ;;  %v3720_v40 = vpop.permute.xlu0 %3719 }
 0xacb   : > { %v3757_v39 = vsel %vm2963_vm8, %v8187_v38, %v3720_v40 }
 0xacc   : > { %v3787_v42 = vadd.f32 %v3772_v12, %v3757_v39  ;;  %v3722_v26 = vpop.permute.xlu1 %3721  ;;  %v3812_v34 = vpack.c.bf16 %v3800_v14, %v3799_v13  ;;  %v3801_v47 = vmax.f32 %v3786_v22, 0.0 }
 0xacd   : > { %v3758_v32 = vsel %vm2963_vm8, %v8195_v45, %v3722_v26 }
 0xace   : > { %v3802_v48 = vmax.f32 %v3787_v42, 0.0  ;;  %v3788_v15 = vadd.f32 %v3773_v41, %v3758_v32  ;;  %6409 = vmatprep.mubr.bf16.mxu0 %v3812_v34  ;;  %v3724_v18 = vpop.permute.xlu0 %3723 }
 0xacf   : > { %v3759_v38 = vsel %vm2963_vm8, %v8200_v16, %v3724_v18  ;;  %v6872_v18 = vld [vmem:[%s8899_s13 + $0x18] sm:$0xff]  }
 0xad0   : > { %v3789_v52 = vadd.f32 %v3774_v46, %v3759_v38  ;;  %v3726_v33 = vpop.permute.xlu1 %3725  ;;  %v3813_v30 = vpack.c.bf16 %v3802_v48, %v3801_v47  ;;  %v3803_v54 = vmax.f32 %v3788_v15, 0.0  ;;  %v6869_v47 = vld [vmem:[%s8899_s13] sm:$0xff]   ;;  %v6870_v48 = vld [vmem:[%s8899_s13 + $0x8] sm:$0xff]   ;;  %v6871_v15 = vld [vmem:[%s8899_s13 + $0x10] sm:$0xff]  }
 0xad1   : > { %v3760_v45 = vsel %vm2963_vm8, %v8192_v44, %v3726_v33  ;;  %v6873_v38 = vld [vmem:[%s8899_s13 + $0x20] sm:$0xff]   ;;  %v6876_v33 = vld [vmem:[%s8899_s13 + $0x38] sm:$0xff]  }
 0xad2   : > { %v3804_v21 = vmax.f32 %v3789_v52, 0.0  ;;  %v3790_v55 = vadd.f32 %v3775_v51, %v3760_v45  ;;  %6410 = vmatmul.mubr.bf16.gmra.mrb[100].mxu0 %v3813_v30  ;;  %v3728_v17 = vpop.permute.xlu0 %3727  ;;  %v6874_v51 = vld [vmem:[%s8899_s13 + $0x28] sm:$0xff]   ;;  %v6875_v52 = vld [vmem:[%s8899_s13 + $0x30] sm:$0xff]   ;;  %v6877_v30 = vld [vmem:[%s8899_s13 + $0x40] sm:$0xff]  }
 0xad3   : > { %v3761_v16 = vsel %vm2963_vm8, %v8197_v31, %v3728_v17  ;;  %v6878_v45 = vld [vmem:[%s8899_s13 + $0x48] sm:$0xff]  }
 0xad4   : > { %v3791_v56 = vadd.f32 %v3776_v53, %v3761_v16  ;;  %v3730_v57 = vpop.permute.xlu1 %3729  ;;  %v3814_v58 = vpack.c.bf16 %v3804_v21, %v3803_v54  ;;  %v3805_v59 = vmax.f32 %v3790_v55, 0.0  ;;  %v6879_v53 = vld [vmem:[%s8899_s13 + $0x50] sm:$0xff]   ;;  %v6880_v21 = vld [vmem:[%s8899_s13 + $0x58] sm:$0xff]   ;;  %v6881_v16 = vld [vmem:[%s8899_s13 + $0x60] sm:$0xff]  }
 0xad5   : > { %v3762_v44 = vsel %vm2963_vm8, %v8207_v49, %v3730_v57  ;;  %v6882_v57 = vld [vmem:[%s8899_s13 + $0x68] sm:$0xff]  }
 0xad6   : > { %v3806_v60 = vmax.f32 %v3791_v56, 0.0  ;;  %v3792_v23 = vadd.f32 %v3777_v36, %v3762_v44  ;;  %6413 = vmatprep.mubr.bf16.mxu0 %v3814_v58  ;;  %v3732_v37 = vpop.permute.xlu0 %3731 }
 0xad7   : > { %v3763_v31 = vsel %vm2963_vm8, %v8210_v50, %v3732_v37  ;;  %v6931_v50 = vmov 0.0   ;;  %v6885_v37 = vld [vmem:[%s8899_s13 + $0x74] sm:$0xff]  }
 0xad8   : > { %v3793_v62 = vadd.f32 %v3778_v19, %v3763_v31  ;;  %v3734_v43 = vpop.permute.xlu1 %3733  ;;  %v3815_v63 = vpack.c.bf16 %v3806_v60, %v3805_v59  ;;  %v3807_v0 = vmax.f32 %v3792_v23, 0.0  ;;  %6421 = vmatprep.subr.bf16.mxu0 %v6931_v50  ;;  %6497 = vmatprep.subr.bf16.mxu1 %v6931_v50  ;;  %v6883_v59 = vld [vmem:[%s8899_s13 + $0x70] ss:$0 sps:$4 sm:$0xff]   ;;  %v6884_v23 = vld [vmem:[%s8899_s13 + $0xe8] sm:$0xff]  }
 0xad9   : > { %v3764_v49 = vsel %vm2963_vm8, %v8204_v28, %v3734_v43  ;;  %6513 = vmatprep.mubr.msk.bf16.mxu1 %vm6932_vm10, %v6931_v50  ;;  %v6886_v31 = vld [vmem:[%s8899_s13 + $0xf0] sm:$0xff]   ;;  %v6889_v43 = vld [vmem:[%s8899_s13 + $0x84] sm:$0xff]  }
 0xada   : > { %v3808_v1 = vmax.f32 %v3793_v62, 0.0  ;;  %v3794_v2 = vadd.f32 %v3779_v61, %v3764_v49  ;;  %6414 = vmatmul.mubr.bf16.gmra.mrb[104].mxu0 %v3815_v63  ;;  %v6887_v61 = vld [vmem:[%s8899_s13 + $0x7c] sm:$0xff]   ;;  %v6891_v49 = vld [vmem:[%s8899_s13 + $0x8c] sm:$0xff]  }
 0xadb   : > { %v6888_v62 = vld [vmem:[%s8899_s13 + $0xf8] sm:$0xff]   ;;  %v6890_v63 = vld [vmem:[%s8899_s13 + $0x100] sm:$0xff]  }
 0xadc   : > { %v3809_v35 = vmax.f32 %v3794_v2, 0.0  ;;  %v3816_v20 = vpack.c.bf16 %v3808_v1, %v3807_v0  ;;  %v6892_v0 = vld [vmem:[%s8899_s13 + $0x108] sm:$0xff]   ;;  %v6893_v1 = vld [vmem:[%s8899_s13 + $0x94] sm:$0xff]  }
 0xadd   : > { %v6894_v2 = vld [vmem:[%s8899_s13 + $0x110] sm:$0xff]  }
 0xade   : > { %6417 = vmatprep.mubr.bf16.mxu0 %v3816_v20  ;;  %v3817_v29 = vpack.c.bf16 %v3809_v35, %v3809_v35  ;;  %v6895_v35 = vld [vmem:[%s8899_s13 + $0x9c] sm:$0xff]  }
 0xadf   : > { %v6896_v20 = vld [vmem:[%s8899_s13 + $0x118] sm:$0xff]  }
 0xae2   : > { %6418 = vmatmul.mubr.bf16.gmra.mrb[108].mxu0 %v3817_v29  ;;  %v6897_v29 = vld [vmem:[%s8899_s13 + $0xa4] sm:$0xff]  }
 0xae3   : > { %6437 = vmatprep.mubr.msk.bf16.mxu0 %vm6932_vm10, %v6931_v50 }
 0xb9d   : > { %v6407_v28 = vpop.f32.mrb[96].mxu0 }
 0xb9e   : > { %v3916_v3 = vpop.f32.mrb[97].mxu0 }
 0xb9f   : > { %v6408_v4 = vpop.f32.mrb[98].mxu0 }
 0xba0   : > { %v8300_v5 = vpack.c.bf16 %v6408_v4, %v6407_v28  ;;  %v3919_v6 = vpop.f32.mrb[99].mxu0  ;;  %v6898_v28 = vld [vmem:[%s8899_s13 + $0x120] sm:$0xff]   ;;  %v6900_v4 = vld [vmem:[%s8899_s13 + $0x128] sm:$0xff]  }
 0xba1   : > { %v8302_v7 = vpack.c.bf16 %v3919_v6, %v3916_v3  ;;  %v6899_v3 = vld [vmem:[%s8899_s13 + $0xac] sm:$0xff]  }
 0xba2   : > { %3996 = vrot.lane.b32.xlu1 %v8300_v5, %s6922_s26  ;;  %v6902_v6 = vld [vmem:[%s8899_s13 + $0x130] sm:$0xff]  }
 0xba3   : > { %6422 = vmatpush3.bf16.msra.mxu0 %v8302_v7  ;;  %3994 = vrot.lane.b32.xlu0 %v8302_v7, %s6922_s26 }
 0xba4   : > { %6423 = vmatprep.subr.bf16.mxu0 %v6931_v50 }
 0xba5   : > { %v6411_v8 = vpop.f32.mrb[100].mxu0 }
 0xba6   : > { %v3932_v9 = vpop.f32.mrb[101].mxu0 }
 0xba7   : > { %v6412_v10 = vpop.f32.mrb[102].mxu0  ;;  %6424 = vmatpush3.bf16.msra.mxu0 %v8300_v5 }
 0xba8   : > { %v8311_v11 = vpack.c.bf16 %v6412_v10, %v6411_v8  ;;  %v3935_v24 = vpop.f32.mrb[103].mxu0  ;;  %6425 = vmatprep.subr.bf16.mxu0 %v6931_v50  ;;  %v6904_v8 = vld [vmem:[%s8899_s13 + $0x138] sm:$0xff]   ;;  %v6906_v10 = vld [vmem:[%s8899_s13 + $0x140] sm:$0xff]  }
 0xba9   : > { %v8314_v25 = vpack.c.bf16 %v3935_v24, %v3932_v9  ;;  %v6905_v9 = vld [vmem:[%s8899_s13 + $0xc4] sm:$0xff]  }
 0xbaa   : > { %4000 = vrot.lane.b32.xlu1 %v8311_v11, %s6922_s26  ;;  %v6908_v24 = vld [vmem:[%s8899_s13 + $0x148] sm:$0xff]  }
 0xbab   : > { %6426 = vmatpush3.bf16.msra.mxu0 %v8314_v25  ;;  %3998 = vrot.lane.b32.xlu0 %v8314_v25, %s6922_s26 }
 0xbac   : > { %6427 = vmatprep.subr.bf16.mxu0 %v6931_v50 }
 0xbad   : > { %v6415_v27 = vpop.f32.mrb[104].mxu0 }
 0xbae   : > { %v3948_v12 = vpop.f32.mrb[105].mxu0 }
 0xbaf   : > { %v6416_v13 = vpop.f32.mrb[106].mxu0  ;;  %6428 = vmatpush3.bf16.msra.mxu0 %v8311_v11 }
 0xbb0   : > { %v8323_v14 = vpack.c.bf16 %v6416_v13, %v6415_v27  ;;  %v3951_v22 = vpop.f32.mrb[107].mxu0  ;;  %6429 = vmatprep.subr.bf16.mxu0 %v6931_v50 }
 0xbb1   : > { %v8326_v40 = vpack.c.bf16 %v3951_v22, %v3948_v12  ;;  %v4928_v12 = vld [vmem:[%s8900_s14 + $0x10] sm:$0xff] }
 0xbb2   : > { %4004 = vrot.lane.b32.xlu1 %v8323_v14, %s6922_s26 }
 0xbb3   : > { %6430 = vmatpush3.bf16.msra.mxu0 %v8326_v40  ;;  %4002 = vrot.lane.b32.xlu0 %v8326_v40, %s6922_s26 }
 0xbb4   : > { %6431 = vmatprep.subr.bf16.mxu0 %v6931_v50 }
 0xbb5   : > { %v6419_v39 = vpop.f32.mrb[108].mxu0 }
 0xbb6   : > { %v3985_v41 = vpack.c.bf16 %v6419_v39, %v6419_v39  ;;  %v3964_v42 = vpop.f32.mrb[109].mxu0 }
 0xbb7   : > { %v6420_v26 = vpop.f32.mrb[110].mxu0  ;;  %6432 = vmatpush3.bf16.msra.mxu0 %v8323_v14 }
 0xbb8   : > { %4008 = vrot.lane.b32.xlu1 %v3985_v41, %s6922_s26  ;;  %v3967_v34 = vpop.f32.mrb[111].mxu0  ;;  %6433 = vmatprep.subr.bf16.mxu0 %v6931_v50  ;;  %v8344_v46 = vsel %vm1482_vm4, %v3985_v41, 0  ;;  %v4930_v26 = vld [vmem:[%s8900_s14 + $0x20] sm:$0xff] }
 0xbb9   : > { %v8337_v32 = vpack.c.bf16 %v3967_v34, %v3964_v42  ;;  %v6910_v42 = vld [vmem:[%s8899_s13 + $0x150] sm:$0xff]  }
 0xbbb   : > { %4006 = vrot.lane.b32.xlu0 %v8337_v32, %s6922_s26  ;;  %6434 = vmatpush3.bf16.msra.mxu0 %v8337_v32 }
 0xbbc   : > { %6435 = vmatprep.subr.bf16.mxu0 %v6931_v50 }
 0xbbf   : > { %6436 = vmatpush3.bf16.msra.mxu0 %v8344_v46 }
 0xbc0   : > { %6573 = vmatprep.subr.bf16.mxu0 %v6931_v50 }
 0xbc2   : > { %6438 = vmatmul.mubr.msk.bf16.vlgmr.msra.gmra.mrb[112].mxu0 %vm1457_vm3, %v6869_v47  ;;  %v6911_v47 = vld [vmem:[%s8899_s13 + $0xdc] sm:$0xff]  }
 0xbc3   : > { %6574 = vmatpush3.bf16.msra.mxu0 %v8302_v7  ;;  %6441 = vmatprep.mubr.msk.bf16.mxu0 %vm6932_vm10, %v6931_v50 }
 0xbc4   : > { %6575 = vmatprep.subr.bf16.mxu0 %v6931_v50 }
 0xbc7   : > { %6576 = vmatpush3.bf16.msra.mxu0 %v8300_v5 }
 0xbc8   : > { %6577 = vmatprep.subr.bf16.mxu0 %v6931_v50 }
 0xbca   : > { %6442 = vmatmul.mubr.msk.bf16.gmra.mrb[116].mxu0 %vm1457_vm3, %v6870_v48 }
 0xbcb   : > { %6578 = vmatpush3.bf16.msra.mxu0 %v8314_v25  ;;  %6445 = vmatprep.mubr.msk.bf16.mxu0 %vm6932_vm10, %v6931_v50 }
 0xbcc   : > { %6579 = vmatprep.subr.bf16.mxu0 %v6931_v50 }
 0xbcf   : > { %6580 = vmatpush3.bf16.msra.mxu0 %v8311_v11 }
 0xbd0   : > { %6581 = vmatprep.subr.bf16.mxu0 %v6931_v50 }
 0xbd2   : > { %6446 = vmatmul.mubr.msk.bf16.gmra.mrb[120].mxu0 %vm1457_vm3, %v6871_v15 }
 0xbd3   : > { %6582 = vmatpush3.bf16.msra.mxu0 %v8326_v40  ;;  %6449 = vmatprep.mubr.msk.bf16.mxu0 %vm6932_vm10, %v6931_v50 }
 0xbd4   : > { %6583 = vmatprep.subr.bf16.mxu0 %v6931_v50 }
 0xbd7   : > { %6584 = vmatpush3.bf16.msra.mxu0 %v8323_v14 }
 0xbd8   : > { %6585 = vmatprep.subr.bf16.mxu0 %v6931_v50 }
 0xbda   : > { %6450 = vmatmul.mubr.msk.bf16.gmra.mrb[124].mxu0 %vm1457_vm3, %v6872_v18 }
 0xbdb   : > { %6586 = vmatpush3.bf16.msra.mxu0 %v8337_v32  ;;  %6453 = vmatprep.mubr.msk.bf16.mxu0 %vm6932_vm10, %v6931_v50 }
 0xbdc   : > { %6587 = vmatprep.subr.bf16.mxu0 %v6931_v50 }
 0xbdf   : > { %6588 = vmatpush3.bf16.msra.mxu0 %v8344_v46 }
 0xbe2   : > { %6454 = vmatmul.mubr.msk.bf16.gmra.mrb[128].mxu0 %vm1457_vm3, %v6873_v38 }
 0xbe3   : > { %6457 = vmatprep.mubr.msk.bf16.mxu0 %vm6932_vm10, %v6931_v50 }
 0xbea   : > { %6458 = vmatmul.mubr.msk.bf16.gmra.mrb[132].mxu0 %vm1457_vm3, %v6874_v51  ;;  %v6912_v51 = vld [vmem:[%s8899_s13 + $0x158] ss:$0 sps:$4 sm:$0xff]  }
 0xbeb   : > { %6461 = vmatprep.mubr.msk.bf16.mxu0 %vm6932_vm10, %v6931_v50 }
 0xbf2   : > { %6462 = vmatmul.mubr.msk.bf16.gmra.mrb[136].mxu0 %vm1457_vm3, %v6875_v52  ;;  %v4934_v52 = vld [vmem:[%s8900_s14 + $0x40] sm:$0xff] }
 0xbf3   : > { %6465 = vmatprep.mubr.msk.bf16.mxu0 %vm6932_vm10, %v6931_v50 }
 0xbfa   : > { %6466 = vmatmul.mubr.msk.bf16.gmra.mrb[140].mxu0 %vm1457_vm3, %v6876_v33 }
 0xbfb   : > { %6469 = vmatprep.mubr.msk.bf16.mxu0 %vm6932_vm10, %v6931_v50 }
 0xc02   : > { %6470 = vmatmul.mubr.msk.bf16.gmra.mrb[144].mxu0 %vm1457_vm3, %v6877_v30  ;;  %v4936_v30 = vld [vmem:[%s8900_s14 + $0x50] sm:$0xff] }
 0xc03   : > { %6473 = vmatprep.mubr.msk.bf16.mxu0 %vm6932_vm10, %v6931_v50 }
 0xc0a   : > { %6474 = vmatmul.mubr.msk.bf16.gmra.mrb[148].mxu0 %vm1457_vm3, %v6878_v45 }
 0xc0b   : > { %6477 = vmatprep.mubr.msk.bf16.mxu0 %vm6932_vm10, %v6931_v50 }
 0xc12   : > { %6478 = vmatmul.mubr.msk.bf16.gmra.mrb[152].mxu0 %vm1457_vm3, %v6879_v53 }
 0xc13   : > { %6481 = vmatprep.mubr.msk.bf16.mxu0 %vm6932_vm10, %v6931_v50 }
 0xc14   : > { %v3997_v55 = vpop.permute.xlu1 %3996 }
 0xc15   : > { %v3995_v54 = vpop.permute.xlu0 %3994 }
 0xc16   : > { %6498 = vmatpush3.bf16.msra.mxu1 %v3995_v54 }
 0xc17   : > { %6499 = vmatprep.subr.bf16.mxu1 %v6931_v50 }
 0xc1a   : > { %6482 = vmatmul.mubr.msk.bf16.gmra.mrb[156].mxu0 %vm1457_vm3, %v6880_v21  ;;  %6500 = vmatpush3.bf16.msra.mxu1 %v3997_v55 }
 0xc1b   : > { %6501 = vmatprep.subr.bf16.mxu1 %v6931_v50  ;;  %6485 = vmatprep.mubr.msk.bf16.mxu0 %vm6932_vm10, %v6931_v50 }
 0xc1c   : > { %v4001_v36 = vpop.permute.xlu1 %4000 }
 0xc1d   : > { %v3999_v17 = vpop.permute.xlu0 %3998 }
 0xc1e   : > { %6502 = vmatpush3.bf16.msra.mxu1 %v3999_v17  ;;  %v6913_v17 = vld [vmem:[%s8899_s13 + $0xe4] ss:$0 sps:$4 sm:$0xff]  }
 0xc1f   : > { %6503 = vmatprep.subr.bf16.mxu1 %v6931_v50 }
 0xc22   : > { %6486 = vmatmul.mubr.msk.bf16.gmra.mrb[160].mxu0 %vm1457_vm3, %v6881_v16  ;;  %6504 = vmatpush3.bf16.msra.mxu1 %v4001_v36  ;;  %v4938_v16 = vld [vmem:[%s8900_s14 + $0x60] sm:$0xff] }
 0xc23   : > { %6505 = vmatprep.subr.bf16.mxu1 %v6931_v50  ;;  %6489 = vmatprep.mubr.msk.bf16.mxu0 %vm6932_vm10, %v6931_v50 }
 0xc24   : > { %v4005_v58 = vpop.permute.xlu1 %4004 }
 0xc25   : > { %v4003_v56 = vpop.permute.xlu0 %4002 }
 0xc26   : > { %6506 = vmatpush3.bf16.msra.mxu1 %v4003_v56 }
 0xc27   : > { %6507 = vmatprep.subr.bf16.mxu1 %v6931_v50 }
 0xc2a   : > { %6490 = vmatmul.mubr.msk.bf16.gmra.mrb[164].mxu0 %vm1457_vm3, %v6882_v57  ;;  %6508 = vmatpush3.bf16.msra.mxu1 %v4005_v58  ;;  %v4009_v19 = vpop.permute.xlu1 %4008 }
 0xc2b   : > { %6509 = vmatprep.subr.bf16.mxu1 %v6931_v50  ;;  %6493 = vmatprep.mubr.msk.bf16.mxu0 %vm6932_vm10, %v6931_v50  ;;  %v4504_v60 = vsel %vm1482_vm4, %v4009_v19, 0 }
 0xc2d   : > { %v4007_v44 = vpop.permute.xlu0 %4006 }
 0xc2e   : > { %6510 = vmatpush3.bf16.msra.mxu1 %v4007_v44 }
 0xc2f   : > { %6511 = vmatprep.subr.bf16.mxu1 %v6931_v50 }
 0xc32   : > { %6494 = vmatmul.mubr.msk.bf16.gmra.mrb[168].mxu0 %vm1457_vm3, %v6883_v59  ;;  %6512 = vmatpush3.bf16.msra.mxu1 %v4504_v60  ;;  %v4942_v59 = vld [vmem:[%s8900_s14 + $0x80] sm:$0xff] }
 0xc33   : > { %6649 = vmatprep.subr.bf16.mxu1 %v6931_v50  ;;  %6589 = vmatprep.mubr.msk.bf16.mxu0 %vm6932_vm10, %v6931_v50 }
 0xc35   : > { %6514 = vmatmul.mubr.msk.bf16.vlgmr.msra.gmra.mrb[80].mxu1 %vm1457_vm3, %v6884_v23  ;;  %v4944_v23 = vld [vmem:[%s8900_s14 + $0x90] sm:$0xff] }
 0xc36   : > { %6657 = vmatpush3.bf16.msra.mxu1 %v8302_v7  ;;  %6517 = vmatprep.mubr.msk.bf16.mxu1 %vm6932_vm10, %v6931_v50  ;;  %v6903_v7 = vld [vmem:[%s8899_s13 + $0xbc] sm:$0xff]  }
 0xc37   : > { %6650 = vmatprep.subr.bf16.mxu1 %v6931_v50 }
 0xc3a   : > { %6658 = vmatpush3.bf16.msra.mxu1 %v8300_v5  ;;  %6590 = vmatmul.mubr.msk.bf16.vlgmr.msra.gmra.mrb[172].mxu0 %vm1457_vm3, %v6885_v37  ;;  %v6901_v5 = vld [vmem:[%s8899_s13 + $0xb4] sm:$0xff]  }
 0xc3b   : > { %6651 = vmatprep.subr.bf16.mxu1 %v6931_v50  ;;  %6593 = vmatprep.mubr.msk.bf16.mxu0 %vm6932_vm10, %v6931_v50 }
 0xc3d   : > { %6518 = vmatmul.mubr.msk.bf16.gmra.mrb[84].mxu1 %vm1457_vm3, %v6886_v31 }
 0xc3e   : > { %6659 = vmatpush3.bf16.msra.mxu1 %v8314_v25  ;;  %6521 = vmatprep.mubr.msk.bf16.mxu1 %vm6932_vm10, %v6931_v50  ;;  %v4926_v25 = vld [vmem:[%s8900_s14] sm:$0xff] }
 0xc3f   : > { %6652 = vmatprep.subr.bf16.mxu1 %v6931_v50 }
 0xc42   : > { %6660 = vmatpush3.bf16.msra.mxu1 %v8311_v11  ;;  %6594 = vmatmul.mubr.msk.bf16.gmra.mrb[176].mxu0 %vm1457_vm3, %v6887_v61  ;;  %v6907_v11 = vld [vmem:[%s8899_s13 + $0xcc] sm:$0xff]  }
 0xc43   : > { %6653 = vmatprep.subr.bf16.mxu1 %v6931_v50  ;;  %6597 = vmatprep.mubr.msk.bf16.mxu0 %vm6932_vm10, %v6931_v50 }
 0xc45   : > { %6522 = vmatmul.mubr.msk.bf16.gmra.mrb[88].mxu1 %vm1457_vm3, %v6888_v62 }
 0xc46   : > { %6661 = vmatpush3.bf16.msra.mxu1 %v8326_v40  ;;  %6525 = vmatprep.mubr.msk.bf16.mxu1 %vm6932_vm10, %v6931_v50 }
 0xc47   : > { %6654 = vmatprep.subr.bf16.mxu1 %v6931_v50 }
 0xc4a   : > { %6662 = vmatpush3.bf16.msra.mxu1 %v8323_v14  ;;  %6598 = vmatmul.mubr.msk.bf16.gmra.mrb[180].mxu0 %vm1457_vm3, %v6889_v43  ;;  %v6909_v14 = vld [vmem:[%s8899_s13 + $0xd4] sm:$0xff]  }
 0xc4b   : > { %6655 = vmatprep.subr.bf16.mxu1 %v6931_v50  ;;  %6601 = vmatprep.mubr.msk.bf16.mxu0 %vm6932_vm10, %v6931_v50 }
 0xc4d   : > { %6526 = vmatmul.mubr.msk.bf16.gmra.mrb[92].mxu1 %vm1457_vm3, %v6890_v63  ;;  %v4946_v63 = vld [vmem:[%s8900_s14 + $0xa0] sm:$0xff] }
 0xc4e   : > { %6663 = vmatpush3.bf16.msra.mxu1 %v8337_v32  ;;  %6529 = vmatprep.mubr.msk.bf16.mxu1 %vm6932_vm10, %v6931_v50  ;;  %v4932_v32 = vld [vmem:[%s8900_s14 + $0x30] sm:$0xff] }
 0xc4f   : > { %6656 = vmatprep.subr.bf16.mxu1 %v6931_v50 }
 0xc52   : > { %6664 = vmatpush3.bf16.msra.mxu1 %v8344_v46  ;;  %6602 = vmatmul.mubr.msk.bf16.gmra.mrb[184].mxu0 %vm1457_vm3, %v6891_v49 }
 0xc53   : > { %6605 = vmatprep.mubr.msk.bf16.mxu0 %vm6932_vm10, %v6931_v50 }
 0xc55   : > { %6530 = vmatmul.mubr.msk.bf16.gmra.mrb[96].mxu1 %vm1457_vm3, %v6892_v0  ;;  %v4948_v0 = vld [vmem:[%s8900_s14 + $0xb0] sm:$0xff] }
 0xc56   : > { %6533 = vmatprep.mubr.msk.bf16.mxu1 %vm6932_vm10, %v6931_v50 }
 0xc5a   : > { %6606 = vmatmul.mubr.msk.bf16.gmra.mrb[188].mxu0 %vm1457_vm3, %v6893_v1 }
 0xc5b   : > { %6609 = vmatprep.mubr.msk.bf16.mxu0 %vm6932_vm10, %v6931_v50 }
 0xc5d   : > { %6534 = vmatmul.mubr.msk.bf16.gmra.mrb[100].mxu1 %vm1457_vm3, %v6894_v2 }
 0xc5e   : > { %6537 = vmatprep.mubr.msk.bf16.mxu1 %vm6932_vm10, %v6931_v50 }
 0xc62   : > { %6610 = vmatmul.mubr.msk.bf16.gmra.mrb[192].mxu0 %vm1457_vm3, %v6895_v35 }
 0xc63   : > { %6613 = vmatprep.mubr.msk.bf16.mxu0 %vm6932_vm10, %v6931_v50 }
 0xc65   : > { %6538 = vmatmul.mubr.msk.bf16.gmra.mrb[104].mxu1 %vm1457_vm3, %v6896_v20 }
 0xc66   : > { %6541 = vmatprep.mubr.msk.bf16.mxu1 %vm6932_vm10, %v6931_v50 }
 0xc6a   : > { %6614 = vmatmul.mubr.msk.bf16.gmra.mrb[196].mxu0 %vm1457_vm3, %v6897_v29 }
 0xc6b   : > { %6617 = vmatprep.mubr.msk.bf16.mxu0 %vm6932_vm10, %v6931_v50 }
 0xc6d   : > { %6542 = vmatmul.mubr.msk.bf16.gmra.mrb[108].mxu1 %vm1457_vm3, %v6898_v28  ;;  %v4950_v28 = vld [vmem:[%s8900_s14 + $0xc0] sm:$0xff] }
 0xc6e   : > { %6545 = vmatprep.mubr.msk.bf16.mxu1 %vm6932_vm10, %v6931_v50 }
 0xc72   : > { %6618 = vmatmul.mubr.msk.bf16.gmra.mrb[200].mxu0 %vm1457_vm3, %v6899_v3 }
 0xc73   : > { %6621 = vmatprep.mubr.msk.bf16.mxu0 %vm6932_vm10, %v6931_v50 }
 0xc75   : > { %6546 = vmatmul.mubr.msk.bf16.gmra.mrb[112].mxu1 %vm1457_vm3, %v6900_v4  ;;  %v4952_v4 = vld [vmem:[%s8900_s14 + $0xd0] sm:$0xff] }
 0xc76   : > { %6549 = vmatprep.mubr.msk.bf16.mxu1 %vm6932_vm10, %v6931_v50 }
 0xc7a   : > { %6622 = vmatmul.mubr.msk.bf16.gmra.mrb[204].mxu0 %vm1457_vm3, %v6901_v5 }
 0xc7b   : > { %6625 = vmatprep.mubr.msk.bf16.mxu0 %vm6932_vm10, %v6931_v50 }
 0xc7d   : > { %6550 = vmatmul.mubr.msk.bf16.gmra.mrb[116].mxu1 %vm1457_vm3, %v6902_v6 }
 0xc7e   : > { %6553 = vmatprep.mubr.msk.bf16.mxu1 %vm6932_vm10, %v6931_v50 }
 0xc82   : > { %6626 = vmatmul.mubr.msk.bf16.gmra.mrb[208].mxu0 %vm1457_vm3, %v6903_v7 }
 0xc83   : > { %6629 = vmatprep.mubr.msk.bf16.mxu0 %vm6932_vm10, %v6931_v50 }
 0xc85   : > { %6554 = vmatmul.mubr.msk.bf16.gmra.mrb[120].mxu1 %vm1457_vm3, %v6904_v8 }
 0xc86   : > { %6557 = vmatprep.mubr.msk.bf16.mxu1 %vm6932_vm10, %v6931_v50 }
 0xc8a   : > { %6630 = vmatmul.mubr.msk.bf16.gmra.mrb[212].mxu0 %vm1457_vm3, %v6905_v9 }
 0xc8b   : > { %6633 = vmatprep.mubr.msk.bf16.mxu0 %vm6932_vm10, %v6931_v50 }
 0xc8d   : > { %6558 = vmatmul.mubr.msk.bf16.gmra.mrb[124].mxu1 %vm1457_vm3, %v6906_v10  ;;  %v4954_v10 = vld [vmem:[%s8900_s14 + $0xe0] sm:$0xff] }
 0xc8e   : > { %6561 = vmatprep.mubr.msk.bf16.mxu1 %vm6932_vm10, %v6931_v50 }
 0xc92   : > { %6634 = vmatmul.mubr.msk.bf16.gmra.mrb[216].mxu0 %vm1457_vm3, %v6907_v11 }
 0xc93   : > { %6637 = vmatprep.mubr.msk.bf16.mxu0 %vm6932_vm10, %v6931_v50 }
 0xc95   : > { %6562 = vmatmul.mubr.msk.bf16.gmra.mrb[128].mxu1 %vm1457_vm3, %v6908_v24  ;;  %v4209_v27 = vpop.f32.mrb[112].mxu0  ;;  %v4956_v24 = vld [vmem:[%s8900_s14 + $0xf0] sm:$0xff] }
 0xc96   : > { %v4982_v13 = vadd.f32 %v4926_v25, %v4209_v27  ;;  %v6439_v22 = vpop.f32.mrb[113].mxu0  ;;  %6565 = vmatprep.mubr.msk.bf16.mxu1 %vm6932_vm10, %v6931_v50 }
 0xc97   : > { %v4212_v40 = vpop.f32.mrb[114].mxu0  ;;  %v4958_v22 = vld [vmem:[%s8900_s14 + $0x100] sm:$0xff] }
 0xc98   : > { %5038 = vst [vmem:[%s8631_s20] sm:$0xff] %v4982_v13  ;;  %v4984_v39 = vadd.f32 %v4928_v12, %v4212_v40  ;;  %v6440_v41 = vpop.f32.mrb[115].mxu0 }
 0xc9a   : > { %6638 = vmatmul.mubr.msk.bf16.gmra.mrb[220].mxu0 %vm1457_vm3, %v6909_v14  ;;  %5040 = vst [vmem:[%s8631_s20 + $0x10] sm:$0xff] %v4984_v39  ;;  %v4960_v39 = vld [vmem:[%s8900_s14 + $0x110] sm:$0xff] }
 0xc9b   : > { %6641 = vmatprep.mubr.msk.bf16.mxu0 %vm6932_vm10, %v6931_v50 }
 0xc9d   : > { %6566 = vmatmul.mubr.msk.bf16.gmra.mrb[132].mxu1 %vm1457_vm3, %v6910_v42  ;;  %v4217_v34 = vpop.f32.mrb[116].mxu0 }
 0xc9e   : > { %v4986_v46 = vadd.f32 %v4930_v26, %v4217_v34  ;;  %v6443_v48 = vpop.f32.mrb[117].mxu0  ;;  %6569 = vmatprep.mubr.msk.bf16.mxu1 %vm6932_vm10, %v6931_v50 }
 0xc9f   : > { %v4220_v15 = vpop.f32.mrb[118].mxu0  ;;  %v4964_v48 = vld [vmem:[%s8900_s14 + $0x130] sm:$0xff] }
 0xca0   : > { %5042 = vst [vmem:[%s8631_s20 + $0x20] sm:$0xff] %v4986_v46  ;;  %v4988_v18 = vadd.f32 %v4932_v32, %v4220_v15  ;;  %v6444_v38 = vpop.f32.mrb[119].mxu0  ;;  %v4962_v46 = vld [vmem:[%s8900_s14 + $0x120] sm:$0xff] }
 0xca2   : > { %6642 = vmatmul.mubr.msk.bf16.gmra.mrb[224].mxu0 %vm1457_vm3, %v6911_v47  ;;  %5044 = vst [vmem:[%s8631_s20 + $0x30] sm:$0xff] %v4988_v18 }
 0xca5   : > { %6570 = vmatmul.mubr.msk.bf16.gmra.mrb[136].mxu1 %vm1457_vm3, %v6912_v51  ;;  %v4225_v33 = vpop.f32.mrb[120].mxu0 }
 0xca6   : > { %v4990_v45 = vadd.f32 %v4934_v52, %v4225_v33  ;;  %v6447_v53 = vpop.f32.mrb[121].mxu0  ;;  %6645 = vmatprep.mubr.msk.bf16.mxu1 %vm6932_vm10, %v6931_v50  ;;  %v4940_v50 = vld [vmem:[%s8900_s14 + $0x70] sm:$0xff]  ;;  %v4966_v33 = vld [vmem:[%s8900_s14 + $0x140] sm:$0xff] }
 0xca7   : > { %v4228_v54 = vpop.f32.mrb[122].mxu0 }
 0xca8   : > { %5046 = vst [vmem:[%s8631_s20 + $0x40] sm:$0xff] %v4990_v45  ;;  %v4992_v21 = vadd.f32 %v4936_v30, %v4228_v54  ;;  %v6448_v55 = vpop.f32.mrb[123].mxu0  ;;  %v4968_v45 = vld [vmem:[%s8900_s14 + $0x150] sm:$0xff] }
 0xcaa   : > { %5048 = vst [vmem:[%s8631_s20 + $0x50] sm:$0xff] %v4992_v21 }
 0xcad   : > { %6646 = vmatmul.mubr.msk.bf16.vlgmr.msra.gmra.mrb[140].mxu1 %vm1457_vm3, %v6913_v17  ;;  %v4233_v36 = vpop.f32.mrb[124].mxu0 }
 0xcae   : > { %v4994_v56 = vadd.f32 %v4938_v16, %v4233_v36  ;;  %v6451_v57 = vpop.f32.mrb[125].mxu0  ;;  %v4970_v16 = vld [vmem:[%s8900_s14 + $0x160] sm:$0xff] }
 0xcaf   : > { %v4236_v58 = vpop.f32.mrb[126].mxu0 }
 0xcb0   : > { %5050 = vst [vmem:[%s8631_s20 + $0x60] sm:$0xff] %v4994_v56  ;;  %v4996_v44 = vadd.f32 %v4940_v50, %v4236_v58  ;;  %v6452_v19 = vpop.f32.mrb[127].mxu0  ;;  %v4972_v50 = vld [vmem:[%s8900_s14 + $0x170] sm:$0xff] }
 0xcb2   : > { %5052 = vst [vmem:[%s8631_s20 + $0x70] sm:$0xff] %v4996_v44 }
 0xcb5   : > { %v4241_v60 = vpop.f32.mrb[128].mxu0 }
 0xcb6   : > { %v4998_v37 = vadd.f32 %v4942_v59, %v4241_v60  ;;  %v6455_v31 = vpop.f32.mrb[129].mxu0  ;;  %v4974_v59 = vld [vmem:[%s8900_s14 + $0x180] sm:$0xff] }
 0xcb7   : > { %v4244_v61 = vpop.f32.mrb[130].mxu0 }
 0xcb8   : > { %5054 = vst [vmem:[%s8631_s20 + $0x80] sm:$0xff] %v4998_v37  ;;  %v5000_v62 = vadd.f32 %v4944_v23, %v4244_v61  ;;  %v6456_v43 = vpop.f32.mrb[131].mxu0  ;;  %v4976_v23 = vld [vmem:[%s8900_s14 + $0x190] sm:$0xff] }
 0xcba   : > { %5056 = vst [vmem:[%s8631_s20 + $0x90] sm:$0xff] %v5000_v62 }
 0xcbd   : > { %v4249_v49 = vpop.f32.mrb[132].mxu0 }
 0xcbe   : > { %v5002_v1 = vadd.f32 %v4946_v63, %v4249_v49  ;;  %v6459_v2 = vpop.f32.mrb[133].mxu0  ;;  %v4978_v63 = vld [vmem:[%s8900_s14 + $0x1a0] sm:$0xff] }
 0xcbf   : > { %v4252_v35 = vpop.f32.mrb[134].mxu0 }
 0xcc0   : > { %5058 = vst [vmem:[%s8631_s20 + $0xa0] sm:$0xff] %v5002_v1  ;;  %v5004_v20 = vadd.f32 %v4948_v0, %v4252_v35  ;;  %v6460_v29 = vpop.f32.mrb[135].mxu0  ;;  %v4980_v0 = vld [vmem:[%s8900_s14 + $0x1b0] sm:$0xff] }
 0xcc2   : > { %5060 = vst [vmem:[%s8631_s20 + $0xb0] sm:$0xff] %v5004_v20 }
 0xcc5   : > { %v4257_v3 = vpop.f32.mrb[136].mxu0 }
 0xcc6   : > { %v5006_v5 = vadd.f32 %v4950_v28, %v4257_v3  ;;  %v6463_v6 = vpop.f32.mrb[137].mxu0 }
 0xcc7   : > { %v4260_v7 = vpop.f32.mrb[138].mxu0 }
 0xcc8   : > { %5062 = vst [vmem:[%s8631_s20 + $0xc0] sm:$0xff] %v5006_v5  ;;  %v5008_v8 = vadd.f32 %v4952_v4, %v4260_v7  ;;  %v6464_v9 = vpop.f32.mrb[139].mxu0 }
 0xcca   : > { %5064 = vst [vmem:[%s8631_s20 + $0xd0] sm:$0xff] %v5008_v8 }
 0xccd   : > { %v4265_v11 = vpop.f32.mrb[140].mxu0 }
 0xcce   : > { %v5010_v25 = vadd.f32 %v4954_v10, %v4265_v11  ;;  %v6467_v27 = vpop.f32.mrb[141].mxu0  ;;  %v4927_v11 = vld [vmem:[%s8900_s14 + $0x8] sm:$0xff] }
 0xccf   : > { %v4268_v12 = vpop.f32.mrb[142].mxu0 }
 0xcd0   : > { %5066 = vst [vmem:[%s8631_s20 + $0xe0] sm:$0xff] %v5010_v25  ;;  %v5012_v13 = vadd.f32 %v4956_v24, %v4268_v12  ;;  %v6468_v14 = vpop.f32.mrb[143].mxu0  ;;  %v4929_v12 = vld [vmem:[%s8900_s14 + $0x18] sm:$0xff] }
 0xcd2   : > { %5068 = vst [vmem:[%s8631_s20 + $0xf0] sm:$0xff] %v5012_v13 }
 0xcd5   : > { %v4273_v40 = vpop.f32.mrb[144].mxu0 }
 0xcd6   : > { %v5014_v41 = vadd.f32 %v4958_v22, %v4273_v40  ;;  %v6471_v42 = vpop.f32.mrb[145].mxu0 }
 0xcd7   : > { %v4276_v26 = vpop.f32.mrb[146].mxu0 }
 0xcd8   : > { %5070 = vst [vmem:[%s8631_s20 + $0x100] sm:$0xff] %v5014_v41  ;;  %v5016_v34 = vadd.f32 %v4960_v39, %v4276_v26  ;;  %v6472_v32 = vpop.f32.mrb[147].mxu0 }
 0xcd9   : > { %v4931_v32 = vld [vmem:[%s8900_s14 + $0x28] sm:$0xff] }
 0xcda   : > { %5072 = vst [vmem:[%s8631_s20 + $0x110] sm:$0xff] %v5016_v34 }
 0xcdd   : > { %v4281_v47 = vpop.f32.mrb[148].mxu0 }
 0xcde   : > { %v5018_v15 = vadd.f32 %v4962_v46, %v4281_v47  ;;  %v6475_v18 = vpop.f32.mrb[149].mxu0 }
 0xcdf   : > { %v4284_v38 = vpop.f32.mrb[150].mxu0 }
 0xce0   : > { %5074 = vst [vmem:[%s8631_s20 + $0x120] sm:$0xff] %v5018_v15  ;;  %v5020_v51 = vadd.f32 %v4964_v48, %v4284_v38  ;;  %v6476_v52 = vpop.f32.mrb[151].mxu0  ;;  %v4933_v15 = vld [vmem:[%s8900_s14 + $0x38] sm:$0xff] }
 0xce2   : > { %5076 = vst [vmem:[%s8631_s20 + $0x130] sm:$0xff] %v5020_v51 }
 0xce5   : > { %v4289_v30 = vpop.f32.mrb[152].mxu0 }
 0xce6   : > { %v5022_v53 = vadd.f32 %v4966_v33, %v4289_v30  ;;  %v6479_v54 = vpop.f32.mrb[153].mxu0 }
 0xce7   : > { %v4292_v21 = vpop.f32.mrb[154].mxu0 }
 0xce8   : > { %5078 = vst [vmem:[%s8631_s20 + $0x140] sm:$0xff] %v5022_v53  ;;  %v5024_v55 = vadd.f32 %v4968_v45, %v4292_v21  ;;  %v6480_v17 = vpop.f32.mrb[155].mxu0  ;;  %v4935_v21 = vld [vmem:[%s8900_s14 + $0x48] sm:$0xff] }
 0xcea   : > { %5080 = vst [vmem:[%s8631_s20 + $0x150] sm:$0xff] %v5024_v55 }
 0xced   : > { %v4297_v36 = vpop.f32.mrb[156].mxu0 }
 0xcee   : > { %v5026_v56 = vadd.f32 %v4970_v16, %v4297_v36  ;;  %v6483_v57 = vpop.f32.mrb[157].mxu0  ;;  %v4937_v36 = vld [vmem:[%s8900_s14 + $0x58] sm:$0xff] }
 0xcef   : > { %v4300_v58 = vpop.f32.mrb[158].mxu0 }
 0xcf0   : > { %5082 = vst [vmem:[%s8631_s20 + $0x160] sm:$0xff] %v5026_v56  ;;  %v5028_v44 = vadd.f32 %v4972_v50, %v4300_v58  ;;  %v6484_v19 = vpop.f32.mrb[159].mxu0 }
 0xcf2   : > { %5084 = vst [vmem:[%s8631_s20 + $0x170] sm:$0xff] %v5028_v44 }
 0xcf5   : > { %v4305_v60 = vpop.f32.mrb[160].mxu0 }
 0xcf6   : > { %v5030_v37 = vadd.f32 %v4974_v59, %v4305_v60  ;;  %v6487_v31 = vpop.f32.mrb[161].mxu0 }
 0xcf7   : > { %v4308_v61 = vpop.f32.mrb[162].mxu0 }
 0xcf8   : > { %5086 = vst [vmem:[%s8631_s20 + $0x180] sm:$0xff] %v5030_v37  ;;  %v5032_v62 = vadd.f32 %v4976_v23, %v4308_v61  ;;  %v6488_v43 = vpop.f32.mrb[163].mxu0  ;;  %v4939_v37 = vld [vmem:[%s8900_s14 + $0x68] sm:$0xff] }
 0xcf9   : > { %v4941_v43 = vld [vmem:[%s8900_s14 + $0x78] sm:$0xff] }
 0xcfa   : > { %5088 = vst [vmem:[%s8631_s20 + $0x190] sm:$0xff] %v5032_v62 }
 0xcfd   : > { %v4313_v49 = vpop.f32.mrb[164].mxu0 }
 0xcfe   : > { %v5034_v1 = vadd.f32 %v4978_v63, %v4313_v49  ;;  %v6491_v2 = vpop.f32.mrb[165].mxu0 }
 0xcff   : > { %v4316_v35 = vpop.f32.mrb[166].mxu0 }
 0xd00   : > { %5090 = vst [vmem:[%s8631_s20 + $0x1a0] sm:$0xff] %v5034_v1  ;;  %v5036_v20 = vadd.f32 %v4980_v0, %v4316_v35  ;;  %v6492_v29 = vpop.f32.mrb[167].mxu0 }
 0xd02   : > { %5092 = vst [vmem:[%s8631_s20 + $0x1b0] sm:$0xff] %v5036_v20 }
 0xd05   : > { %v4321_v28 = vpop.f32.mrb[168].mxu0 }
 0xd06   : > { %v6495_v3 = vpop.f32.mrb[169].mxu0 }
 0xd07   : > { %v4323_v4 = vpop.f32.mrb[170].mxu0  ;;  %v4943_v3 = vld [vmem:[%s8900_s14 + $0x88] sm:$0xff] }
 0xd08   : > { %v4540_v5 = vpop.f32.mrb[80].mxu1  ;;  %v6496_v6 = vpop.f32.mrb[171].mxu0 }
 0xd09   : > { %v6515_v7 = vpop.f32.mrb[81].mxu1 }
 0xd0a   : > { %v4543_v8 = vpop.f32.mrb[82].mxu1  ;;  %v4945_v7 = vld [vmem:[%s8900_s14 + $0x98] sm:$0xff] }
 0xd0b   : > { %v6516_v9 = vpop.f32.mrb[83].mxu1 }
 0xd0d   : > { %v4809_v10 = vpop.f32.mrb[172].mxu0 }
 0xd0e   : > { %v4810_v24 = vadd.f32 %v4809_v10, %v4540_v5  ;;  %v6591_v25 = vpop.f32.mrb[173].mxu0 }
 0xd0f   : > { %v4812_v27 = vpop.f32.mrb[174].mxu0 }
 0xd10   : > { %v4983_v13 = vadd.f32 %v4927_v11, %v4810_v24  ;;  %v4813_v14 = vadd.f32 %v4812_v27, %v4543_v8  ;;  %v4548_v22 = vpop.f32.mrb[84].mxu1  ;;  %v6592_v40 = vpop.f32.mrb[175].mxu0 }
 0xd11   : > { %v6519_v39 = vpop.f32.mrb[85].mxu1 }
 0xd12   : > { %5039 = vst [vmem:[%s8631_s20 + $0x8] sm:$0xff] %v4983_v13  ;;  %v4985_v41 = vadd.f32 %v4929_v12, %v4813_v14  ;;  %v4551_v42 = vpop.f32.mrb[86].mxu1  ;;  %v4947_v14 = vld [vmem:[%s8900_s14 + $0xa8] sm:$0xff] }
 0xd13   : > { %v6520_v26 = vpop.f32.mrb[87].mxu1 }
 0xd14   : > { %5041 = vst [vmem:[%s8631_s20 + $0x18] sm:$0xff] %v4985_v41  ;;  %v4949_v41 = vld [vmem:[%s8900_s14 + $0xb8] sm:$0xff] }
 0xd15   : > { %v4817_v34 = vpop.f32.mrb[176].mxu0 }
 0xd16   : > { %v4818_v46 = vadd.f32 %v4817_v34, %v4548_v22  ;;  %v6595_v47 = vpop.f32.mrb[177].mxu0 }
 0xd17   : > { %v4820_v48 = vpop.f32.mrb[178].mxu0 }
 0xd18   : > { %v4987_v18 = vadd.f32 %v4931_v32, %v4818_v46  ;;  %v4821_v38 = vadd.f32 %v4820_v48, %v4551_v42  ;;  %v4556_v51 = vpop.f32.mrb[88].mxu1  ;;  %v6596_v52 = vpop.f32.mrb[179].mxu0 }
 0xd19   : > { %v6523_v33 = vpop.f32.mrb[89].mxu1 }
 0xd1a   : > { %5043 = vst [vmem:[%s8631_s20 + $0x28] sm:$0xff] %v4987_v18  ;;  %v4989_v30 = vadd.f32 %v4933_v15, %v4821_v38  ;;  %v4559_v45 = vpop.f32.mrb[90].mxu1  ;;  %v4951_v38 = vld [vmem:[%s8900_s14 + $0xc8] sm:$0xff] }
 0xd1b   : > { %v6524_v53 = vpop.f32.mrb[91].mxu1 }
 0xd1c   : > { %5045 = vst [vmem:[%s8631_s20 + $0x38] sm:$0xff] %v4989_v30  ;;  %v4953_v30 = vld [vmem:[%s8900_s14 + $0xd8] sm:$0xff] }
 0xd1d   : > { %v4825_v54 = vpop.f32.mrb[180].mxu0 }
 0xd1e   : > { %v4826_v55 = vadd.f32 %v4825_v54, %v4556_v51  ;;  %v6599_v17 = vpop.f32.mrb[181].mxu0 }
 0xd1f   : > { %v4828_v16 = vpop.f32.mrb[182].mxu0 }
 0xd20   : > { %v4991_v50 = vadd.f32 %v4935_v21, %v4826_v55  ;;  %v4829_v56 = vadd.f32 %v4828_v16, %v4559_v45  ;;  %v4564_v57 = vpop.f32.mrb[92].mxu1  ;;  %v6600_v58 = vpop.f32.mrb[183].mxu0 }
 0xd21   : > { %v6527_v44 = vpop.f32.mrb[93].mxu1 }
 0xd22   : > { %5047 = vst [vmem:[%s8631_s20 + $0x48] sm:$0xff] %v4991_v50  ;;  %v4993_v19 = vadd.f32 %v4937_v36, %v4829_v56  ;;  %v4567_v59 = vpop.f32.mrb[94].mxu1  ;;  %v4955_v56 = vld [vmem:[%s8900_s14 + $0xe8] sm:$0xff] }
 0xd23   : > { %v6528_v60 = vpop.f32.mrb[95].mxu1 }
 0xd24   : > { %5049 = vst [vmem:[%s8631_s20 + $0x58] sm:$0xff] %v4993_v19  ;;  %v4957_v19 = vld [vmem:[%s8900_s14 + $0xf8] sm:$0xff] }
 0xd25   : > { %v4833_v23 = vpop.f32.mrb[184].mxu0 }
 0xd26   : > { %v4834_v31 = vadd.f32 %v4833_v23, %v4564_v57  ;;  %v6603_v61 = vpop.f32.mrb[185].mxu0 }
 0xd27   : > { %v4836_v62 = vpop.f32.mrb[186].mxu0 }
 0xd28   : > { %v4995_v63 = vadd.f32 %v4939_v37, %v4834_v31  ;;  %v4837_v49 = vadd.f32 %v4836_v62, %v4567_v59  ;;  %v4572_v0 = vpop.f32.mrb[96].mxu1  ;;  %v6604_v1 = vpop.f32.mrb[187].mxu0 }
 0xd29   : > { %v6531_v2 = vpop.f32.mrb[97].mxu1 }
 0xd2a   : > { %5051 = vst [vmem:[%s8631_s20 + $0x68] sm:$0xff] %v4995_v63  ;;  %v4997_v35 = vadd.f32 %v4941_v43, %v4837_v49  ;;  %v4575_v20 = vpop.f32.mrb[98].mxu1  ;;  %v4959_v49 = vld [vmem:[%s8900_s14 + $0x108] sm:$0xff] }
 0xd2b   : > { %v6532_v29 = vpop.f32.mrb[99].mxu1 }
 0xd2c   : > { %5053 = vst [vmem:[%s8631_s20 + $0x78] sm:$0xff] %v4997_v35  ;;  %v4961_v35 = vld [vmem:[%s8900_s14 + $0x118] sm:$0xff] }
 0xd2d   : > { %v4841_v28 = vpop.f32.mrb[188].mxu0 }
 0xd2e   : > { %v4842_v4 = vadd.f32 %v4841_v28, %v4572_v0  ;;  %v6607_v5 = vpop.f32.mrb[189].mxu0 }
 0xd2f   : > { %v4844_v6 = vpop.f32.mrb[190].mxu0 }
 0xd30   : > { %v4999_v8 = vadd.f32 %v4943_v3, %v4842_v4  ;;  %v4845_v9 = vadd.f32 %v4844_v6, %v4575_v20  ;;  %v4580_v10 = vpop.f32.mrb[100].mxu1  ;;  %v6608_v11 = vpop.f32.mrb[191].mxu0 }
 0xd31   : > { %v6535_v24 = vpop.f32.mrb[101].mxu1 }
 0xd32   : > { %5055 = vst [vmem:[%s8631_s20 + $0x88] sm:$0xff] %v4999_v8  ;;  %v5001_v25 = vadd.f32 %v4945_v7, %v4845_v9  ;;  %v4583_v27 = vpop.f32.mrb[102].mxu1  ;;  %v4963_v9 = vld [vmem:[%s8900_s14 + $0x128] sm:$0xff] }
 0xd33   : > { %v6536_v12 = vpop.f32.mrb[103].mxu1 }
 0xd34   : > { %5057 = vst [vmem:[%s8631_s20 + $0x98] sm:$0xff] %v5001_v25  ;;  %v4965_v25 = vld [vmem:[%s8900_s14 + $0x138] sm:$0xff] }
 0xd35   : > { %v4849_v13 = vpop.f32.mrb[192].mxu0 }
 0xd36   : > { %v4850_v22 = vadd.f32 %v4849_v13, %v4580_v10  ;;  %v6611_v40 = vpop.f32.mrb[193].mxu0 }
 0xd37   : > { %v4852_v39 = vpop.f32.mrb[194].mxu0 }
 0xd38   : > { %v5003_v42 = vadd.f32 %v4947_v14, %v4850_v22  ;;  %v4853_v26 = vadd.f32 %v4852_v39, %v4583_v27  ;;  %v4588_v34 = vpop.f32.mrb[104].mxu1  ;;  %v6612_v32 = vpop.f32.mrb[195].mxu0 }
 0xd39   : > { %v6539_v46 = vpop.f32.mrb[105].mxu1 }
 0xd3a   : > { %5059 = vst [vmem:[%s8631_s20 + $0xa8] sm:$0xff] %v5003_v42  ;;  %v5005_v47 = vadd.f32 %v4949_v41, %v4853_v26  ;;  %v4591_v48 = vpop.f32.mrb[106].mxu1  ;;  %v4967_v26 = vld [vmem:[%s8900_s14 + $0x148] sm:$0xff] }
 0xd3b   : > { %v6540_v15 = vpop.f32.mrb[107].mxu1 }
 0xd3c   : > { %5061 = vst [vmem:[%s8631_s20 + $0xb8] sm:$0xff] %v5005_v47  ;;  %v4969_v47 = vld [vmem:[%s8900_s14 + $0x158] sm:$0xff] }
 0xd3d   : > { %v4857_v18 = vpop.f32.mrb[196].mxu0 }
 0xd3e   : > { %v4858_v51 = vadd.f32 %v4857_v18, %v4588_v34  ;;  %v6615_v52 = vpop.f32.mrb[197].mxu0 }
 0xd3f   : > { %v4860_v33 = vpop.f32.mrb[198].mxu0 }
 0xd40   : > { %v5007_v45 = vadd.f32 %v4951_v38, %v4858_v51  ;;  %v4861_v53 = vadd.f32 %v4860_v33, %v4591_v48  ;;  %v4596_v54 = vpop.f32.mrb[108].mxu1  ;;  %v6616_v21 = vpop.f32.mrb[199].mxu0 }
 0xd41   : > { %v6543_v55 = vpop.f32.mrb[109].mxu1 }
 0xd42   : > { %5063 = vst [vmem:[%s8631_s20 + $0xc8] sm:$0xff] %v5007_v45  ;;  %v5009_v17 = vadd.f32 %v4953_v30, %v4861_v53  ;;  %v4599_v16 = vpop.f32.mrb[110].mxu1  ;;  %v4971_v53 = vld [vmem:[%s8900_s14 + $0x168] sm:$0xff] }
 0xd43   : > { %v6544_v36 = vpop.f32.mrb[111].mxu1 }
 0xd44   : > { %5065 = vst [vmem:[%s8631_s20 + $0xd8] sm:$0xff] %v5009_v17  ;;  %v4973_v17 = vld [vmem:[%s8900_s14 + $0x178] sm:$0xff] }
 0xd45   : > { %v4865_v50 = vpop.f32.mrb[200].mxu0 }
 0xd46   : > { %v4866_v57 = vadd.f32 %v4865_v50, %v4596_v54  ;;  %v6619_v58 = vpop.f32.mrb[201].mxu0 }
 0xd47   : > { %v4868_v44 = vpop.f32.mrb[202].mxu0 }
 0xd48   : > { %v5011_v59 = vadd.f32 %v4955_v56, %v4866_v57  ;;  %v4869_v60 = vadd.f32 %v4868_v44, %v4599_v16  ;;  %v4604_v23 = vpop.f32.mrb[112].mxu1  ;;  %v6620_v37 = vpop.f32.mrb[203].mxu0 }
 0xd49   : > { %v6547_v31 = vpop.f32.mrb[113].mxu1 }
 0xd4a   : > { %5067 = vst [vmem:[%s8631_s20 + $0xe8] sm:$0xff] %v5011_v59  ;;  %v5013_v61 = vadd.f32 %v4957_v19, %v4869_v60  ;;  %v4607_v62 = vpop.f32.mrb[114].mxu1  ;;  %v4975_v60 = vld [vmem:[%s8900_s14 + $0x188] sm:$0xff] }
 0xd4b   : > { %v6548_v43 = vpop.f32.mrb[115].mxu1 }
 0xd4c   : > { %5069 = vst [vmem:[%s8631_s20 + $0xf8] sm:$0xff] %v5013_v61  ;;  %v4977_v61 = vld [vmem:[%s8900_s14 + $0x198] sm:$0xff] }
 0xd4d   : > { %v4873_v63 = vpop.f32.mrb[204].mxu0 }
 0xd4e   : > { %v4874_v0 = vadd.f32 %v4873_v63, %v4604_v23  ;;  %v6623_v1 = vpop.f32.mrb[205].mxu0 }
 0xd4f   : > { %v4876_v2 = vpop.f32.mrb[206].mxu0 }
 0xd50   : > { %v5015_v20 = vadd.f32 %v4959_v49, %v4874_v0  ;;  %v4877_v29 = vadd.f32 %v4876_v2, %v4607_v62  ;;  %v4612_v28 = vpop.f32.mrb[116].mxu1  ;;  %v6624_v3 = vpop.f32.mrb[207].mxu0 }
 0xd51   : > { %v6551_v4 = vpop.f32.mrb[117].mxu1 }
 0xd52   : > { %5071 = vst [vmem:[%s8631_s20 + $0x108] sm:$0xff] %v5015_v20  ;;  %v5017_v5 = vadd.f32 %v4961_v35, %v4877_v29  ;;  %v4615_v6 = vpop.f32.mrb[118].mxu1  ;;  %v4979_v29 = vld [vmem:[%s8900_s14 + $0x1a8] sm:$0xff] }
 0xd53   : > { %v6552_v7 = vpop.f32.mrb[119].mxu1 }
 0xd54   : > { %5073 = vst [vmem:[%s8631_s20 + $0x118] sm:$0xff] %v5017_v5  ;;  %v4981_v5 = vld [vmem:[%s8900_s14 + $0x1b8] sm:$0xff] }
 0xd55   : > { %v4881_v8 = vpop.f32.mrb[208].mxu0 }
 0xd56   : > { %v4882_v10 = vadd.f32 %v4881_v8, %v4612_v28  ;;  %v6627_v11 = vpop.f32.mrb[209].mxu0 }
 0xd57   : > { %v4884_v24 = vpop.f32.mrb[210].mxu0 }
 0xd58   : > { %v5019_v27 = vadd.f32 %v4963_v9, %v4882_v10  ;;  %v4885_v12 = vadd.f32 %v4884_v24, %v4615_v6  ;;  %v4620_v13 = vpop.f32.mrb[120].mxu1  ;;  %v6628_v14 = vpop.f32.mrb[211].mxu0 }
 0xd59   : > { %v6555_v22 = vpop.f32.mrb[121].mxu1 }
 0xd5a   : > { %5075 = vst [vmem:[%s8631_s20 + $0x128] sm:$0xff] %v5019_v27  ;;  %v5021_v40 = vadd.f32 %v4965_v25, %v4885_v12  ;;  %v4623_v39 = vpop.f32.mrb[122].mxu1 }
 0xd5b   : > { %v6556_v41 = vpop.f32.mrb[123].mxu1 }
 0xd5c   : > { %5077 = vst [vmem:[%s8631_s20 + $0x138] sm:$0xff] %v5021_v40 }
 0xd5d   : > { %v4889_v42 = vpop.f32.mrb[212].mxu0 }
 0xd5e   : > { %v4890_v34 = vadd.f32 %v4889_v42, %v4620_v13  ;;  %v6631_v32 = vpop.f32.mrb[213].mxu0 }
 0xd5f   : > { %v4892_v46 = vpop.f32.mrb[214].mxu0 }
 0xd60   : > { %v5023_v48 = vadd.f32 %v4967_v26, %v4890_v34  ;;  %v4893_v15 = vadd.f32 %v4892_v46, %v4623_v39  ;;  %v4628_v18 = vpop.f32.mrb[124].mxu1  ;;  %v6632_v38 = vpop.f32.mrb[215].mxu0 }
 0xd61   : > { %v6559_v51 = vpop.f32.mrb[125].mxu1 }
 0xd62   : > { %5079 = vst [vmem:[%s8631_s20 + $0x148] sm:$0xff] %v5023_v48  ;;  %v5025_v52 = vadd.f32 %v4969_v47, %v4893_v15  ;;  %v4631_v33 = vpop.f32.mrb[126].mxu1 }
 0xd63   : > { %v6560_v30 = vpop.f32.mrb[127].mxu1 }
 0xd64   : > { %5081 = vst [vmem:[%s8631_s20 + $0x158] sm:$0xff] %v5025_v52 }
 0xd65   : > { %v4897_v45 = vpop.f32.mrb[216].mxu0 }
 0xd66   : > { %v4898_v54 = vadd.f32 %v4897_v45, %v4628_v18  ;;  %v6635_v21 = vpop.f32.mrb[217].mxu0 }
 0xd67   : > { %v4900_v55 = vpop.f32.mrb[218].mxu0 }
 0xd68   : > { %v5027_v16 = vadd.f32 %v4971_v53, %v4898_v54  ;;  %v4901_v36 = vadd.f32 %v4900_v55, %v4631_v33  ;;  %v4636_v50 = vpop.f32.mrb[128].mxu1  ;;  %v6636_v56 = vpop.f32.mrb[219].mxu0 }
 0xd69   : > { %v6563_v57 = vpop.f32.mrb[129].mxu1 }
 0xd6a   : > { %5083 = vst [vmem:[%s8631_s20 + $0x168] sm:$0xff] %v5027_v16  ;;  %v5029_v58 = vadd.f32 %v4973_v17, %v4901_v36  ;;  %v4639_v44 = vpop.f32.mrb[130].mxu1 }
 0xd6b   : > { %v6564_v19 = vpop.f32.mrb[131].mxu1 }
 0xd6c   : > { %5085 = vst [vmem:[%s8631_s20 + $0x178] sm:$0xff] %v5029_v58 }
 0xd6d   : > { %v4905_v59 = vpop.f32.mrb[220].mxu0 }
 0xd6e   : > { %v4906_v23 = vadd.f32 %v4905_v59, %v4636_v50  ;;  %v6639_v37 = vpop.f32.mrb[221].mxu0 }
 0xd6f   : > { %v4908_v31 = vpop.f32.mrb[222].mxu0 }
 0xd70   : > { %v5031_v62 = vadd.f32 %v4975_v60, %v4906_v23  ;;  %v4909_v43 = vadd.f32 %v4908_v31, %v4639_v44  ;;  %v4644_v63 = vpop.f32.mrb[132].mxu1  ;;  %v6640_v49 = vpop.f32.mrb[223].mxu0 }
 0xd71   : > { %v6567_v0 = vpop.f32.mrb[133].mxu1 }
 0xd72   : > { %5087 = vst [vmem:[%s8631_s20 + $0x188] sm:$0xff] %v5031_v62  ;;  %v5033_v1 = vadd.f32 %v4977_v61, %v4909_v43  ;;  %v4647_v2 = vpop.f32.mrb[134].mxu1 }
 0xd73   : > { %v6568_v35 = vpop.f32.mrb[135].mxu1 }
 0xd74   : > { %5089 = vst [vmem:[%s8631_s20 + $0x198] sm:$0xff] %v5033_v1 }
 0xd75   : > { %v4913_v20 = vpop.f32.mrb[224].mxu0 }
 0xd76   : > { %v4914_v28 = vadd.f32 %v4913_v20, %v4644_v63  ;;  %v6643_v3 = vpop.f32.mrb[225].mxu0 }
 0xd77   : > { %v4916_v4 = vpop.f32.mrb[226].mxu0 }
 0xd78   : > { %v5035_v6 = vadd.f32 %v4979_v29, %v4914_v28  ;;  %v4917_v7 = vadd.f32 %v4916_v4, %v4647_v2  ;;  %v4652_v8 = vpop.f32.mrb[136].mxu1  ;;  %v6644_v9 = vpop.f32.mrb[227].mxu0 }
 0xd79   : > { %v6571_v10 = vpop.f32.mrb[137].mxu1 }
 0xd7a   : > { %5091 = vst [vmem:[%s8631_s20 + $0x1a8] sm:$0xff] %v5035_v6  ;;  %v5037_v11 = vadd.f32 %v4981_v5, %v4917_v7  ;;  %v4654_v24 = vpop.f32.mrb[138].mxu1 }
 0xd7b   : > { %v6572_v25 = vpop.f32.mrb[139].mxu1 }
 0xd7c   : > { %5093 = vst [vmem:[%s8631_s20 + $0x1b8] sm:$0xff] %v5037_v11 }
 0xd80   : > { %v4921_v27 = vpop.f32.mrb[140].mxu1 }
 0xd81   : > { %v6647_v12 = vpop.f32.mrb[141].mxu1 }
 0xd82   : > { %v4923_v13 = vpop.f32.mrb[142].mxu1 }
 0xd83   : > { %v6648_v14 = vpop.f32.mrb[143].mxu1 }
 0xd84 PF: > { %s25_s18 = sadd.s32 1, %s6920_s18  }
 0xd85   : > { %p22_p4 = scmp.ge.s32.totalorder %s25_s18, 4  }
 0xd87   :  { %24 = sbr.rel (!%p22_p4) target bundleno = 1 (0x1), region = 120 }

</bundles_post_ra>
